<compile_context>
chip_gen: v7x
topology: tpu7x:2x2x1
jax: 0.10.0
libtpu: 0.0.40
codegen_flags: <defaults>
</compile_context>

<pallas_src>
import functools

import jax
import jax.numpy as jnp
from jax.experimental import pallas as pl
from jax.experimental.pallas import tpu as pltpu


# ----------------------------------------------------------------------------
# Blocked Pallas matmul kernel with fused  act(acc * scale + bias)  epilogue.
# scale/bias are packed into one (8, tn) f32 block: row 0 = scale, row 1 = bias.
# ----------------------------------------------------------------------------
def _mm_kernel(a_ref, b_ref, sb_ref, o_ref, acc_ref, *, act, slope):
    k = pl.program_id(2)

    @pl.when(k == 0)
    def _():
        acc_ref[...] = jnp.zeros_like(acc_ref)

    acc_ref[...] += jnp.dot(a_ref[...], b_ref[...],
                            preferred_element_type=jnp.float32)

    @pl.when(k == pl.num_programs(2) - 1)
    def _():
        y = acc_ref[...] * sb_ref[0:1, :] + sb_ref[1:2, :]
        if act == "leaky":
            y = jnp.where(y >= 0.0, y, slope * y)
        o_ref[...] = y.astype(o_ref.dtype)


def _round_up(x, m):
    return (x + m - 1) // m * m


def _pick_tile_m(m, cap=512):
    # Multiple of 16 (bf16 sublane packing), sized to minimize M padding.
    nblk = -(-m // cap)
    tm = _round_up(-(-m // nblk), 16)
    return tm, _round_up(m, tm)


def matmul_act(a, b, *, scale=None, bias=None, act="none", slope=0.01,
               out_dtype=jnp.bfloat16):
    """act((a @ b) * scale + bias), computed with bf16 MXU operands."""
    M, K = a.shape
    K2, N = b.shape
    assert K == K2
    f32, bf16 = jnp.float32, jnp.bfloat16

    s = jnp.ones((N,), f32) if scale is None else scale.astype(f32)
    bb = jnp.zeros((N,), f32) if bias is None else bias.astype(f32)

    # Tile selection: keep K and N fully VMEM-resident when small so the
    # weight is DMA'd once per layer; M is blocked (cap 512) and marked
    # "parallel" so large-M layers shard across TensorCores.
    tm, Mp = _pick_tile_m(M)
    Np = _round_up(N, 128)
    tn = Np if Np <= 512 else 256
    Np = _round_up(N, tn)
    Kp = _round_up(K, 128)
    tk = Kp if Kp <= 2048 else 512
    Kp = _round_up(K, tk)

    a_p = jnp.pad(a.astype(bf16), ((0, Mp - M), (0, Kp - K)))
    b_p = jnp.pad(b.astype(bf16), ((0, Kp - K), (0, Np - N)))

    sb = jnp.zeros((8, Np), f32)
    sb = sb.at[0, :N].set(s)
    sb = sb.at[1, :N].set(bb)

    kernel = functools.partial(_mm_kernel, act=act, slope=slope)
    out = pl.pallas_call(
        kernel,
        out_shape=jax.ShapeDtypeStruct((Mp, Np), out_dtype),
        grid_spec=pltpu.PrefetchScalarGridSpec(
            num_scalar_prefetch=0,
            grid=(Mp // tm, Np // tn, Kp // tk),
            in_specs=[
                pl.BlockSpec((tm, tk), lambda i, j, k: (i, k)),
                pl.BlockSpec((tk, tn), lambda i, j, k: (k, j)),
                pl.BlockSpec((8, tn), lambda i, j, k: (0, j)),
            ],
            out_specs=pl.BlockSpec((tm, tn), lambda i, j, k: (i, j)),
            scratch_shapes=[pltpu.VMEM((tm, tn), jnp.float32)],
        ),
        compiler_params=pltpu.CompilerParams(
            dimension_semantics=("parallel", "parallel", "arbitrary")),
    )(a_p, b_p, sb)
    return out[:M, :N]


# ----------------------------------------------------------------------------
# Fused dense-tail kernel: a whole chain of small Linear(+BN+LeakyReLU) layers
# computed in one pallas_call, with every weight fully VMEM-resident.
# sb_ref packs (scale, bias) rows per layer: rows 2i / 2i+1 for layer i.
# ----------------------------------------------------------------------------
def _fused_mlp_kernel(*refs, acts, slope):
    L = len(acts)
    x_ref = refs[0]
    w_refs = refs[1:1 + L]
    sb_ref = refs[1 + L]
    o_ref = refs[2 + L]

    h = x_ref[...]
    for i, (w_ref, act) in enumerate(zip(w_refs, acts)):
        n = w_ref.shape[1]
        y = jnp.dot(h, w_ref[...], preferred_element_type=jnp.float32)
        y = y * sb_ref[2 * i:2 * i + 1, :n] + sb_ref[2 * i + 1:2 * i + 2, :n]
        if act:
            y = jnp.where(y >= 0.0, y, slope * y)
        h = y.astype(jnp.bfloat16) if i + 1 < L else y
    o_ref[...] = h.astype(o_ref.dtype)


def fused_mlp(x, layers, *, slope=0.01, out_dtype=jnp.float32):
    """layers: list of (W (K,N), scale (N,)|None, bias (N,)|None, act bool)."""
    f32, bf16 = jnp.float32, jnp.bfloat16
    M, K = x.shape
    Mp = _round_up(max(M, 8), 8)
    Kp = _round_up(K, 128)
    x_p = jnp.pad(x.astype(bf16), ((0, Mp - M), (0, Kp - K)))

    L = len(layers)
    w_ps, nps, acts = [], [], []
    k_in = Kp
    for (W, s, b, act) in layers:
        k, n = W.shape
        npad = _round_up(n, 128)
        w_ps.append(jnp.pad(W.astype(bf16), ((0, k_in - k), (0, npad - n))))
        nps.append((n, npad))
        acts.append(bool(act))
        k_in = npad

    max_np = max(npad for _, npad in nps)
    sb = jnp.zeros((_round_up(2 * L, 8), max_np), f32)
    for i, (W, s, b, _) in enumerate(layers):
        n = W.shape[1]
        s_arr = jnp.ones((n,), f32) if s is None else s.astype(f32)
        b_arr = jnp.zeros((n,), f32) if b is None else b.astype(f32)
        sb = sb.at[2 * i, :n].set(s_arr)
        sb = sb.at[2 * i + 1, :n].set(b_arr)

    kernel = functools.partial(_fused_mlp_kernel, acts=tuple(acts), slope=slope)
    vmem = pl.BlockSpec(memory_space=pltpu.MemorySpace.VMEM)
    out = pl.pallas_call(
        kernel,
        out_shape=jax.ShapeDtypeStruct((Mp, nps[-1][1]), out_dtype),
        in_specs=[vmem] * (1 + L + 1),
        out_specs=vmem,
    )(x_p, *w_ps, sb)
    return out[:M, :nps[-1][0]]


# ----------------------------------------------------------------------------
# Plain-JAX glue: im2col patch extraction, max-pool, layer wrappers.
# ----------------------------------------------------------------------------
def im2col(x, kh, kw, stride=1):
    # x: (B, H, W, C) -> (B*OH*OW, kh*kw*C), ordering (kh, kw, C).
    B, H, W, C = x.shape
    OH = (H - kh) // stride + 1
    OW = (W - kw) // stride + 1
    cols = []
    for i in range(kh):
        for j in range(kw):
            cols.append(x[:, i:i + stride * OH:stride,
                          j:j + stride * OW:stride, :])
    patches = jnp.concatenate(cols, axis=-1)
    return patches.reshape(B * OH * OW, kh * kw * C), OH, OW


def maxpool2x2(x):
    B, H, W, C = x.shape
    H2, W2 = H // 2, W // 2
    return x[:, :H2 * 2, :W2 * 2, :].reshape(B, H2, 2, W2, 2, C).max(axis=(2, 4))


def bn_identity(n, eps=1e-5):
    # eval-mode BN with fresh running stats: y = x / sqrt(1 + eps)
    s = jnp.full((n,), 1.0 / (1.0 + eps) ** 0.5, jnp.float32)
    b = jnp.zeros((n,), jnp.float32)
    return s, b


def conv_bn_lrelu(x, w, bn, slope=0.01):
    # Conv2d (valid, stride 1, no bias) -> BN(eval) -> LeakyReLU, NHWC, bf16 out.
    B = x.shape[0]
    Cout, Cin, kh, kw = w.shape
    patches, OH, OW = im2col(x, kh, kw, 1)
    w_mat = jnp.transpose(w, (2, 3, 1, 0)).reshape(kh * kw * Cin, Cout)
    s, beta = bn
    y = matmul_act(patches, w_mat, scale=s, bias=beta, act="leaky", slope=slope)
    return y.reshape(B, OH, OW, Cout)


def block_diag2(A, B):
    ka, na = A.shape
    kb, nb = B.shape
    top = jnp.concatenate([A, jnp.zeros((ka, nb), A.dtype)], axis=1)
    bot = jnp.concatenate([jnp.zeros((kb, na), B.dtype), B], axis=1)
    return jnp.concatenate([top, bot], axis=0)


# ----------------------------------------------------------------------------
# Regressor forward
# ----------------------------------------------------------------------------
def regressor_forward(params, x_nchw):
    p = params
    slope = 0.01
    x = jnp.transpose(x_nchw, (0, 2, 3, 1)).astype(jnp.bfloat16)  # NCHW -> NHWC

    # Conv stack (4 Pallas matmul calls).
    h = conv_bn_lrelu(x, p["c1"], p["bn1"], slope)
    h = conv_bn_lrelu(h, p["c2"], p["bn2"], slope)
    h = maxpool2x2(h)
    h = conv_bn_lrelu(h, p["c3"], p["bn3"], slope)
    h = conv_bn_lrelu(h, p["c4"], p["bn4"], slope)
    h = maxpool2x2(h)

    B = h.shape[0]
    feat = jnp.transpose(h, (0, 3, 1, 2)).reshape(B, -1)   # NCHW flatten order

    # Dense tail: MLP([feat,64,256]) + both mean/logvar heads, fused into ONE
    # Pallas kernel.  Heads are packed side-by-side then block-diagonally.
    pm, pv = p["mean"], p["logvar"]
    s0, be0 = p["mlp_bn0"]
    s1, be1 = p["mlp_bn1"]
    layers = [
        (p["mlp_w0"].T, s0, p["mlp_b0"] * s0 + be0, True),
        (p["mlp_w1"].T, s1, p["mlp_b1"] * s1 + be1, True),
        (jnp.concatenate([pm["w0"].T, pv["w0"].T], axis=1),
         jnp.concatenate([pm["bn0"][0], pv["bn0"][0]]),
         jnp.concatenate([pm["b0"] * pm["bn0"][0] + pm["bn0"][1],
                          pv["b0"] * pv["bn0"][0] + pv["bn0"][1]]), True),
        (block_diag2(pm["w1"].T, pv["w1"].T),
         jnp.concatenate([pm["bn1"][0], pv["bn1"][0]]),
         jnp.concatenate([pm["b1"] * pm["bn1"][0] + pm["bn1"][1],
                          pv["b1"] * pv["bn1"][0] + pv["bn1"][1]]), True),
        (block_diag2(pm["w2"].T, pv["w2"].T), None,
         jnp.concatenate([pm["b2"], pv["b2"]]), False),
    ]

    # If the flattened feature dim is huge, do the first (feat -> 64) layer
    # with the blocked matmul kernel and fuse only the rest (VMEM safety).
    if feat.shape[1] > 16384:
        W0, sc0, bi0, _ = layers[0]
        feat = matmul_act(feat, W0, scale=sc0, bias=bi0, act="leaky", slope=slope)
        layers = layers[1:]

    out = fused_mlp(feat, layers, slope=slope, out_dtype=jnp.float32)
    return out[:, 0:1], out[:, 1:2]           # (mean, logvar)


# ----------------------------------------------------------------------------
# Deterministic parameter initialization (shapes from the nn.Module __init__)
# ----------------------------------------------------------------------------
class KeyGen:
    def __init__(self, key):
        self.key = key

    def __call__(self):
        self.key, k = jax.random.split(self.key)
        return k


def init_params(c, feat_dim, npred=4, seed=0):
    kg = KeyGen(jax.random.PRNGKey(seed))
    W = lambda *shape: jax.random.normal(kg(), shape, jnp.float32) * 0.05
    bvec = lambda n: jax.random.normal(kg(), (n,), jnp.float32) * 0.01

    def head():
        return dict(
            w0=W(16, 256), b0=bvec(16), bn0=bn_identity(16),
            w1=W(npred, 16), b1=bvec(npred), bn1=bn_identity(npred),
            w2=W(1, npred), b2=bvec(1),
        )

    return dict(
        c1=W(16, c, 5, 5), bn1=bn_identity(16),
        c2=W(32, 16, 5, 5), bn2=bn_identity(32),
        c3=W(64, 32, 3, 3), bn3=bn_identity(64),
        c4=W(64, 64, 3, 3), bn4=bn_identity(64),
        mlp_w0=W(64, feat_dim), mlp_b0=bvec(64), mlp_bn0=bn_identity(64),
        mlp_w1=W(256, 64), mlp_b1=bvec(256), mlp_bn1=bn_identity(256),
        mean=head(), logvar=head(),
    )


# ----------------------------------------------------------------------------
if __name__ == "__main__":
    B, C, H, Wd = 2, 3, 24, 24      # Regressor arithmetic needs H, W >= 22
    npred = 4

    key = jax.random.PRNGKey(0)
    kx, _ = jax.random.split(key)
    x = jax.random.normal(kx, (B, C, H, Wd), jnp.float32)

    ww = ((Wd - 8) // 2 - 4) // 2
    hh = ((H - 8) // 2 - 4) // 2
    params = init_params(C, ww * hh * 64, npred, seed=0)

    fwd = jax.jit(regressor_forward)
    mean, logvar = jax.block_until_ready(fwd(params, x))

    assert mean.shape == (B, 1), mean.shape
    assert logvar.shape == (B, 1), logvar.shape
    assert bool(jnp.all(jnp.isfinite(mean)))
    assert bool(jnp.all(jnp.isfinite(logvar)))
    print("KERNEL_OK")
</pallas_src>

<mosaic_0001>
module attributes {stable_mosaic.version = 11 : i64} {
  func.func @_mm_kernel(%arg0: i32, %arg1: i32, %arg2: i32, %arg3: memref<400x128xbf16, #tpu.memory_space<vmem>>, %arg4: memref<128x128xbf16, #tpu.memory_space<vmem>>, %arg5: memref<8x128xf32, #tpu.memory_space<vmem>>, %arg6: memref<400x128xbf16, #tpu.memory_space<vmem>>, %arg7: memref<400x128xf32, #tpu.memory_space<vmem>>) attributes {dimension_semantics = [#tpu.dimension_semantics<parallel>, #tpu.dimension_semantics<parallel>, #tpu.dimension_semantics<arbitrary>], iteration_bounds = array<i64: 2, 1, 1>, scalar_prefetch = 0 : i64, scratch_operands = 1 : i64, tpu.core_type = #tpu.core_type<tc>, window_params = [{transform_indices = @transform_0, window_bounds = array<i64: 400, 128>}, {transform_indices = @transform_1, window_bounds = array<i64: 128, 128>}, {transform_indices = @transform_2, window_bounds = array<i64: 8, 128>}, {transform_indices = @transform_3, window_bounds = array<i64: 400, 128>}]} {
    %c0_i32 = arith.constant 0 : i32
    %0 = arith.cmpi eq, %arg2, %c0_i32 : i32
    %1 = arith.extui %0 : i1 to i32
    %c0_i32_0 = arith.constant 0 : i32
    %2 = arith.cmpi ne, %1, %c0_i32_0 : i32
    scf.if %2 {
      %cst_10 = arith.constant 0.000000e+00 : f32
      %12 = vector.broadcast %cst_10 : f32 to vector<400x128xf32>
      %c0_11 = arith.constant 0 : index
      %c0_12 = arith.constant 0 : index
      %13 = vector.load %arg7[%c0_11, %c0_12] : memref<400x128xf32, #tpu.memory_space<vmem>>, vector<400x128xf32>
      tpu.vector_store %arg7[%c0_11, %c0_12], %12 {strides = array<i32>} : memref<400x128xf32, #tpu.memory_space<vmem>>, vector<400x128xf32>,
    } else {
    }
    %c0 = arith.constant 0 : index
    %c0_1 = arith.constant 0 : index
    %3 = vector.load %arg7[%c0, %c0_1] : memref<400x128xf32, #tpu.memory_space<vmem>>, vector<400x128xf32>
    %c0_2 = arith.constant 0 : index
    %c0_3 = arith.constant 0 : index
    %4 = vector.load %arg3[%c0_2, %c0_3] : memref<400x128xbf16, #tpu.memory_space<vmem>>, vector<400x128xbf16>
    %c0_4 = arith.constant 0 : index
    %c0_5 = arith.constant 0 : index
    %5 = vector.load %arg4[%c0_4, %c0_5] : memref<128x128xbf16, #tpu.memory_space<vmem>>, vector<128x128xbf16>
    %cst = arith.constant dense<0.000000e+00> : vector<400x128xf32>
    %6 = tpu.matmul %4, %5, %cst {dimension_numbers = #tpu.dot_dimension_numbers<[1], [0], [0], [1], [0, 0, 1, 1], [], []>} : vector<400x128xbf16>, vector<128x128xbf16>, vector<400x128xf32> -> vector<400x128xf32>
    %7 = arith.addf %3, %6 : vector<400x128xf32>
    %c0_6 = arith.constant 0 : index
    %c0_7 = arith.constant 0 : index
    %8 = vector.load %arg7[%c0_6, %c0_7] : memref<400x128xf32, #tpu.memory_space<vmem>>, vector<400x128xf32>
    tpu.vector_store %arg7[%c0_6, %c0_7], %7 {strides = array<i32>} : memref<400x128xf32, #tpu.memory_space<vmem>>, vector<400x128xf32>,
    %c0_i32_8 = arith.constant 0 : i32
    %9 = arith.cmpi eq, %arg2, %c0_i32_8 : i32
    %10 = arith.extui %9 : i1 to i32
    %c0_i32_9 = arith.constant 0 : i32
    %11 = arith.cmpi ne, %10, %c0_i32_9 : i32
    scf.if %11 {
      %c0_10 = arith.constant 0 : index
      %c0_11 = arith.constant 0 : index
      %12 = vector.load %arg7[%c0_10, %c0_11] : memref<400x128xf32, #tpu.memory_space<vmem>>, vector<400x128xf32>
      %c0_12 = arith.constant 0 : index
      %c0_13 = arith.constant 0 : index
      %13 = vector.load %arg5[%c0_12, %c0_13] : memref<8x128xf32, #tpu.memory_space<vmem>>, vector<1x128xf32>
      %14 = vector.broadcast %13 : vector<1x128xf32> to vector<400x128xf32>
      %15 = arith.mulf %12, %14 : vector<400x128xf32>
      %c1 = arith.constant 1 : index
      %c0_14 = arith.constant 0 : index
      %16 = vector.load %arg5[%c1, %c0_14] : memref<8x128xf32, #tpu.memory_space<vmem>>, vector<1x128xf32>
      %17 = vector.broadcast %16 : vector<1x128xf32> to vector<400x128xf32>
      %18 = arith.addf %15, %17 : vector<400x128xf32>
      %cst_15 = arith.constant 0.000000e+00 : f32
      %19 = vector.broadcast %cst_15 : f32 to vector<400x128xf32>
      %20 = arith.cmpf oge, %18, %19 : vector<400x128xf32>
      %cst_16 = arith.constant 0.00999999977 : f32
      %21 = vector.broadcast %cst_16 : f32 to vector<400x128xf32>
      %22 = arith.mulf %21, %18 : vector<400x128xf32>
      %23 = arith.select %20, %18, %22 : vector<400x128xi1>, vector<400x128xf32>
      %24 = arith.truncf %23 : vector<400x128xf32> to vector<400x128xbf16>
      %c0_17 = arith.constant 0 : index
      %c0_18 = arith.constant 0 : index
      %25 = vector.load %arg6[%c0_17, %c0_18] : memref<400x128xbf16, #tpu.memory_space<vmem>>, vector<400x128xbf16>
      tpu.vector_store %arg6[%c0_17, %c0_18], %24 {strides = array<i32>} : memref<400x128xbf16, #tpu.memory_space<vmem>>, vector<400x128xbf16>,
    } else {
    }
    return
  }
  func.func @transform_0(%arg0: i32, %arg1: i32, %arg2: i32) -> (i32, i32) {
    %c0_i32 = arith.constant 0 : i32
    return %arg0, %arg2 : i32, i32
  }
  func.func @transform_1(%arg0: i32, %arg1: i32, %arg2: i32) -> (i32, i32) {
    %c0_i32 = arith.constant 0 : i32
    return %arg2, %arg1 : i32, i32
  }
  func.func @transform_2(%arg0: i32, %arg1: i32, %arg2: i32) -> (i32, i32) {
    %c0_i32 = arith.constant 0 : i32
    %c0_i32_0 = arith.constant 0 : i32
    return %c0_i32, %arg1 : i32, i32
  }
  func.func @transform_3(%arg0: i32, %arg1: i32, %arg2: i32) -> (i32, i32) {
    %c0_i32 = arith.constant 0 : i32
    return %arg0, %arg1 : i32, i32
  }
}

module attributes {stable_mosaic.version = 11 : i64} {
  func.func @_mm_kernel(%arg0: i32, %arg1: i32, %arg2: i32, %arg3: memref<512x512xbf16, #tpu.memory_space<vmem>>, %arg4: memref<512x128xbf16, #tpu.memory_space<vmem>>, %arg5: memref<8x128xf32, #tpu.memory_space<vmem>>, %arg6: memref<512x128xbf16, #tpu.memory_space<vmem>>, %arg7: memref<512x128xf32, #tpu.memory_space<vmem>>) attributes {dimension_semantics = [#tpu.dimension_semantics<parallel>, #tpu.dimension_semantics<parallel>, #tpu.dimension_semantics<arbitrary>], iteration_bounds = array<i64: 1, 1, 1>, scalar_prefetch = 0 : i64, scratch_operands = 1 : i64, tpu.core_type = #tpu.core_type<tc>, window_params = [{transform_indices = @transform_0, window_bounds = array<i64: 512, 512>}, {transform_indices = @transform_1, window_bounds = array<i64: 512, 128>}, {transform_indices = @transform_2, window_bounds = array<i64: 8, 128>}, {transform_indices = @transform_3, window_bounds = array<i64: 512, 128>}]} {
    %c0_i32 = arith.constant 0 : i32
    %0 = arith.cmpi eq, %arg2, %c0_i32 : i32
    %1 = arith.extui %0 : i1 to i32
    %c0_i32_0 = arith.constant 0 : i32
    %2 = arith.cmpi ne, %1, %c0_i32_0 : i32
    scf.if %2 {
      %cst_10 = arith.constant 0.000000e+00 : f32
      %12 = vector.broadcast %cst_10 : f32 to vector<512x128xf32>
      %c0_11 = arith.constant 0 : index
      %c0_12 = arith.constant 0 : index
      %13 = vector.load %arg7[%c0_11, %c0_12] : memref<512x128xf32, #tpu.memory_space<vmem>>, vector<512x128xf32>
      tpu.vector_store %arg7[%c0_11, %c0_12], %12 {strides = array<i32>} : memref<512x128xf32, #tpu.memory_space<vmem>>, vector<512x128xf32>,
    } else {
    }
    %c0 = arith.constant 0 : index
    %c0_1 = arith.constant 0 : index
    %3 = vector.load %arg7[%c0, %c0_1] : memref<512x128xf32, #tpu.memory_space<vmem>>, vector<512x128xf32>
    %c0_2 = arith.constant 0 : index
    %c0_3 = arith.constant 0 : index
    %4 = vector.load %arg3[%c0_2, %c0_3] : memref<512x512xbf16, #tpu.memory_space<vmem>>, vector<512x512xbf16>
    %c0_4 = arith.constant 0 : index
    %c0_5 = arith.constant 0 : index
    %5 = vector.load %arg4[%c0_4, %c0_5] : memref<512x128xbf16, #tpu.memory_space<vmem>>, vector<512x128xbf16>
    %cst = arith.constant dense<0.000000e+00> : vector<512x128xf32>
    %6 = tpu.matmul %4, %5, %cst {dimension_numbers = #tpu.dot_dimension_numbers<[1], [0], [0], [1], [0, 0, 1, 1], [], []>} : vector<512x512xbf16>, vector<512x128xbf16>, vector<512x128xf32> -> vector<512x128xf32>
    %7 = arith.addf %3, %6 : vector<512x128xf32>
    %c0_6 = arith.constant 0 : index
    %c0_7 = arith.constant 0 : index
    %8 = vector.load %arg7[%c0_6, %c0_7] : memref<512x128xf32, #tpu.memory_space<vmem>>, vector<512x128xf32>
    tpu.vector_store %arg7[%c0_6, %c0_7], %7 {strides = array<i32>} : memref<512x128xf32, #tpu.memory_space<vmem>>, vector<512x128xf32>,
    %c0_i32_8 = arith.constant 0 : i32
    %9 = arith.cmpi eq, %arg2, %c0_i32_8 : i32
    %10 = arith.extui %9 : i1 to i32
    %c0_i32_9 = arith.constant 0 : i32
    %11 = arith.cmpi ne, %10, %c0_i32_9 : i32
    scf.if %11 {
      %c0_10 = arith.constant 0 : index
      %c0_11 = arith.constant 0 : index
      %12 = vector.load %arg7[%c0_10, %c0_11] : memref<512x128xf32, #tpu.memory_space<vmem>>, vector<512x128xf32>
      %c0_12 = arith.constant 0 : index
      %c0_13 = arith.constant 0 : index
      %13 = vector.load %arg5[%c0_12, %c0_13] : memref<8x128xf32, #tpu.memory_space<vmem>>, vector<1x128xf32>
      %14 = vector.broadcast %13 : vector<1x128xf32> to vector<512x128xf32>
      %15 = arith.mulf %12, %14 : vector<512x128xf32>
      %c1 = arith.constant 1 : index
      %c0_14 = arith.constant 0 : index
      %16 = vector.load %arg5[%c1, %c0_14] : memref<8x128xf32, #tpu.memory_space<vmem>>, vector<1x128xf32>
      %17 = vector.broadcast %16 : vector<1x128xf32> to vector<512x128xf32>
      %18 = arith.addf %15, %17 : vector<512x128xf32>
      %cst_15 = arith.constant 0.000000e+00 : f32
      %19 = vector.broadcast %cst_15 : f32 to vector<512x128xf32>
      %20 = arith.cmpf oge, %18, %19 : vector<512x128xf32>
      %cst_16 = arith.constant 0.00999999977 : f32
      %21 = vector.broadcast %cst_16 : f32 to vector<512x128xf32>
      %22 = arith.mulf %21, %18 : vector<512x128xf32>
      %23 = arith.select %20, %18, %22 : vector<512x128xi1>, vector<512x128xf32>
      %24 = arith.truncf %23 : vector<512x128xf32> to vector<512x128xbf16>
      %c0_17 = arith.constant 0 : index
      %c0_18 = arith.constant 0 : index
      %25 = vector.load %arg6[%c0_17, %c0_18] : memref<512x128xbf16, #tpu.memory_space<vmem>>, vector<512x128xbf16>
      tpu.vector_store %arg6[%c0_17, %c0_18], %24 {strides = array<i32>} : memref<512x128xbf16, #tpu.memory_space<vmem>>, vector<512x128xbf16>,
    } else {
    }
    return
  }
  func.func @transform_0(%arg0: i32, %arg1: i32, %arg2: i32) -> (i32, i32) {
    %c0_i32 = arith.constant 0 : i32
    return %arg0, %arg2 : i32, i32
  }
  func.func @transform_1(%arg0: i32, %arg1: i32, %arg2: i32) -> (i32, i32) {
    %c0_i32 = arith.constant 0 : i32
    return %arg2, %arg1 : i32, i32
  }
  func.func @transform_2(%arg0: i32, %arg1: i32, %arg2: i32) -> (i32, i32) {
    %c0_i32 = arith.constant 0 : i32
    %c0_i32_0 = arith.constant 0 : i32
    return %c0_i32, %arg1 : i32, i32
  }
  func.func @transform_3(%arg0: i32, %arg1: i32, %arg2: i32) -> (i32, i32) {
    %c0_i32 = arith.constant 0 : i32
    return %arg0, %arg1 : i32, i32
  }
}

module attributes {stable_mosaic.version = 11 : i64} {
  func.func @_mm_kernel(%arg0: i32, %arg1: i32, %arg2: i32, %arg3: memref<80x384xbf16, #tpu.memory_space<vmem>>, %arg4: memref<384x128xbf16, #tpu.memory_space<vmem>>, %arg5: memref<8x128xf32, #tpu.memory_space<vmem>>, %arg6: memref<80x128xbf16, #tpu.memory_space<vmem>>, %arg7: memref<80x128xf32, #tpu.memory_space<vmem>>) attributes {dimension_semantics = [#tpu.dimension_semantics<parallel>, #tpu.dimension_semantics<parallel>, #tpu.dimension_semantics<arbitrary>], iteration_bounds = array<i64: 1, 1, 1>, scalar_prefetch = 0 : i64, scratch_operands = 1 : i64, tpu.core_type = #tpu.core_type<tc>, window_params = [{transform_indices = @transform_0, window_bounds = array<i64: 80, 384>}, {transform_indices = @transform_1, window_bounds = array<i64: 384, 128>}, {transform_indices = @transform_2, window_bounds = array<i64: 8, 128>}, {transform_indices = @transform_3, window_bounds = array<i64: 80, 128>}]} {
    %c0_i32 = arith.constant 0 : i32
    %0 = arith.cmpi eq, %arg2, %c0_i32 : i32
    %1 = arith.extui %0 : i1 to i32
    %c0_i32_0 = arith.constant 0 : i32
    %2 = arith.cmpi ne, %1, %c0_i32_0 : i32
    scf.if %2 {
      %cst_10 = arith.constant 0.000000e+00 : f32
      %12 = vector.broadcast %cst_10 : f32 to vector<80x128xf32>
      %c0_11 = arith.constant 0 : index
      %c0_12 = arith.constant 0 : index
      %13 = vector.load %arg7[%c0_11, %c0_12] : memref<80x128xf32, #tpu.memory_space<vmem>>, vector<80x128xf32>
      tpu.vector_store %arg7[%c0_11, %c0_12], %12 {strides = array<i32>} : memref<80x128xf32, #tpu.memory_space<vmem>>, vector<80x128xf32>,
    } else {
    }
    %c0 = arith.constant 0 : index
    %c0_1 = arith.constant 0 : index
    %3 = vector.load %arg7[%c0, %c0_1] : memref<80x128xf32, #tpu.memory_space<vmem>>, vector<80x128xf32>
    %c0_2 = arith.constant 0 : index
    %c0_3 = arith.constant 0 : index
    %4 = vector.load %arg3[%c0_2, %c0_3] : memref<80x384xbf16, #tpu.memory_space<vmem>>, vector<80x384xbf16>
    %c0_4 = arith.constant 0 : index
    %c0_5 = arith.constant 0 : index
    %5 = vector.load %arg4[%c0_4, %c0_5] : memref<384x128xbf16, #tpu.memory_space<vmem>>, vector<384x128xbf16>
    %cst = arith.constant dense<0.000000e+00> : vector<80x128xf32>
    %6 = tpu.matmul %4, %5, %cst {dimension_numbers = #tpu.dot_dimension_numbers<[1], [0], [0], [1], [0, 0, 1, 1], [], []>} : vector<80x384xbf16>, vector<384x128xbf16>, vector<80x128xf32> -> vector<80x128xf32>
    %7 = arith.addf %3, %6 : vector<80x128xf32>
    %c0_6 = arith.constant 0 : index
    %c0_7 = arith.constant 0 : index
    %8 = vector.load %arg7[%c0_6, %c0_7] : memref<80x128xf32, #tpu.memory_space<vmem>>, vector<80x128xf32>
    tpu.vector_store %arg7[%c0_6, %c0_7], %7 {strides = array<i32>} : memref<80x128xf32, #tpu.memory_space<vmem>>, vector<80x128xf32>,
    %c0_i32_8 = arith.constant 0 : i32
    %9 = arith.cmpi eq, %arg2, %c0_i32_8 : i32
    %10 = arith.extui %9 : i1 to i32
    %c0_i32_9 = arith.constant 0 : i32
    %11 = arith.cmpi ne, %10, %c0_i32_9 : i32
    scf.if %11 {
      %c0_10 = arith.constant 0 : index
      %c0_11 = arith.constant 0 : index
      %12 = vector.load %arg7[%c0_10, %c0_11] : memref<80x128xf32, #tpu.memory_space<vmem>>, vector<80x128xf32>
      %c0_12 = arith.constant 0 : index
      %c0_13 = arith.constant 0 : index
      %13 = vector.load %arg5[%c0_12, %c0_13] : memref<8x128xf32, #tpu.memory_space<vmem>>, vector<1x128xf32>
      %14 = vector.broadcast %13 : vector<1x128xf32> to vector<80x128xf32>
      %15 = arith.mulf %12, %14 : vector<80x128xf32>
      %c1 = arith.constant 1 : index
      %c0_14 = arith.constant 0 : index
      %16 = vector.load %arg5[%c1, %c0_14] : memref<8x128xf32, #tpu.memory_space<vmem>>, vector<1x128xf32>
      %17 = vector.broadcast %16 : vector<1x128xf32> to vector<80x128xf32>
      %18 = arith.addf %15, %17 : vector<80x128xf32>
      %cst_15 = arith.constant 0.000000e+00 : f32
      %19 = vector.broadcast %cst_15 : f32 to vector<80x128xf32>
      %20 = arith.cmpf oge, %18, %19 : vector<80x128xf32>
      %cst_16 = arith.constant 0.00999999977 : f32
      %21 = vector.broadcast %cst_16 : f32 to vector<80x128xf32>
      %22 = arith.mulf %21, %18 : vector<80x128xf32>
      %23 = arith.select %20, %18, %22 : vector<80x128xi1>, vector<80x128xf32>
      %24 = arith.truncf %23 : vector<80x128xf32> to vector<80x128xbf16>
      %c0_17 = arith.constant 0 : index
      %c0_18 = arith.constant 0 : index
      %25 = vector.load %arg6[%c0_17, %c0_18] : memref<80x128xbf16, #tpu.memory_space<vmem>>, vector<80x128xbf16>
      tpu.vector_store %arg6[%c0_17, %c0_18], %24 {strides = array<i32>} : memref<80x128xbf16, #tpu.memory_space<vmem>>, vector<80x128xbf16>,
    } else {
    }
    return
  }
  func.func @transform_0(%arg0: i32, %arg1: i32, %arg2: i32) -> (i32, i32) {
    %c0_i32 = arith.constant 0 : i32
    return %arg0, %arg2 : i32, i32
  }
  func.func @transform_1(%arg0: i32, %arg1: i32, %arg2: i32) -> (i32, i32) {
    %c0_i32 = arith.constant 0 : i32
    return %arg2, %arg1 : i32, i32
  }
  func.func @transform_2(%arg0: i32, %arg1: i32, %arg2: i32) -> (i32, i32) {
    %c0_i32 = arith.constant 0 : i32
    %c0_i32_0 = arith.constant 0 : i32
    return %c0_i32, %arg1 : i32, i32
  }
  func.func @transform_3(%arg0: i32, %arg1: i32, %arg2: i32) -> (i32, i32) {
    %c0_i32 = arith.constant 0 : i32
    return %arg0, %arg1 : i32, i32
  }
}

module attributes {stable_mosaic.version = 11 : i64} {
  func.func @_mm_kernel(%arg0: i32, %arg1: i32, %arg2: i32, %arg3: memref<32x640xbf16, #tpu.memory_space<vmem>>, %arg4: memref<640x128xbf16, #tpu.memory_space<vmem>>, %arg5: memref<8x128xf32, #tpu.memory_space<vmem>>, %arg6: memref<32x128xbf16, #tpu.memory_space<vmem>>, %arg7: memref<32x128xf32, #tpu.memory_space<vmem>>) attributes {dimension_semantics = [#tpu.dimension_semantics<parallel>, #tpu.dimension_semantics<parallel>, #tpu.dimension_semantics<arbitrary>], iteration_bounds = array<i64: 1, 1, 1>, scalar_prefetch = 0 : i64, scratch_operands = 1 : i64, tpu.core_type = #tpu.core_type<tc>, window_params = [{transform_indices = @transform_0, window_bounds = array<i64: 32, 640>}, {transform_indices = @transform_1, window_bounds = array<i64: 640, 128>}, {transform_indices = @transform_2, window_bounds = array<i64: 8, 128>}, {transform_indices = @transform_3, window_bounds = array<i64: 32, 128>}]} {
    %c0_i32 = arith.constant 0 : i32
    %0 = arith.cmpi eq, %arg2, %c0_i32 : i32
    %1 = arith.extui %0 : i1 to i32
    %c0_i32_0 = arith.constant 0 : i32
    %2 = arith.cmpi ne, %1, %c0_i32_0 : i32
    scf.if %2 {
      %cst_10 = arith.constant 0.000000e+00 : f32
      %12 = vector.broadcast %cst_10 : f32 to vector<32x128xf32>
      %c0_11 = arith.constant 0 : index
      %c0_12 = arith.constant 0 : index
      %13 = vector.load %arg7[%c0_11, %c0_12] : memref<32x128xf32, #tpu.memory_space<vmem>>, vector<32x128xf32>
      tpu.vector_store %arg7[%c0_11, %c0_12], %12 {strides = array<i32>} : memref<32x128xf32, #tpu.memory_space<vmem>>, vector<32x128xf32>,
    } else {
    }
    %c0 = arith.constant 0 : index
    %c0_1 = arith.constant 0 : index
    %3 = vector.load %arg7[%c0, %c0_1] : memref<32x128xf32, #tpu.memory_space<vmem>>, vector<32x128xf32>
    %c0_2 = arith.constant 0 : index
    %c0_3 = arith.constant 0 : index
    %4 = vector.load %arg3[%c0_2, %c0_3] : memref<32x640xbf16, #tpu.memory_space<vmem>>, vector<32x640xbf16>
    %c0_4 = arith.constant 0 : index
    %c0_5 = arith.constant 0 : index
    %5 = vector.load %arg4[%c0_4, %c0_5] : memref<640x128xbf16, #tpu.memory_space<vmem>>, vector<640x128xbf16>
    %cst = arith.constant dense<0.000000e+00> : vector<32x128xf32>
    %6 = tpu.matmul %4, %5, %cst {dimension_numbers = #tpu.dot_dimension_numbers<[1], [0], [0], [1], [0, 0, 1, 1], [], []>} : vector<32x640xbf16>, vector<640x128xbf16>, vector<32x128xf32> -> vector<32x128xf32>
    %7 = arith.addf %3, %6 : vector<32x128xf32>
    %c0_6 = arith.constant 0 : index
    %c0_7 = arith.constant 0 : index
    %8 = vector.load %arg7[%c0_6, %c0_7] : memref<32x128xf32, #tpu.memory_space<vmem>>, vector<32x128xf32>
    tpu.vector_store %arg7[%c0_6, %c0_7], %7 {strides = array<i32>} : memref<32x128xf32, #tpu.memory_space<vmem>>, vector<32x128xf32>,
    %c0_i32_8 = arith.constant 0 : i32
    %9 = arith.cmpi eq, %arg2, %c0_i32_8 : i32
    %10 = arith.extui %9 : i1 to i32
    %c0_i32_9 = arith.constant 0 : i32
    %11 = arith.cmpi ne, %10, %c0_i32_9 : i32
    scf.if %11 {
      %c0_10 = arith.constant 0 : index
      %c0_11 = arith.constant 0 : index
      %12 = vector.load %arg7[%c0_10, %c0_11] : memref<32x128xf32, #tpu.memory_space<vmem>>, vector<32x128xf32>
      %c0_12 = arith.constant 0 : index
      %c0_13 = arith.constant 0 : index
      %13 = vector.load %arg5[%c0_12, %c0_13] : memref<8x128xf32, #tpu.memory_space<vmem>>, vector<1x128xf32>
      %14 = vector.broadcast %13 : vector<1x128xf32> to vector<32x128xf32>
      %15 = arith.mulf %12, %14 : vector<32x128xf32>
      %c1 = arith.constant 1 : index
      %c0_14 = arith.constant 0 : index
      %16 = vector.load %arg5[%c1, %c0_14] : memref<8x128xf32, #tpu.memory_space<vmem>>, vector<1x128xf32>
      %17 = vector.broadcast %16 : vector<1x128xf32> to vector<32x128xf32>
      %18 = arith.addf %15, %17 : vector<32x128xf32>
      %cst_15 = arith.constant 0.000000e+00 : f32
      %19 = vector.broadcast %cst_15 : f32 to vector<32x128xf32>
      %20 = arith.cmpf oge, %18, %19 : vector<32x128xf32>
      %cst_16 = arith.constant 0.00999999977 : f32
      %21 = vector.broadcast %cst_16 : f32 to vector<32x128xf32>
      %22 = arith.mulf %21, %18 : vector<32x128xf32>
      %23 = arith.select %20, %18, %22 : vector<32x128xi1>, vector<32x128xf32>
      %24 = arith.truncf %23 : vector<32x128xf32> to vector<32x128xbf16>
      %c0_17 = arith.constant 0 : index
      %c0_18 = arith.constant 0 : index
      %25 = vector.load %arg6[%c0_17, %c0_18] : memref<32x128xbf16, #tpu.memory_space<vmem>>, vector<32x128xbf16>
      tpu.vector_store %arg6[%c0_17, %c0_18], %24 {strides = array<i32>} : memref<32x128xbf16, #tpu.memory_space<vmem>>, vector<32x128xbf16>,
    } else {
    }
    return
  }
  func.func @transform_0(%arg0: i32, %arg1: i32, %arg2: i32) -> (i32, i32) {
    %c0_i32 = arith.constant 0 : i32
    return %arg0, %arg2 : i32, i32
  }
  func.func @transform_1(%arg0: i32, %arg1: i32, %arg2: i32) -> (i32, i32) {
    %c0_i32 = arith.constant 0 : i32
    return %arg2, %arg1 : i32, i32
  }
  func.func @transform_2(%arg0: i32, %arg1: i32, %arg2: i32) -> (i32, i32) {
    %c0_i32 = arith.constant 0 : i32
    %c0_i32_0 = arith.constant 0 : i32
    return %c0_i32, %arg1 : i32, i32
  }
  func.func @transform_3(%arg0: i32, %arg1: i32, %arg2: i32) -> (i32, i32) {
    %c0_i32 = arith.constant 0 : i32
    return %arg0, %arg1 : i32, i32
  }
}

module attributes {stable_mosaic.version = 11 : i64} {
  func.func @_fused_mlp_kernel(%arg0: memref<8x256xbf16, #tpu.memory_space<vmem>>, %arg1: memref<256x128xbf16, #tpu.memory_space<vmem>>, %arg2: memref<128x256xbf16, #tpu.memory_space<vmem>>, %arg3: memref<256x128xbf16, #tpu.memory_space<vmem>>, %arg4: memref<128x128xbf16, #tpu.memory_space<vmem>>, %arg5: memref<128x128xbf16, #tpu.memory_space<vmem>>, %arg6: memref<16x256xf32, #tpu.memory_space<vmem>>, %arg7: memref<8x128xf32, #tpu.memory_space<vmem>>) attributes {dimension_semantics = [], scalar_prefetch = 0 : i64, scratch_operands = 0 : i64, tpu.core_type = #tpu.core_type<tc>} {
    %c0 = arith.constant 0 : index
    %c0_0 = arith.constant 0 : index
    %0 = vector.load %arg0[%c0, %c0_0] : memref<8x256xbf16, #tpu.memory_space<vmem>>, vector<8x256xbf16>
    %c0_1 = arith.constant 0 : index
    %c0_2 = arith.constant 0 : index
    %1 = vector.load %arg1[%c0_1, %c0_2] : memref<256x128xbf16, #tpu.memory_space<vmem>>, vector<256x128xbf16>
    %cst = arith.constant dense<0.000000e+00> : vector<8x128xf32>
    %2 = tpu.matmul %0, %1, %cst {dimension_numbers = #tpu.dot_dimension_numbers<[1], [0], [0], [1], [0, 0, 1, 1], [], []>} : vector<8x256xbf16>, vector<256x128xbf16>, vector<8x128xf32> -> vector<8x128xf32>
    %c0_3 = arith.constant 0 : index
    %c0_4 = arith.constant 0 : index
    %3 = vector.load %arg6[%c0_3, %c0_4] : memref<16x256xf32, #tpu.memory_space<vmem>>, vector<1x128xf32>
    %4 = vector.broadcast %3 : vector<1x128xf32> to vector<8x128xf32>
    %5 = arith.mulf %2, %4 : vector<8x128xf32>
    %c1 = arith.constant 1 : index
    %c0_5 = arith.constant 0 : index
    %6 = vector.load %arg6[%c1, %c0_5] : memref<16x256xf32, #tpu.memory_space<vmem>>, vector<1x128xf32>
    %7 = vector.broadcast %6 : vector<1x128xf32> to vector<8x128xf32>
    %8 = arith.addf %5, %7 : vector<8x128xf32>
    %cst_6 = arith.constant 0.000000e+00 : f32
    %9 = vector.broadcast %cst_6 : f32 to vector<8x128xf32>
    %10 = arith.cmpf oge, %8, %9 : vector<8x128xf32>
    %cst_7 = arith.constant 0.00999999977 : f32
    %11 = vector.broadcast %cst_7 : f32 to vector<8x128xf32>
    %12 = arith.mulf %11, %8 : vector<8x128xf32>
    %13 = arith.select %10, %8, %12 : vector<8x128xi1>, vector<8x128xf32>
    %14 = arith.truncf %13 : vector<8x128xf32> to vector<8x128xbf16>
    %c0_8 = arith.constant 0 : index
    %c0_9 = arith.constant 0 : index
    %15 = vector.load %arg2[%c0_8, %c0_9] : memref<128x256xbf16, #tpu.memory_space<vmem>>, vector<128x256xbf16>
    %cst_10 = arith.constant dense<0.000000e+00> : vector<8x256xf32>
    %16 = tpu.matmul %14, %15, %cst_10 {dimension_numbers = #tpu.dot_dimension_numbers<[1], [0], [0], [1], [0, 0, 1, 1], [], []>} : vector<8x128xbf16>, vector<128x256xbf16>, vector<8x256xf32> -> vector<8x256xf32>
    %c2 = arith.constant 2 : index
    %c0_11 = arith.constant 0 : index
    %17 = vector.load %arg6[%c2, %c0_11] : memref<16x256xf32, #tpu.memory_space<vmem>>, vector<1x256xf32>
    %18 = vector.broadcast %17 : vector<1x256xf32> to vector<8x256xf32>
    %19 = arith.mulf %16, %18 : vector<8x256xf32>
    %c3 = arith.constant 3 : index
    %c0_12 = arith.constant 0 : index
    %20 = vector.load %arg6[%c3, %c0_12] : memref<16x256xf32, #tpu.memory_space<vmem>>, vector<1x256xf32>
    %21 = vector.broadcast %20 : vector<1x256xf32> to vector<8x256xf32>
    %22 = arith.addf %19, %21 : vector<8x256xf32>
    %cst_13 = arith.constant 0.000000e+00 : f32
    %23 = vector.broadcast %cst_13 : f32 to vector<8x256xf32>
    %24 = arith.cmpf oge, %22, %23 : vector<8x256xf32>
    %cst_14 = arith.constant 0.00999999977 : f32
    %25 = vector.broadcast %cst_14 : f32 to vector<8x256xf32>
    %26 = arith.mulf %25, %22 : vector<8x256xf32>
    %27 = arith.select %24, %22, %26 : vector<8x256xi1>, vector<8x256xf32>
    %28 = arith.truncf %27 : vector<8x256xf32> to vector<8x256xbf16>
    %c0_15 = arith.constant 0 : index
    %c0_16 = arith.constant 0 : index
    %29 = vector.load %arg3[%c0_15, %c0_16] : memref<256x128xbf16, #tpu.memory_space<vmem>>, vector<256x128xbf16>
    %cst_17 = arith.constant dense<0.000000e+00> : vector<8x128xf32>
    %30 = tpu.matmul %28, %29, %cst_17 {dimension_numbers = #tpu.dot_dimension_numbers<[1], [0], [0], [1], [0, 0, 1, 1], [], []>} : vector<8x256xbf16>, vector<256x128xbf16>, vector<8x128xf32> -> vector<8x128xf32>
    %c4 = arith.constant 4 : index
    %c0_18 = arith.constant 0 : index
    %31 = vector.load %arg6[%c4, %c0_18] : memref<16x256xf32, #tpu.memory_space<vmem>>, vector<1x128xf32>
    %32 = vector.broadcast %31 : vector<1x128xf32> to vector<8x128xf32>
    %33 = arith.mulf %30, %32 : vector<8x128xf32>
    %c5 = arith.constant 5 : index
    %c0_19 = arith.constant 0 : index
    %34 = vector.load %arg6[%c5, %c0_19] : memref<16x256xf32, #tpu.memory_space<vmem>>, vector<1x128xf32>
    %35 = vector.broadcast %34 : vector<1x128xf32> to vector<8x128xf32>
    %36 = arith.addf %33, %35 : vector<8x128xf32>
    %cst_20 = arith.constant 0.000000e+00 : f32
    %37 = vector.broadcast %cst_20 : f32 to vector<8x128xf32>
    %38 = arith.cmpf oge, %36, %37 : vector<8x128xf32>
    %cst_21 = arith.constant 0.00999999977 : f32
    %39 = vector.broadcast %cst_21 : f32 to vector<8x128xf32>
    %40 = arith.mulf %39, %36 : vector<8x128xf32>
    %41 = arith.select %38, %36, %40 : vector<8x128xi1>, vector<8x128xf32>
    %42 = arith.truncf %41 : vector<8x128xf32> to vector<8x128xbf16>
    %c0_22 = arith.constant 0 : index
    %c0_23 = arith.constant 0 : index
    %43 = vector.load %arg4[%c0_22, %c0_23] : memref<128x128xbf16, #tpu.memory_space<vmem>>, vector<128x128xbf16>
    %cst_24 = arith.constant dense<0.000000e+00> : vector<8x128xf32>
    %44 = tpu.matmul %42, %43, %cst_24 {dimension_numbers = #tpu.dot_dimension_numbers<[1], [0], [0], [1], [0, 0, 1, 1], [], []>} : vector<8x128xbf16>, vector<128x128xbf16>, vector<8x128xf32> -> vector<8x128xf32>
    %c6 = arith.constant 6 : index
    %c0_25 = arith.constant 0 : index
    %45 = vector.load %arg6[%c6, %c0_25] : memref<16x256xf32, #tpu.memory_space<vmem>>, vector<1x128xf32>
    %46 = vector.broadcast %45 : vector<1x128xf32> to vector<8x128xf32>
    %47 = arith.mulf %44, %46 : vector<8x128xf32>
    %c7 = arith.constant 7 : index
    %c0_26 = arith.constant 0 : index
    %48 = vector.load %arg6[%c7, %c0_26] : memref<16x256xf32, #tpu.memory_space<vmem>>, vector<1x128xf32>
    %49 = vector.broadcast %48 : vector<1x128xf32> to vector<8x128xf32>
    %50 = arith.addf %47, %49 : vector<8x128xf32>
    %cst_27 = arith.constant 0.000000e+00 : f32
    %51 = vector.broadcast %cst_27 : f32 to vector<8x128xf32>
    %52 = arith.cmpf oge, %50, %51 : vector<8x128xf32>
    %cst_28 = arith.constant 0.00999999977 : f32
    %53 = vector.broadcast %cst_28 : f32 to vector<8x128xf32>
    %54 = arith.mulf %53, %50 : vector<8x128xf32>
    %55 = arith.select %52, %50, %54 : vector<8x128xi1>, vector<8x128xf32>
    %56 = arith.truncf %55 : vector<8x128xf32> to vector<8x128xbf16>
    %c0_29 = arith.constant 0 : index
    %c0_30 = arith.constant 0 : index
    %57 = vector.load %arg5[%c0_29, %c0_30] : memref<128x128xbf16, #tpu.memory_space<vmem>>, vector<128x128xbf16>
    %cst_31 = arith.constant dense<0.000000e+00> : vector<8x128xf32>
    %58 = tpu.matmul %56, %57, %cst_31 {dimension_numbers = #tpu.dot_dimension_numbers<[1], [0], [0], [1], [0, 0, 1, 1], [], []>} : vector<8x128xbf16>, vector<128x128xbf16>, vector<8x128xf32> -> vector<8x128xf32>
    %c8 = arith.constant 8 : index
    %c0_32 = arith.constant 0 : index
    %59 = vector.load %arg6[%c8, %c0_32] : memref<16x256xf32, #tpu.memory_space<vmem>>, vector<1x128xf32>
    %60 = vector.broadcast %59 : vector<1x128xf32> to vector<8x128xf32>
    %61 = arith.mulf %58, %60 : vector<8x128xf32>
    %c9 = arith.constant 9 : index
    %c0_33 = arith.constant 0 : index
    %62 = vector.load %arg6[%c9, %c0_33] : memref<16x256xf32, #tpu.memory_space<vmem>>, vector<1x128xf32>
    %63 = vector.broadcast %62 : vector<1x128xf32> to vector<8x128xf32>
    %64 = arith.addf %61, %63 : vector<8x128xf32>
    %c0_34 = arith.constant 0 : index
    %c0_35 = arith.constant 0 : index
    %65 = vector.load %arg7[%c0_34, %c0_35] : memref<8x128xf32, #tpu.memory_space<vmem>>, vector<8x128xf32>
    tpu.vector_store %arg7[%c0_34, %c0_35], %64 {strides = array<i32>} : memref<8x128xf32, #tpu.memory_space<vmem>>, vector<8x128xf32>,
    return
  }
}

</mosaic_0001>

<bundles_post_ra>
// kernel: regressor_forward.5
= control target key start
LH: loop header
LB: loop body
LE: loop exit
PB: predicated region body
PF: predicated region fallthrough
CT: control target
= control target key end

     0   :  { %s2206_s12 = smov 0   ;;  %s2208_s13 = smov 0   ;;  %s2500_s0 = inlined_call_operand.vmem [shape: bf16[800,128], index: 0, kind: input, shape index: {}]   ;;  %s2501_s1 = inlined_call_operand.vmem [shape: bf16[128,128], index: 1, kind: input, shape index: {}]   ;;  %s2502_s2 = inlined_call_operand.vmem [shape: f32[8,128], index: 2, kind: input, shape index: {}]   ;;  %s2503_s3 = inlined_call_operand.vmem [shape: bf16[800,128], index: 3, kind: output, shape index: {}]  }
   0x1   :  { %s2210_s14 = smov 0  }
   0x2 LB: > { %s32_s15 = sadd.s32 1, %s2178_s13  ;;  %p1647_p0 = scmp.ge.s32.totalorder %s2182_s14, 1  ;;  %s2182_s14 = sphi %s2210_s14, %s13_s14   ;;  %s2178_s13 = sphi %s2208_s13, %s2505_s13   ;;  %s2174_s12 = sphi %s2206_s12, %s2504_s12  }
   0x3   : > { %p34_p1 = scmp.ge.s32.totalorder %s32_s15, 2  ;;  %p189_p2 = scmp.lt.s32.totalorder %s2182_s14, 3 }
   0x5   : > { %s2507_s15 = smov (%p34_p1, %s32_s15), 0  ;;  %p190_p3 = pnand %p1647_p0, %p189_p2 }
   0x6   : > { %v2127_v0 = vld [vmem:[%s2501_s1] sm:$0xff] (!%p190_p3)   ;;  %v2184_v1 = vmov (!%p190_p3), 0.0   ;;  %v2128_v2 = vld [vmem:[%s2501_s1 + $0x8] sm:$0xff] (!%p190_p3)   ;;  %s231_s20 = smul.u32 (!%p190_p3), 50, %s2174_s12  ;;  %vm2185_vm0 = vmmov (!%p190_p3), 0   ;;  %v2129_v3 = vld [vmem:[%s2501_s1 + $0x10] sm:$0xff] (!%p190_p3)  }
   0x7   : > { %193 = sbr.rel (%p190_p3) target bundleno = 359 (0x167), region = 32  ;;  %1969 = vmatprep.subr.bf16.mxu0 (!%p190_p3), %v2184_v1  ;;  %2085 = vmatprep.subr.bf16.mxu1 (!%p190_p3), %v2184_v1  ;;  %v2130_v4 = vld [vmem:[%s2501_s1 + $0x18] sm:$0xff] (!%p190_p3)   ;;  %v2131_v5 = vld [vmem:[%s2501_s1 + $0x20] sm:$0xff] (!%p190_p3)   ;;  %v2132_v6 = vld [vmem:[%s2501_s1 + $0x28] sm:$0xff] (!%p190_p3)  }
   0x8   : > { %1970 = vmatpush3.bf16.msra.mxu0 (!%p190_p3), %v2127_v0  ;;  %2093 = vmatpush3.bf16.msra.mxu1 (!%p190_p3), %v2127_v0  ;;  %p232_p4 = scmp.lt.s32.totalorder (!%p190_p3), %s231_s20, 99  ;;  %v2133_v7 = vld [vmem:[%s2501_s1 + $0x30] sm:$0xff] (!%p190_p3)   ;;  %v2134_v8 = vld [vmem:[%s2501_s1 + $0x38] sm:$0xff] (!%p190_p3)   ;;  %v2352_v34 = vld [vmem:[%s2502_s2] ss:$0 sm:$0xff] (!%p190_p3) }
   0x9   : > { %1971 = vmatprep.subr.bf16.mxu0 (!%p190_p3), %v2184_v1  ;;  %2086 = vmatprep.subr.bf16.mxu1 (!%p190_p3), %v2184_v1  ;;  %v2357_v36 = vld [vmem:[%s2502_s2 + $0x1] ss:$0 sm:$0xff] (!%p190_p3) }
   0xa   : > { %1985 = vmatprep.mubr.msk.bf16.mxu0 (!%p190_p3), %vm2185_vm0, %v2184_v1  ;;  %2037 = vmatprep.mubr.msk.bf16.mxu1 (!%p190_p3), %vm2185_vm0, %v2184_v1 }
   0xc   : > { %1972 = vmatpush3.bf16.msra.mxu0 (!%p190_p3), %v2128_v2  ;;  %2094 = vmatpush3.bf16.msra.mxu1 (!%p190_p3), %v2128_v2 }
   0xd   : > { %1973 = vmatprep.subr.bf16.mxu0 (!%p190_p3), %v2184_v1  ;;  %2087 = vmatprep.subr.bf16.mxu1 (!%p190_p3), %v2184_v1 }
   0xe   : > { %s2509_s20 = smov (!%p232_p4, %s231_s20), 99 }
   0xf   : > { %s1648_s23 = sshll.u32 %s2509_s20, 2 }
  0x10   : > { %s2251_s26 = scalar_lea.vmem %s2500_s0, %s1648_s23  ;;  %1974 = vmatpush3.bf16.msra.mxu0 %v2129_v3  ;;  %2095 = vmatpush3.bf16.msra.mxu1 %v2129_v3  ;;  %s2372_s19 = scalar_lea.vmem %s2503_s3, %s1648_s23 }
  0x11   : > { %1975 = vmatprep.subr.bf16.mxu0 %v2184_v1  ;;  %2088 = vmatprep.subr.bf16.mxu1 %v2184_v1  ;;  %v2135_v9 = vld [vmem:[%s2251_s26] sm:$0xff]   ;;  %v2136_v10 = vld [vmem:[%s2251_s26 + $0x68] sm:$0xff]   ;;  %v2138_v12 = vld [vmem:[%s2251_s26 + $0x70] sm:$0xff]  }
  0x12   : > { %v2137_v11 = vld [vmem:[%s2251_s26 + $0x8] sm:$0xff]   ;;  %v2139_v13 = vld [vmem:[%s2251_s26 + $0x10] sm:$0xff]   ;;  %v2140_v14 = vld [vmem:[%s2251_s26 + $0x78] sm:$0xff]  }
  0x13   : > { %v2141_v15 = vld [vmem:[%s2251_s26 + $0x18] sm:$0xff]   ;;  %v2142_v16 = vld [vmem:[%s2251_s26 + $0x80] sm:$0xff]   ;;  %v2144_v18 = vld [vmem:[%s2251_s26 + $0x88] sm:$0xff]  }
  0x14   : > { %1976 = vmatpush3.bf16.msra.mxu0 %v2130_v4  ;;  %2096 = vmatpush3.bf16.msra.mxu1 %v2130_v4  ;;  %v2143_v17 = vld [vmem:[%s2251_s26 + $0x20] sm:$0xff]   ;;  %v2145_v19 = vld [vmem:[%s2251_s26 + $0x28] sm:$0xff]   ;;  %v2146_v20 = vld [vmem:[%s2251_s26 + $0x90] sm:$0xff]  }
  0x15   : > { %1977 = vmatprep.subr.bf16.mxu0 %v2184_v1  ;;  %2089 = vmatprep.subr.bf16.mxu1 %v2184_v1  ;;  %v2147_v21 = vld [vmem:[%s2251_s26 + $0x30] sm:$0xff]   ;;  %v2148_v22 = vld [vmem:[%s2251_s26 + $0x98] sm:$0xff]   ;;  %v2150_v24 = vld [vmem:[%s2251_s26 + $0xa0] sm:$0xff]  }
  0x16   : > { %v2149_v23 = vld [vmem:[%s2251_s26 + $0x38] sm:$0xff]   ;;  %v2151_v25 = vld [vmem:[%s2251_s26 + $0x40] sm:$0xff]   ;;  %v2152_v26 = vld [vmem:[%s2251_s26 + $0xa8] sm:$0xff]  }
  0x17   : > { %v2153_v27 = vld [vmem:[%s2251_s26 + $0x48] sm:$0xff]   ;;  %v2154_v28 = vld [vmem:[%s2251_s26 + $0xb0] sm:$0xff]   ;;  %v2156_v30 = vld [vmem:[%s2251_s26 + $0xb8] sm:$0xff]  }
  0x18   : > { %1978 = vmatpush3.bf16.msra.mxu0 %v2131_v5  ;;  %2097 = vmatpush3.bf16.msra.mxu1 %v2131_v5  ;;  %v2155_v29 = vld [vmem:[%s2251_s26 + $0x50] sm:$0xff]   ;;  %v2157_v31 = vld [vmem:[%s2251_s26 + $0x58] sm:$0xff]   ;;  %v2158_v32 = vld [vmem:[%s2251_s26 + $0xc0] sm:$0xff]  }
  0x19   : > { %1979 = vmatprep.subr.bf16.mxu0 %v2184_v1  ;;  %2090 = vmatprep.subr.bf16.mxu1 %v2184_v1  ;;  %v2159_v33 = vld [vmem:[%s2251_s26 + $0x60] sm:$0xff]  }
  0x1c   : > { %1980 = vmatpush3.bf16.msra.mxu0 %v2132_v6  ;;  %2098 = vmatpush3.bf16.msra.mxu1 %v2132_v6 }
  0x1d   : > { %1981 = vmatprep.subr.bf16.mxu0 %v2184_v1  ;;  %2091 = vmatprep.subr.bf16.mxu1 %v2184_v1 }
  0x20   : > { %1982 = vmatpush3.bf16.msra.mxu0 %v2133_v7  ;;  %2099 = vmatpush3.bf16.msra.mxu1 %v2133_v7 }
  0x21   : > { %1983 = vmatprep.subr.bf16.mxu0 %v2184_v1  ;;  %2092 = vmatprep.subr.bf16.mxu1 %v2184_v1 }
  0x24   : > { %1984 = vmatpush3.bf16.msra.mxu0 %v2134_v8  ;;  %2100 = vmatpush3.bf16.msra.mxu1 %v2134_v8 }
  0x27   : > { %1986 = vmatmul.mubr.bf16.vlgmr.msra.gmra.mrb[0].mxu0 %v2135_v9  ;;  %2038 = vmatmul.mubr.bf16.vlgmr.msra.gmra.mrb[0].mxu1 %v2136_v10 }
  0x28   : > { %1989 = vmatprep.mubr.msk.bf16.mxu0 %vm2185_vm0, %v2184_v1  ;;  %2041 = vmatprep.mubr.msk.bf16.mxu1 %vm2185_vm0, %v2184_v1 }
  0x2f   : > { %1990 = vmatmul.mubr.bf16.gmra.mrb[4].mxu0 %v2137_v11  ;;  %2042 = vmatmul.mubr.bf16.gmra.mrb[4].mxu1 %v2138_v12 }
  0x30   : > { %1993 = vmatprep.mubr.msk.bf16.mxu0 %vm2185_vm0, %v2184_v1  ;;  %2045 = vmatprep.mubr.msk.bf16.mxu1 %vm2185_vm0, %v2184_v1 }
  0x37   : > { %1994 = vmatmul.mubr.bf16.gmra.mrb[8].mxu0 %v2139_v13  ;;  %2046 = vmatmul.mubr.bf16.gmra.mrb[8].mxu1 %v2140_v14 }
  0x38   : > { %1997 = vmatprep.mubr.msk.bf16.mxu0 %vm2185_vm0, %v2184_v1  ;;  %2049 = vmatprep.mubr.msk.bf16.mxu1 %vm2185_vm0, %v2184_v1 }
  0x3f   : > { %1998 = vmatmul.mubr.bf16.gmra.mrb[12].mxu0 %v2141_v15  ;;  %2050 = vmatmul.mubr.bf16.gmra.mrb[12].mxu1 %v2142_v16 }
  0x40   : > { %2001 = vmatprep.mubr.msk.bf16.mxu0 %vm2185_vm0, %v2184_v1  ;;  %2053 = vmatprep.mubr.msk.bf16.mxu1 %vm2185_vm0, %v2184_v1 }
  0x47   : > { %2002 = vmatmul.mubr.bf16.gmra.mrb[16].mxu0 %v2143_v17  ;;  %2054 = vmatmul.mubr.bf16.gmra.mrb[16].mxu1 %v2144_v18 }
  0x48   : > { %2005 = vmatprep.mubr.msk.bf16.mxu0 %vm2185_vm0, %v2184_v1  ;;  %2057 = vmatprep.mubr.msk.bf16.mxu1 %vm2185_vm0, %v2184_v1 }
  0x4f   : > { %2006 = vmatmul.mubr.bf16.gmra.mrb[20].mxu0 %v2145_v19  ;;  %2058 = vmatmul.mubr.bf16.gmra.mrb[20].mxu1 %v2146_v20 }
  0x50   : > { %2009 = vmatprep.mubr.msk.bf16.mxu0 %vm2185_vm0, %v2184_v1  ;;  %2061 = vmatprep.mubr.msk.bf16.mxu1 %vm2185_vm0, %v2184_v1 }
  0x57   : > { %2010 = vmatmul.mubr.bf16.gmra.mrb[24].mxu0 %v2147_v21  ;;  %2062 = vmatmul.mubr.bf16.gmra.mrb[24].mxu1 %v2148_v22 }
  0x58   : > { %2013 = vmatprep.mubr.msk.bf16.mxu0 %vm2185_vm0, %v2184_v1  ;;  %2065 = vmatprep.mubr.msk.bf16.mxu1 %vm2185_vm0, %v2184_v1 }
  0x5f   : > { %2014 = vmatmul.mubr.bf16.gmra.mrb[28].mxu0 %v2149_v23  ;;  %2066 = vmatmul.mubr.bf16.gmra.mrb[28].mxu1 %v2150_v24 }
  0x60   : > { %2017 = vmatprep.mubr.msk.bf16.mxu0 %vm2185_vm0, %v2184_v1  ;;  %2069 = vmatprep.mubr.msk.bf16.mxu1 %vm2185_vm0, %v2184_v1 }
  0x67   : > { %2018 = vmatmul.mubr.bf16.gmra.mrb[32].mxu0 %v2151_v25  ;;  %2070 = vmatmul.mubr.bf16.gmra.mrb[32].mxu1 %v2152_v26 }
  0x68   : > { %2021 = vmatprep.mubr.msk.bf16.mxu0 %vm2185_vm0, %v2184_v1  ;;  %2073 = vmatprep.mubr.msk.bf16.mxu1 %vm2185_vm0, %v2184_v1 }
  0x6f   : > { %2022 = vmatmul.mubr.bf16.gmra.mrb[36].mxu0 %v2153_v27  ;;  %2074 = vmatmul.mubr.bf16.gmra.mrb[36].mxu1 %v2154_v28 }
  0x70   : > { %2025 = vmatprep.mubr.msk.bf16.mxu0 %vm2185_vm0, %v2184_v1  ;;  %2077 = vmatprep.mubr.msk.bf16.mxu1 %vm2185_vm0, %v2184_v1 }
  0x77   : > { %2026 = vmatmul.mubr.bf16.gmra.mrb[40].mxu0 %v2155_v29  ;;  %2078 = vmatmul.mubr.bf16.gmra.mrb[40].mxu1 %v2156_v30 }
  0x78   : > { %2029 = vmatprep.mubr.msk.bf16.mxu0 %vm2185_vm0, %v2184_v1  ;;  %2081 = vmatprep.mubr.msk.bf16.mxu1 %vm2185_vm0, %v2184_v1 }
  0x7f   : > { %2030 = vmatmul.mubr.bf16.gmra.mrb[44].mxu0 %v2157_v31  ;;  %2082 = vmatmul.mubr.bf16.gmra.mrb[44].mxu1 %v2158_v32 }
  0x80   : > { %2033 = vmatprep.mubr.msk.bf16.mxu0 %vm2185_vm0, %v2184_v1 }
  0x87   : > { %2034 = vmatmul.mubr.bf16.gmra.mrb[48].mxu0 %v2159_v33 }
  0xfa   : > { %v665_v35 = vpop.f32.mrb[0].mxu0  ;;  %v769_v37 = vpop.f32.mrb[0].mxu1 }
  0xfb   : > { %v1022_v38 = vmul.f32 %v2352_v34, %v665_v35  ;;  %v1987_v39 = vpop.f32.mrb[1].mxu0  ;;  %v1048_v40 = vmul.f32 %v2352_v34, %v769_v37  ;;  %v2039_v41 = vpop.f32.mrb[1].mxu1 }
  0xfc   : > { %v668_v42 = vpop.f32.mrb[2].mxu0  ;;  %v772_v43 = vpop.f32.mrb[2].mxu1 }
  0xfd   : > { %v1077_v44 = vadd.f32 %v2357_v36, %v1022_v38  ;;  %v1023_v45 = vmul.f32 %v2352_v34, %v668_v42  ;;  %v1988_v46 = vpop.f32.mrb[3].mxu0  ;;  %v1103_v47 = vadd.f32 %v2357_v36, %v1048_v40  ;;  %v1049_v48 = vmul.f32 %v2352_v34, %v772_v43  ;;  %v2040_v49 = vpop.f32.mrb[3].mxu1 }
  0xff   : > { %v1177_v50 = vmul.f32 0.01, %v1077_v44  ;;  %v1078_v51 = vadd.f32 %v2357_v36, %v1023_v45  ;;  %vm1153_vm1 = vcmp.ge.f32.partialorder %v1103_v47, 0.0  ;;  %vm1127_vm2 = vcmp.ge.f32.partialorder %v1077_v44, 0.0 }
 0x100   : > { %v1203_v52 = vmul.f32 0.01, %v1103_v47  ;;  %v1104_v53 = vadd.f32 %v2357_v36, %v1049_v48 }
 0x101   : > { %vm1128_vm3 = vcmp.ge.f32.partialorder %v1078_v51, 0.0  ;;  %v1178_v54 = vmul.f32 0.01, %v1078_v51  ;;  %v1227_v59 = vsel %vm1127_vm2, %v1077_v44, %v1177_v50 }
 0x102   : > { %v1253_v55 = vsel %vm1153_vm1, %v1103_v47, %v1203_v52  ;;  %vm1154_vm4 = vcmp.ge.f32.partialorder %v1104_v53, 0.0  ;;  %v1204_v56 = vmul.f32 0.01, %v1104_v53  ;;  %v673_v57 = vpop.f32.mrb[4].mxu0  ;;  %v777_v58 = vpop.f32.mrb[4].mxu1 }
 0x103   : > { %v1228_v60 = vsel %vm1128_vm3, %v1078_v51, %v1178_v54  ;;  %v1024_v61 = vmul.f32 %v2352_v34, %v673_v57  ;;  %v1991_v62 = vpop.f32.mrb[5].mxu0  ;;  %v1050_v63 = vmul.f32 %v2352_v34, %v777_v58  ;;  %v2043_v0 = vpop.f32.mrb[5].mxu1 }
 0x104   : > { %v1790_v1 = vpack.c.bf16 %v1228_v60, %v1227_v59  ;;  %v1254_v2 = vsel %vm1154_vm4, %v1104_v53, %v1204_v56  ;;  %v676_v3 = vpop.f32.mrb[6].mxu0  ;;  %v780_v4 = vpop.f32.mrb[6].mxu1 }
 0x105   : > { %v1855_v5 = vpack.c.bf16 %v1254_v2, %v1253_v55  ;;  %v1079_v6 = vadd.f32 %v2357_v36, %v1024_v61  ;;  %v1025_v7 = vmul.f32 %v2352_v34, %v676_v3  ;;  %v1992_v8 = vpop.f32.mrb[7].mxu0  ;;  %v1105_v9 = vadd.f32 %v2357_v36, %v1050_v63  ;;  %v2044_v10 = vpop.f32.mrb[7].mxu1 }
 0x106   : > { %1791 = vst [vmem:[%s2372_s19] sm:$0xff] %v1790_v1   ;;  %v1051_v11 = vmul.f32 %v2352_v34, %v780_v4 }
 0x107   : > { %1924 = vst [vmem:[%s2372_s19 + $0x68] sm:$0xff] %v1855_v5   ;;  %v1179_v12 = vmul.f32 0.01, %v1079_v6  ;;  %v1080_v13 = vadd.f32 %v2357_v36, %v1025_v7  ;;  %vm1155_vm5 = vcmp.ge.f32.partialorder %v1105_v9, 0.0  ;;  %vm1129_vm6 = vcmp.ge.f32.partialorder %v1079_v6, 0.0 }
 0x108   : > { %v1205_v14 = vmul.f32 0.01, %v1105_v9  ;;  %v1106_v15 = vadd.f32 %v2357_v36, %v1051_v11 }
 0x109   : > { %vm1130_vm7 = vcmp.ge.f32.partialorder %v1080_v13, 0.0  ;;  %v1180_v16 = vmul.f32 0.01, %v1080_v13  ;;  %v1229_v21 = vsel %vm1129_vm6, %v1079_v6, %v1179_v12 }
 0x10a   : > { %v1255_v17 = vsel %vm1155_vm5, %v1105_v9, %v1205_v14  ;;  %vm1156_vm8 = vcmp.ge.f32.partialorder %v1106_v15, 0.0  ;;  %v1206_v18 = vmul.f32 0.01, %v1106_v15  ;;  %v681_v19 = vpop.f32.mrb[8].mxu0  ;;  %v785_v20 = vpop.f32.mrb[8].mxu1 }
 0x10b   : > { %v1230_v22 = vsel %vm1130_vm7, %v1080_v13, %v1180_v16  ;;  %v1026_v23 = vmul.f32 %v2352_v34, %v681_v19  ;;  %v1995_v24 = vpop.f32.mrb[9].mxu0  ;;  %v1052_v25 = vmul.f32 %v2352_v34, %v785_v20  ;;  %v2047_v26 = vpop.f32.mrb[9].mxu1 }
 0x10c   : > { %v1795_v27 = vpack.c.bf16 %v1230_v22, %v1229_v21  ;;  %v1256_v28 = vsel %vm1156_vm8, %v1106_v15, %v1206_v18  ;;  %v684_v29 = vpop.f32.mrb[10].mxu0  ;;  %v788_v30 = vpop.f32.mrb[10].mxu1 }
 0x10d   : > { %v1860_v31 = vpack.c.bf16 %v1256_v28, %v1255_v17  ;;  %v1081_v32 = vadd.f32 %v2357_v36, %v1026_v23  ;;  %v1027_v33 = vmul.f32 %v2352_v34, %v684_v29  ;;  %v1996_v35 = vpop.f32.mrb[11].mxu0  ;;  %v1107_v37 = vadd.f32 %v2357_v36, %v1052_v25  ;;  %v2048_v38 = vpop.f32.mrb[11].mxu1 }
 0x10e   : > { %1912 = vst [vmem:[%s2372_s19 + $0x8] sm:$0xff] %v1795_v27   ;;  %v1053_v39 = vmul.f32 %v2352_v34, %v788_v30 }
 0x10f   : > { %1925 = vst [vmem:[%s2372_s19 + $0x70] sm:$0xff] %v1860_v31   ;;  %v1181_v40 = vmul.f32 0.01, %v1081_v32  ;;  %v1082_v41 = vadd.f32 %v2357_v36, %v1027_v33  ;;  %vm1157_vm9 = vcmp.ge.f32.partialorder %v1107_v37, 0.0  ;;  %vm1131_vm10 = vcmp.ge.f32.partialorder %v1081_v32, 0.0 }
 0x110   : > { %v1207_v42 = vmul.f32 0.01, %v1107_v37  ;;  %v1108_v43 = vadd.f32 %v2357_v36, %v1053_v39 }
 0x111   : > { %vm1132_vm11 = vcmp.ge.f32.partialorder %v1082_v41, 0.0  ;;  %v1182_v44 = vmul.f32 0.01, %v1082_v41  ;;  %v1231_v49 = vsel %vm1131_vm10, %v1081_v32, %v1181_v40 }
 0x112   : > { %v1257_v45 = vsel %vm1157_vm9, %v1107_v37, %v1207_v42  ;;  %vm1158_vm12 = vcmp.ge.f32.partialorder %v1108_v43, 0.0  ;;  %v1208_v46 = vmul.f32 0.01, %v1108_v43  ;;  %v689_v47 = vpop.f32.mrb[12].mxu0  ;;  %v793_v48 = vpop.f32.mrb[12].mxu1 }
 0x113   : > { %v1232_v50 = vsel %vm1132_vm11, %v1082_v41, %v1182_v44  ;;  %v1028_v51 = vmul.f32 %v2352_v34, %v689_v47  ;;  %v1999_v52 = vpop.f32.mrb[13].mxu0  ;;  %v1054_v53 = vmul.f32 %v2352_v34, %v793_v48  ;;  %v2051_v54 = vpop.f32.mrb[13].mxu1 }
 0x114   : > { %v1800_v55 = vpack.c.bf16 %v1232_v50, %v1231_v49  ;;  %v1258_v56 = vsel %vm1158_vm12, %v1108_v43, %v1208_v46  ;;  %v692_v57 = vpop.f32.mrb[14].mxu0  ;;  %v796_v58 = vpop.f32.mrb[14].mxu1 }
 0x115   : > { %v1865_v59 = vpack.c.bf16 %v1258_v56, %v1257_v45  ;;  %v1083_v60 = vadd.f32 %v2357_v36, %v1028_v51  ;;  %v1029_v61 = vmul.f32 %v2352_v34, %v692_v57  ;;  %v2000_v62 = vpop.f32.mrb[15].mxu0  ;;  %v1109_v63 = vadd.f32 %v2357_v36, %v1054_v53  ;;  %v2052_v0 = vpop.f32.mrb[15].mxu1 }
 0x116   : > { %1913 = vst [vmem:[%s2372_s19 + $0x10] sm:$0xff] %v1800_v55   ;;  %v1055_v1 = vmul.f32 %v2352_v34, %v796_v58 }
 0x117   : > { %1926 = vst [vmem:[%s2372_s19 + $0x78] sm:$0xff] %v1865_v59   ;;  %v1183_v2 = vmul.f32 0.01, %v1083_v60  ;;  %v1084_v3 = vadd.f32 %v2357_v36, %v1029_v61  ;;  %vm1159_vm13 = vcmp.ge.f32.partialorder %v1109_v63, 0.0  ;;  %vm1133_vm14 = vcmp.ge.f32.partialorder %v1083_v60, 0.0 }
 0x118   : > { %v1209_v4 = vmul.f32 0.01, %v1109_v63  ;;  %v1110_v5 = vadd.f32 %v2357_v36, %v1055_v1 }
 0x119   : > { %vm1134_vm15 = vcmp.ge.f32.partialorder %v1084_v3, 0.0  ;;  %v1184_v6 = vmul.f32 0.01, %v1084_v3  ;;  %v1233_v11 = vsel %vm1133_vm14, %v1083_v60, %v1183_v2 }
 0x11a   : > { %v1259_v7 = vsel %vm1159_vm13, %v1109_v63, %v1209_v4  ;;  %vm1160_vm0 = vcmp.ge.f32.partialorder %v1110_v5, 0.0  ;;  %v1210_v8 = vmul.f32 0.01, %v1110_v5  ;;  %v697_v9 = vpop.f32.mrb[16].mxu0  ;;  %v801_v10 = vpop.f32.mrb[16].mxu1 }
 0x11b   : > { %v1234_v12 = vsel %vm1134_vm15, %v1084_v3, %v1184_v6  ;;  %v1030_v13 = vmul.f32 %v2352_v34, %v697_v9  ;;  %v2003_v14 = vpop.f32.mrb[17].mxu0  ;;  %v1056_v15 = vmul.f32 %v2352_v34, %v801_v10  ;;  %v2055_v16 = vpop.f32.mrb[17].mxu1 }
 0x11c   : > { %v1805_v17 = vpack.c.bf16 %v1234_v12, %v1233_v11  ;;  %v1260_v18 = vsel %vm1160_vm0, %v1110_v5, %v1210_v8  ;;  %v700_v19 = vpop.f32.mrb[18].mxu0  ;;  %v804_v20 = vpop.f32.mrb[18].mxu1 }
 0x11d   : > { %v1870_v21 = vpack.c.bf16 %v1260_v18, %v1259_v7  ;;  %v1085_v22 = vadd.f32 %v2357_v36, %v1030_v13  ;;  %v1031_v23 = vmul.f32 %v2352_v34, %v700_v19  ;;  %v2004_v24 = vpop.f32.mrb[19].mxu0  ;;  %v1111_v25 = vadd.f32 %v2357_v36, %v1056_v15  ;;  %v2056_v26 = vpop.f32.mrb[19].mxu1 }
 0x11e   : > { %1914 = vst [vmem:[%s2372_s19 + $0x18] sm:$0xff] %v1805_v17   ;;  %v1057_v27 = vmul.f32 %v2352_v34, %v804_v20 }
 0x11f   : > { %1927 = vst [vmem:[%s2372_s19 + $0x80] sm:$0xff] %v1870_v21   ;;  %v1185_v28 = vmul.f32 0.01, %v1085_v22  ;;  %v1086_v29 = vadd.f32 %v2357_v36, %v1031_v23  ;;  %vm1161_vm1 = vcmp.ge.f32.partialorder %v1111_v25, 0.0  ;;  %vm1135_vm2 = vcmp.ge.f32.partialorder %v1085_v22, 0.0 }
 0x120   : > { %v1211_v30 = vmul.f32 0.01, %v1111_v25  ;;  %v1112_v31 = vadd.f32 %v2357_v36, %v1057_v27 }
 0x121   : > { %vm1136_vm3 = vcmp.ge.f32.partialorder %v1086_v29, 0.0  ;;  %v1186_v32 = vmul.f32 0.01, %v1086_v29  ;;  %v1235_v39 = vsel %vm1135_vm2, %v1085_v22, %v1185_v28 }
 0x122   : > { %v1261_v33 = vsel %vm1161_vm1, %v1111_v25, %v1211_v30  ;;  %vm1162_vm4 = vcmp.ge.f32.partialorder %v1112_v31, 0.0  ;;  %v1212_v35 = vmul.f32 0.01, %v1112_v31  ;;  %v705_v37 = vpop.f32.mrb[20].mxu0  ;;  %v809_v38 = vpop.f32.mrb[20].mxu1 }
 0x123   : > { %v1236_v40 = vsel %vm1136_vm3, %v1086_v29, %v1186_v32  ;;  %v1032_v41 = vmul.f32 %v2352_v34, %v705_v37  ;;  %v2007_v42 = vpop.f32.mrb[21].mxu0  ;;  %v1058_v43 = vmul.f32 %v2352_v34, %v809_v38  ;;  %v2059_v44 = vpop.f32.mrb[21].mxu1 }
 0x124   : > { %v1810_v45 = vpack.c.bf16 %v1236_v40, %v1235_v39  ;;  %v1262_v46 = vsel %vm1162_vm4, %v1112_v31, %v1212_v35  ;;  %v708_v47 = vpop.f32.mrb[22].mxu0  ;;  %v812_v48 = vpop.f32.mrb[22].mxu1 }
 0x125   : > { %v1875_v49 = vpack.c.bf16 %v1262_v46, %v1261_v33  ;;  %v1087_v50 = vadd.f32 %v2357_v36, %v1032_v41  ;;  %v1033_v51 = vmul.f32 %v2352_v34, %v708_v47  ;;  %v2008_v52 = vpop.f32.mrb[23].mxu0  ;;  %v1113_v53 = vadd.f32 %v2357_v36, %v1058_v43  ;;  %v2060_v54 = vpop.f32.mrb[23].mxu1 }
 0x126   : > { %1915 = vst [vmem:[%s2372_s19 + $0x20] sm:$0xff] %v1810_v45   ;;  %v1059_v55 = vmul.f32 %v2352_v34, %v812_v48 }
 0x127   : > { %1928 = vst [vmem:[%s2372_s19 + $0x88] sm:$0xff] %v1875_v49   ;;  %v1187_v56 = vmul.f32 0.01, %v1087_v50  ;;  %v1088_v57 = vadd.f32 %v2357_v36, %v1033_v51  ;;  %vm1163_vm5 = vcmp.ge.f32.partialorder %v1113_v53, 0.0  ;;  %vm1137_vm6 = vcmp.ge.f32.partialorder %v1087_v50, 0.0 }
 0x128   : > { %v1213_v58 = vmul.f32 0.01, %v1113_v53  ;;  %v1114_v59 = vadd.f32 %v2357_v36, %v1059_v55 }
 0x129   : > { %vm1138_vm7 = vcmp.ge.f32.partialorder %v1088_v57, 0.0  ;;  %v1188_v60 = vmul.f32 0.01, %v1088_v57  ;;  %v1237_v1 = vsel %vm1137_vm6, %v1087_v50, %v1187_v56 }
 0x12a   : > { %v1263_v61 = vsel %vm1163_vm5, %v1113_v53, %v1213_v58  ;;  %vm1164_vm8 = vcmp.ge.f32.partialorder %v1114_v59, 0.0  ;;  %v1214_v62 = vmul.f32 0.01, %v1114_v59  ;;  %v713_v63 = vpop.f32.mrb[24].mxu0  ;;  %v817_v0 = vpop.f32.mrb[24].mxu1 }
 0x12b   : > { %v1238_v2 = vsel %vm1138_vm7, %v1088_v57, %v1188_v60  ;;  %v1034_v3 = vmul.f32 %v2352_v34, %v713_v63  ;;  %v2011_v4 = vpop.f32.mrb[25].mxu0  ;;  %v1060_v5 = vmul.f32 %v2352_v34, %v817_v0  ;;  %v2063_v6 = vpop.f32.mrb[25].mxu1 }
 0x12c   : > { %v1815_v7 = vpack.c.bf16 %v1238_v2, %v1237_v1  ;;  %v1264_v8 = vsel %vm1164_vm8, %v1114_v59, %v1214_v62  ;;  %v716_v9 = vpop.f32.mrb[26].mxu0  ;;  %v820_v10 = vpop.f32.mrb[26].mxu1 }
 0x12d   : > { %v1880_v11 = vpack.c.bf16 %v1264_v8, %v1263_v61  ;;  %v1089_v12 = vadd.f32 %v2357_v36, %v1034_v3  ;;  %v1035_v13 = vmul.f32 %v2352_v34, %v716_v9  ;;  %v2012_v14 = vpop.f32.mrb[27].mxu0  ;;  %v1115_v15 = vadd.f32 %v2357_v36, %v1060_v5  ;;  %v2064_v16 = vpop.f32.mrb[27].mxu1 }
 0x12e   : > { %1916 = vst [vmem:[%s2372_s19 + $0x28] sm:$0xff] %v1815_v7   ;;  %v1061_v17 = vmul.f32 %v2352_v34, %v820_v10 }
 0x12f   : > { %1929 = vst [vmem:[%s2372_s19 + $0x90] sm:$0xff] %v1880_v11   ;;  %v1189_v18 = vmul.f32 0.01, %v1089_v12  ;;  %v1090_v19 = vadd.f32 %v2357_v36, %v1035_v13  ;;  %vm1165_vm9 = vcmp.ge.f32.partialorder %v1115_v15, 0.0  ;;  %vm1139_vm10 = vcmp.ge.f32.partialorder %v1089_v12, 0.0 }
 0x130   : > { %v1215_v20 = vmul.f32 0.01, %v1115_v15  ;;  %v1116_v21 = vadd.f32 %v2357_v36, %v1061_v17 }
 0x131   : > { %vm1140_vm11 = vcmp.ge.f32.partialorder %v1090_v19, 0.0  ;;  %v1190_v22 = vmul.f32 0.01, %v1090_v19  ;;  %v1239_v27 = vsel %vm1139_vm10, %v1089_v12, %v1189_v18 }
 0x132   : > { %v1265_v23 = vsel %vm1165_vm9, %v1115_v15, %v1215_v20  ;;  %vm1166_vm12 = vcmp.ge.f32.partialorder %v1116_v21, 0.0  ;;  %v1216_v24 = vmul.f32 0.01, %v1116_v21  ;;  %v721_v25 = vpop.f32.mrb[28].mxu0  ;;  %v825_v26 = vpop.f32.mrb[28].mxu1 }
 0x133   : > { %v1240_v28 = vsel %vm1140_vm11, %v1090_v19, %v1190_v22  ;;  %v1036_v29 = vmul.f32 %v2352_v34, %v721_v25  ;;  %v2015_v30 = vpop.f32.mrb[29].mxu0  ;;  %v1062_v31 = vmul.f32 %v2352_v34, %v825_v26  ;;  %v2067_v32 = vpop.f32.mrb[29].mxu1 }
 0x134   : > { %v1820_v33 = vpack.c.bf16 %v1240_v28, %v1239_v27  ;;  %v1266_v35 = vsel %vm1166_vm12, %v1116_v21, %v1216_v24  ;;  %v724_v37 = vpop.f32.mrb[30].mxu0  ;;  %v828_v38 = vpop.f32.mrb[30].mxu1 }
 0x135   : > { %v1885_v39 = vpack.c.bf16 %v1266_v35, %v1265_v23  ;;  %v1091_v40 = vadd.f32 %v2357_v36, %v1036_v29  ;;  %v1037_v41 = vmul.f32 %v2352_v34, %v724_v37  ;;  %v2016_v42 = vpop.f32.mrb[31].mxu0  ;;  %v1117_v43 = vadd.f32 %v2357_v36, %v1062_v31  ;;  %v2068_v44 = vpop.f32.mrb[31].mxu1 }
 0x136   : > { %1917 = vst [vmem:[%s2372_s19 + $0x30] sm:$0xff] %v1820_v33   ;;  %v1063_v45 = vmul.f32 %v2352_v34, %v828_v38 }
 0x137   : > { %1930 = vst [vmem:[%s2372_s19 + $0x98] sm:$0xff] %v1885_v39   ;;  %v1191_v46 = vmul.f32 0.01, %v1091_v40  ;;  %v1092_v47 = vadd.f32 %v2357_v36, %v1037_v41  ;;  %vm1167_vm13 = vcmp.ge.f32.partialorder %v1117_v43, 0.0  ;;  %vm1141_vm14 = vcmp.ge.f32.partialorder %v1091_v40, 0.0 }
 0x138   : > { %v1217_v48 = vmul.f32 0.01, %v1117_v43  ;;  %v1118_v49 = vadd.f32 %v2357_v36, %v1063_v45 }
 0x139   : > { %vm1142_vm15 = vcmp.ge.f32.partialorder %v1092_v47, 0.0  ;;  %v1192_v50 = vmul.f32 0.01, %v1092_v47  ;;  %v1241_v55 = vsel %vm1141_vm14, %v1091_v40, %v1191_v46 }
 0x13a   : > { %v1267_v51 = vsel %vm1167_vm13, %v1117_v43, %v1217_v48  ;;  %vm1168_vm0 = vcmp.ge.f32.partialorder %v1118_v49, 0.0  ;;  %v1218_v52 = vmul.f32 0.01, %v1118_v49  ;;  %v729_v53 = vpop.f32.mrb[32].mxu0  ;;  %v833_v54 = vpop.f32.mrb[32].mxu1 }
 0x13b   : > { %v1242_v56 = vsel %vm1142_vm15, %v1092_v47, %v1192_v50  ;;  %v1038_v57 = vmul.f32 %v2352_v34, %v729_v53  ;;  %v2019_v58 = vpop.f32.mrb[33].mxu0  ;;  %v1064_v59 = vmul.f32 %v2352_v34, %v833_v54  ;;  %v2071_v60 = vpop.f32.mrb[33].mxu1 }
 0x13c   : > { %v1825_v61 = vpack.c.bf16 %v1242_v56, %v1241_v55  ;;  %v1268_v62 = vsel %vm1168_vm0, %v1118_v49, %v1218_v52  ;;  %v732_v63 = vpop.f32.mrb[34].mxu0  ;;  %v836_v0 = vpop.f32.mrb[34].mxu1 }
 0x13d   : > { %v1890_v1 = vpack.c.bf16 %v1268_v62, %v1267_v51  ;;  %v1093_v2 = vadd.f32 %v2357_v36, %v1038_v57  ;;  %v1039_v3 = vmul.f32 %v2352_v34, %v732_v63  ;;  %v2020_v4 = vpop.f32.mrb[35].mxu0  ;;  %v1119_v5 = vadd.f32 %v2357_v36, %v1064_v59  ;;  %v2072_v6 = vpop.f32.mrb[35].mxu1 }
 0x13e   : > { %1918 = vst [vmem:[%s2372_s19 + $0x38] sm:$0xff] %v1825_v61   ;;  %v1065_v7 = vmul.f32 %v2352_v34, %v836_v0 }
 0x13f   : > { %1931 = vst [vmem:[%s2372_s19 + $0xa0] sm:$0xff] %v1890_v1   ;;  %v1193_v8 = vmul.f32 0.01, %v1093_v2  ;;  %v1094_v9 = vadd.f32 %v2357_v36, %v1039_v3  ;;  %vm1169_vm1 = vcmp.ge.f32.partialorder %v1119_v5, 0.0  ;;  %vm1143_vm2 = vcmp.ge.f32.partialorder %v1093_v2, 0.0 }
 0x140   : > { %v1219_v10 = vmul.f32 0.01, %v1119_v5  ;;  %v1120_v11 = vadd.f32 %v2357_v36, %v1065_v7 }
 0x141   : > { %vm1144_vm3 = vcmp.ge.f32.partialorder %v1094_v9, 0.0  ;;  %v1194_v12 = vmul.f32 0.01, %v1094_v9  ;;  %v1243_v17 = vsel %vm1143_vm2, %v1093_v2, %v1193_v8 }
 0x142   : > { %v1269_v13 = vsel %vm1169_vm1, %v1119_v5, %v1219_v10  ;;  %vm1170_vm4 = vcmp.ge.f32.partialorder %v1120_v11, 0.0  ;;  %v1220_v14 = vmul.f32 0.01, %v1120_v11  ;;  %v737_v15 = vpop.f32.mrb[36].mxu0  ;;  %v841_v16 = vpop.f32.mrb[36].mxu1 }
 0x143   : > { %v1244_v18 = vsel %vm1144_vm3, %v1094_v9, %v1194_v12  ;;  %v1040_v19 = vmul.f32 %v2352_v34, %v737_v15  ;;  %v2023_v20 = vpop.f32.mrb[37].mxu0  ;;  %v1066_v21 = vmul.f32 %v2352_v34, %v841_v16  ;;  %v2075_v22 = vpop.f32.mrb[37].mxu1 }
 0x144   : > { %v1830_v23 = vpack.c.bf16 %v1244_v18, %v1243_v17  ;;  %v1270_v24 = vsel %vm1170_vm4, %v1120_v11, %v1220_v14  ;;  %v740_v25 = vpop.f32.mrb[38].mxu0  ;;  %v844_v26 = vpop.f32.mrb[38].mxu1 }
 0x145   : > { %v1895_v27 = vpack.c.bf16 %v1270_v24, %v1269_v13  ;;  %v1095_v28 = vadd.f32 %v2357_v36, %v1040_v19  ;;  %v1041_v29 = vmul.f32 %v2352_v34, %v740_v25  ;;  %v2024_v30 = vpop.f32.mrb[39].mxu0  ;;  %v1121_v31 = vadd.f32 %v2357_v36, %v1066_v21  ;;  %v2076_v32 = vpop.f32.mrb[39].mxu1 }
 0x146   : > { %1919 = vst [vmem:[%s2372_s19 + $0x40] sm:$0xff] %v1830_v23   ;;  %v1067_v33 = vmul.f32 %v2352_v34, %v844_v26 }
 0x147   : > { %1932 = vst [vmem:[%s2372_s19 + $0xa8] sm:$0xff] %v1895_v27   ;;  %v1195_v35 = vmul.f32 0.01, %v1095_v28  ;;  %v1096_v37 = vadd.f32 %v2357_v36, %v1041_v29  ;;  %vm1171_vm5 = vcmp.ge.f32.partialorder %v1121_v31, 0.0  ;;  %vm1145_vm6 = vcmp.ge.f32.partialorder %v1095_v28, 0.0 }
 0x148   : > { %v1221_v38 = vmul.f32 0.01, %v1121_v31  ;;  %v1122_v39 = vadd.f32 %v2357_v36, %v1067_v33 }
 0x149   : > { %vm1146_vm7 = vcmp.ge.f32.partialorder %v1096_v37, 0.0  ;;  %v1196_v40 = vmul.f32 0.01, %v1096_v37  ;;  %v1245_v45 = vsel %vm1145_vm6, %v1095_v28, %v1195_v35 }
 0x14a   : > { %v1271_v41 = vsel %vm1171_vm5, %v1121_v31, %v1221_v38  ;;  %vm1172_vm8 = vcmp.ge.f32.partialorder %v1122_v39, 0.0  ;;  %v1222_v42 = vmul.f32 0.01, %v1122_v39  ;;  %v745_v43 = vpop.f32.mrb[40].mxu0  ;;  %v849_v44 = vpop.f32.mrb[40].mxu1 }
 0x14b   : > { %v1246_v46 = vsel %vm1146_vm7, %v1096_v37, %v1196_v40  ;;  %v1042_v47 = vmul.f32 %v2352_v34, %v745_v43  ;;  %v2027_v48 = vpop.f32.mrb[41].mxu0  ;;  %v1068_v49 = vmul.f32 %v2352_v34, %v849_v44  ;;  %v2079_v50 = vpop.f32.mrb[41].mxu1 }
 0x14c   : > { %v1835_v51 = vpack.c.bf16 %v1246_v46, %v1245_v45  ;;  %v1272_v52 = vsel %vm1172_vm8, %v1122_v39, %v1222_v42  ;;  %v748_v53 = vpop.f32.mrb[42].mxu0  ;;  %v852_v54 = vpop.f32.mrb[42].mxu1 }
 0x14d   : > { %v1900_v55 = vpack.c.bf16 %v1272_v52, %v1271_v41  ;;  %v1097_v56 = vadd.f32 %v2357_v36, %v1042_v47  ;;  %v1043_v57 = vmul.f32 %v2352_v34, %v748_v53  ;;  %v2028_v58 = vpop.f32.mrb[43].mxu0  ;;  %v1123_v59 = vadd.f32 %v2357_v36, %v1068_v49  ;;  %v2080_v60 = vpop.f32.mrb[43].mxu1 }
 0x14e   : > { %1920 = vst [vmem:[%s2372_s19 + $0x48] sm:$0xff] %v1835_v51   ;;  %v1069_v61 = vmul.f32 %v2352_v34, %v852_v54 }
 0x14f   : > { %1933 = vst [vmem:[%s2372_s19 + $0xb0] sm:$0xff] %v1900_v55   ;;  %v1197_v62 = vmul.f32 0.01, %v1097_v56  ;;  %v1098_v63 = vadd.f32 %v2357_v36, %v1043_v57  ;;  %vm1173_vm9 = vcmp.ge.f32.partialorder %v1123_v59, 0.0  ;;  %vm1147_vm10 = vcmp.ge.f32.partialorder %v1097_v56, 0.0 }
 0x150   : > { %v1223_v0 = vmul.f32 0.01, %v1123_v59  ;;  %v1124_v1 = vadd.f32 %v2357_v36, %v1069_v61 }
 0x151   : > { %vm1148_vm11 = vcmp.ge.f32.partialorder %v1098_v63, 0.0  ;;  %v1198_v2 = vmul.f32 0.01, %v1098_v63  ;;  %v1247_v7 = vsel %vm1147_vm10, %v1097_v56, %v1197_v62 }
 0x152   : > { %v1273_v3 = vsel %vm1173_vm9, %v1123_v59, %v1223_v0  ;;  %vm1174_vm12 = vcmp.ge.f32.partialorder %v1124_v1, 0.0  ;;  %v1224_v4 = vmul.f32 0.01, %v1124_v1  ;;  %v753_v5 = vpop.f32.mrb[44].mxu0  ;;  %v857_v6 = vpop.f32.mrb[44].mxu1 }
 0x153   : > { %v1248_v8 = vsel %vm1148_vm11, %v1098_v63, %v1198_v2  ;;  %v1044_v9 = vmul.f32 %v2352_v34, %v753_v5  ;;  %v2031_v10 = vpop.f32.mrb[45].mxu0  ;;  %v1070_v11 = vmul.f32 %v2352_v34, %v857_v6  ;;  %v2083_v12 = vpop.f32.mrb[45].mxu1 }
 0x154   : > { %v1840_v13 = vpack.c.bf16 %v1248_v8, %v1247_v7  ;;  %v1274_v14 = vsel %vm1174_vm12, %v1124_v1, %v1224_v4  ;;  %v756_v15 = vpop.f32.mrb[46].mxu0  ;;  %v860_v16 = vpop.f32.mrb[46].mxu1 }
 0x155   : > { %v1905_v17 = vpack.c.bf16 %v1274_v14, %v1273_v3  ;;  %v1099_v18 = vadd.f32 %v2357_v36, %v1044_v9  ;;  %v1045_v19 = vmul.f32 %v2352_v34, %v756_v15  ;;  %v2032_v20 = vpop.f32.mrb[47].mxu0  ;;  %v1125_v21 = vadd.f32 %v2357_v36, %v1070_v11  ;;  %v2084_v22 = vpop.f32.mrb[47].mxu1 }
 0x156   : > { %1921 = vst [vmem:[%s2372_s19 + $0x50] sm:$0xff] %v1840_v13   ;;  %v1071_v23 = vmul.f32 %v2352_v34, %v860_v16 }
 0x157   : > { %1934 = vst [vmem:[%s2372_s19 + $0xb8] sm:$0xff] %v1905_v17   ;;  %v1199_v24 = vmul.f32 0.01, %v1099_v18  ;;  %v1100_v25 = vadd.f32 %v2357_v36, %v1045_v19  ;;  %vm1175_vm13 = vcmp.ge.f32.partialorder %v1125_v21, 0.0  ;;  %vm1149_vm14 = vcmp.ge.f32.partialorder %v1099_v18, 0.0 }
 0x158   : > { %v1225_v26 = vmul.f32 0.01, %v1125_v21  ;;  %v1126_v27 = vadd.f32 %v2357_v36, %v1071_v23 }
 0x159   : > { %vm1150_vm15 = vcmp.ge.f32.partialorder %v1100_v25, 0.0  ;;  %v1200_v28 = vmul.f32 0.01, %v1100_v25  ;;  %v1249_v32 = vsel %vm1149_vm14, %v1099_v18, %v1199_v24 }
 0x15a   : > { %v1275_v29 = vsel %vm1175_vm13, %v1125_v21, %v1225_v26  ;;  %vm1176_vm0 = vcmp.ge.f32.partialorder %v1126_v27, 0.0  ;;  %v1226_v30 = vmul.f32 0.01, %v1126_v27  ;;  %v761_v31 = vpop.f32.mrb[48].mxu0 }
 0x15b   : > { %v1250_v33 = vsel %vm1150_vm15, %v1100_v25, %v1200_v28  ;;  %v1046_v35 = vmul.f32 %v2352_v34, %v761_v31  ;;  %v2035_v37 = vpop.f32.mrb[49].mxu0 }
 0x15c   : > { %v1845_v38 = vpack.c.bf16 %v1250_v33, %v1249_v32  ;;  %v1276_v39 = vsel %vm1176_vm0, %v1126_v27, %v1226_v30  ;;  %v764_v40 = vpop.f32.mrb[50].mxu0 }
 0x15d   : > { %v1910_v41 = vpack.c.bf16 %v1276_v39, %v1275_v29  ;;  %v1101_v42 = vadd.f32 %v2357_v36, %v1046_v35  ;;  %v1047_v43 = vmul.f32 %v2352_v34, %v764_v40  ;;  %v2036_v44 = vpop.f32.mrb[51].mxu0 }
 0x15e   : > { %1922 = vst [vmem:[%s2372_s19 + $0x58] sm:$0xff] %v1845_v38  }
 0x15f   : > { %1935 = vst [vmem:[%s2372_s19 + $0xc0] sm:$0xff] %v1910_v41   ;;  %v1201_v45 = vmul.f32 0.01, %v1101_v42  ;;  %v1102_v46 = vadd.f32 %v2357_v36, %v1047_v43  ;;  %vm1151_vm1 = vcmp.ge.f32.partialorder %v1101_v42, 0.0 }
 0x161   : > { %vm1152_vm2 = vcmp.ge.f32.partialorder %v1102_v46, 0.0  ;;  %v1202_v47 = vmul.f32 0.01, %v1102_v46  ;;  %v1251_v48 = vsel %vm1151_vm1, %v1101_v42, %v1201_v45 }
 0x163   : > { %v1252_v49 = vsel %vm1152_vm2, %v1102_v46, %v1202_v47 }
 0x164   : > { %v1850_v50 = vpack.c.bf16 %v1252_v49, %v1251_v48 }
 0x166   : > { %1923 = vst [vmem:[%s2372_s19 + $0x60] sm:$0xff] %v1850_v50  }
 0x167 PF: > { %s13_s14 = sadd.s32 1, %s2182_s14   ;;  %s2504_s12 = smov %s2178_s13 }
 0x168   : > { %p10_p5 = scmp.ge.s32.totalorder %s13_s14, 4   ;;  %s2505_s13 = smov %s2507_s15 }
 0x16a   :  { %12 = sbr.rel (!%p10_p5) target bundleno = 2 (0x2), region = 76 }

// kernel: regressor_forward.6
= control target key start
LH: loop header
LB: loop body
LE: loop exit
PB: predicated region body
PF: predicated region fallthrough
CT: control target
= control target key end

     0   :  { %v3370_v0 = vmov 0   ;;  %s4147_s1 = inlined_call_operand.vmem [shape: bf16[512,128], index: 1, kind: input, shape index: {}]   ;;  %s4148_s0 = inlined_call_operand.vmem [shape: bf16[512,512], index: 0, kind: input, shape index: {}]   ;;  %s4149_s2 = inlined_call_operand.vmem [shape: f32[8,128], index: 2, kind: input, shape index: {}]   ;;  %s4150_s3 = inlined_call_operand.vmem [shape: bf16[512,128], index: 3, kind: output, shape index: {}]  }
   0x1   :  { %1171 = vmatprep.subr.bf16.mxu1 %v3370_v0  ;;  %1460 = vmatprep.subr.bf16.mxu0 %v3370_v0  ;;  %v3144_v1 = vld [vmem:[%s4147_s1] sm:$0xff]   ;;  %v3146_v3 = vld [vmem:[%s4147_s1 + $0x8] sm:$0xff]   ;;  %v3148_v5 = vld [vmem:[%s4147_s1 + $0x10] sm:$0xff]  }
   0x2   :  { %v3145_v2 = vld [vmem:[%s4147_s1 + $0x80] sm:$0xff]   ;;  %1172 = vmatpush1.bf16.msra.mxu1 %v3144_v1  ;;  %v3147_v4 = vld [vmem:[%s4147_s1 + $0x88] sm:$0xff]   ;;  %v3149_v6 = vld [vmem:[%s4147_s1 + $0x90] sm:$0xff]  }
   0x3   :  { %1461 = vmatpush1.bf16.msra.mxu0 %v3145_v2  ;;  %1173 = vmatprep.subr.bf16.mxu1 %v3370_v0  ;;  %v3150_v7 = vld [vmem:[%s4147_s1 + $0x18] sm:$0xff]   ;;  %v3152_v9 = vld [vmem:[%s4147_s1 + $0x20] sm:$0xff]   ;;  %v3154_v11 = vld [vmem:[%s4147_s1 + $0x28] sm:$0xff]  }
   0x4   :  { %1462 = vmatprep.subr.bf16.mxu0 %v3370_v0  ;;  %v3151_v8 = vld [vmem:[%s4147_s1 + $0x98] sm:$0xff]   ;;  %v3153_v10 = vld [vmem:[%s4147_s1 + $0xa0] sm:$0xff]   ;;  %v3155_v12 = vld [vmem:[%s4147_s1 + $0xa8] sm:$0xff]  }
   0x5   :  { %v3156_v13 = vld [vmem:[%s4147_s1 + $0x30] sm:$0xff]   ;;  %v3158_v15 = vld [vmem:[%s4147_s1 + $0x38] sm:$0xff]   ;;  %v3160_v17 = vld [vmem:[%s4147_s1 + $0x40] sm:$0xff]  }
   0x6   :  { %1174 = vmatpush1.bf16.msra.mxu1 %v3146_v3  ;;  %v3157_v14 = vld [vmem:[%s4147_s1 + $0xb0] sm:$0xff]   ;;  %v3159_v16 = vld [vmem:[%s4147_s1 + $0xb8] sm:$0xff]   ;;  %v3161_v18 = vld [vmem:[%s4147_s1 + $0xc0] sm:$0xff]  }
   0x7   :  { %1463 = vmatpush1.bf16.msra.mxu0 %v3147_v4  ;;  %1175 = vmatprep.subr.bf16.mxu1 %v3370_v0  ;;  %v3178_v19 = vld [vmem:[%s4148_s0 + $0x4] ss:$16 sps:$4 sm:$0xff]   ;;  %v3162_v20 = vld [vmem:[%s4147_s1 + $0x48] sm:$0xff]   ;;  %v3166_v25 = vld [vmem:[%s4147_s1 + $0x58] sm:$0xff]  }
   0x8   :  { %1464 = vmatprep.subr.bf16.mxu0 %v3370_v0  ;;  %v3181_v21 = vld [vmem:[%s4148_s0 + $0xc] ss:$16 sps:$4 sm:$0xff]   ;;  %1203 = vmatprep.mubr.bf16.mxu1 %v3178_v19  ;;  %v3164_v23 = vld [vmem:[%s4147_s1 + $0x50] sm:$0xff]   ;;  %v3168_v27 = vld [vmem:[%s4147_s1 + $0x60] sm:$0xff]  }
   0x9   :  { %v3163_v22 = vld [vmem:[%s4147_s1 + $0xc8] sm:$0xff]   ;;  %1492 = vmatprep.mubr.bf16.mxu0 %v3181_v21  ;;  %v3165_v24 = vld [vmem:[%s4147_s1 + $0xd0] sm:$0xff]   ;;  %v3167_v26 = vld [vmem:[%s4147_s1 + $0xd8] sm:$0xff]  }
   0xa   :  { %1176 = vmatpush1.bf16.msra.mxu1 %v3148_v5  ;;  %v3169_v28 = vld [vmem:[%s4147_s1 + $0xe0] sm:$0xff]   ;;  %v3170_v29 = vld [vmem:[%s4147_s1 + $0x68] sm:$0xff]   ;;  %v3172_v31 = vld [vmem:[%s4147_s1 + $0x70] sm:$0xff]  }
   0xb   :  { %1465 = vmatpush1.bf16.msra.mxu0 %v3149_v6  ;;  %1177 = vmatprep.subr.bf16.mxu1 %v3370_v0  ;;  %v3171_v30 = vld [vmem:[%s4147_s1 + $0xe8] sm:$0xff]   ;;  %v3173_v32 = vld [vmem:[%s4147_s1 + $0xf0] sm:$0xff]   ;;  %v3174_v33 = vld [vmem:[%s4147_s1 + $0x78] sm:$0xff]  }
   0xc   :  { %1466 = vmatprep.subr.bf16.mxu0 %v3370_v0  ;;  %v3175_v34 = vld [vmem:[%s4147_s1 + $0xf8] sm:$0xff]   ;;  %v3176_v35 = vld [vmem:[%s4148_s0] ss:$16 sps:$4 sm:$0xff]   ;;  %v3182_v37 = vld [vmem:[%s4148_s0 + $0x24] ss:$16 sps:$4 sm:$0xff]  }
   0xd   :  { %v3179_v36 = vld [vmem:[%s4148_s0 + $0x8] ss:$16 sps:$4 sm:$0xff]   ;;  %v3184_v38 = vld [vmem:[%s4148_s0 + $0x2c] ss:$16 sps:$4 sm:$0xff]   ;;  %v3186_v39 = vld [vmem:[%s4148_s0 + $0x20] ss:$16 sps:$4 sm:$0xff]  }
   0xe   :  { %1178 = vmatpush1.bf16.msra.mxu1 %v3150_v7  ;;  %v3187_v40 = vld [vmem:[%s4148_s0 + $0x28] ss:$16 sps:$4 sm:$0xff]   ;;  %v3188_v41 = vld [vmem:[%s4148_s0 + $0x44] ss:$16 sps:$4 sm:$0xff]   ;;  %v3190_v42 = vld [vmem:[%s4148_s0 + $0x4c] ss:$16 sps:$4 sm:$0xff]  }
   0xf   :  { %1467 = vmatpush1.bf16.msra.mxu0 %v3151_v8  ;;  %1179 = vmatprep.subr.bf16.mxu1 %v3370_v0  ;;  %v3192_v43 = vld [vmem:[%s4148_s0 + $0x40] ss:$16 sps:$4 sm:$0xff]   ;;  %v3193_v44 = vld [vmem:[%s4148_s0 + $0x48] ss:$16 sps:$4 sm:$0xff]   ;;  %v3194_v45 = vld [vmem:[%s4148_s0 + $0x64] ss:$16 sps:$4 sm:$0xff]  }
  0x10   :  { %1468 = vmatprep.subr.bf16.mxu0 %v3370_v0  ;;  %v3196_v46 = vld [vmem:[%s4148_s0 + $0x6c] ss:$16 sps:$4 sm:$0xff]   ;;  %v3198_v47 = vld [vmem:[%s4148_s0 + $0x60] ss:$16 sps:$4 sm:$0xff]   ;;  %v3199_v48 = vld [vmem:[%s4148_s0 + $0x68] ss:$16 sps:$4 sm:$0xff]  }
  0x11   :  { %v3200_v49 = vld [vmem:[%s4148_s0 + $0x84] ss:$16 sps:$4 sm:$0xff]   ;;  %v3202_v50 = vld [vmem:[%s4148_s0 + $0x8c] ss:$16 sps:$4 sm:$0xff]   ;;  %v3204_v51 = vld [vmem:[%s4148_s0 + $0x80] ss:$16 sps:$4 sm:$0xff]  }
  0x12   :  { %1180 = vmatpush1.bf16.msra.mxu1 %v3152_v9  ;;  %v3205_v52 = vld [vmem:[%s4148_s0 + $0x88] ss:$16 sps:$4 sm:$0xff]   ;;  %v3206_v53 = vld [vmem:[%s4148_s0 + $0xa4] ss:$16 sps:$4 sm:$0xff]   ;;  %v3208_v54 = vld [vmem:[%s4148_s0 + $0xac] ss:$16 sps:$4 sm:$0xff]  }
  0x13   :  { %1469 = vmatpush1.bf16.msra.mxu0 %v3153_v10  ;;  %1181 = vmatprep.subr.bf16.mxu1 %v3370_v0  ;;  %v3210_v55 = vld [vmem:[%s4148_s0 + $0xa0] ss:$16 sps:$4 sm:$0xff]   ;;  %v3211_v56 = vld [vmem:[%s4148_s0 + $0xa8] ss:$16 sps:$4 sm:$0xff]   ;;  %v3212_v57 = vld [vmem:[%s4148_s0 + $0xc4] ss:$16 sps:$4 sm:$0xff]  }
  0x14   :  { %1470 = vmatprep.subr.bf16.mxu0 %v3370_v0  ;;  %v3214_v58 = vld [vmem:[%s4148_s0 + $0xcc] ss:$16 sps:$4 sm:$0xff]   ;;  %v3216_v59 = vld [vmem:[%s4148_s0 + $0xc0] ss:$16 sps:$4 sm:$0xff]   ;;  %v3217_v60 = vld [vmem:[%s4148_s0 + $0xc8] ss:$16 sps:$4 sm:$0xff]  }
  0x15   :  { %v3218_v61 = vld [vmem:[%s4148_s0 + $0xe4] ss:$16 sps:$4 sm:$0xff]   ;;  %v3220_v62 = vld [vmem:[%s4148_s0 + $0xec] ss:$16 sps:$4 sm:$0xff]   ;;  %v3222_v63 = vld [vmem:[%s4148_s0 + $0xe0] ss:$16 sps:$4 sm:$0xff]  }
  0x16   :  { %1182 = vmatpush1.bf16.msra.mxu1 %v3154_v11  ;;  %v3224_v1 = vld [vmem:[%s4148_s0 + $0x104] ss:$16 sps:$4 sm:$0xff]   ;;  %v3226_v2 = vld [vmem:[%s4148_s0 + $0x10c] ss:$16 sps:$4 sm:$0xff]   ;;  %v3228_v3 = vld [vmem:[%s4148_s0 + $0x100] ss:$16 sps:$4 sm:$0xff]  }
  0x17   :  { %1471 = vmatpush1.bf16.msra.mxu0 %v3155_v12  ;;  %1183 = vmatprep.subr.bf16.mxu1 %v3370_v0  ;;  %v3229_v4 = vld [vmem:[%s4148_s0 + $0x108] ss:$16 sps:$4 sm:$0xff]   ;;  %v3230_v5 = vld [vmem:[%s4148_s0 + $0x124] ss:$16 sps:$4 sm:$0xff]   ;;  %v3232_v6 = vld [vmem:[%s4148_s0 + $0x12c] ss:$16 sps:$4 sm:$0xff]  }
  0x18   :  { %1472 = vmatprep.subr.bf16.mxu0 %v3370_v0  ;;  %v3234_v7 = vld [vmem:[%s4148_s0 + $0x120] ss:$16 sps:$4 sm:$0xff]   ;;  %v3235_v8 = vld [vmem:[%s4148_s0 + $0x128] ss:$16 sps:$4 sm:$0xff]   ;;  %v3236_v9 = vld [vmem:[%s4148_s0 + $0x144] ss:$16 sps:$4 sm:$0xff]  }
  0x19   :  { %v3238_v10 = vld [vmem:[%s4148_s0 + $0x14c] ss:$16 sps:$4 sm:$0xff]   ;;  %v3240_v11 = vld [vmem:[%s4148_s0 + $0x140] ss:$16 sps:$4 sm:$0xff]   ;;  %v3241_v12 = vld [vmem:[%s4148_s0 + $0x148] ss:$16 sps:$4 sm:$0xff]  }
  0x1a   :  { %1184 = vmatpush1.bf16.msra.mxu1 %v3156_v13  ;;  %v3242_v13 = vld [vmem:[%s4148_s0 + $0x164] ss:$16 sps:$4 sm:$0xff]   ;;  %v3252_v19 = vld [vmem:[%s4148_s0 + $0x180] ss:$16 sps:$4 sm:$0xff]  }
  0x1b   :  { %1473 = vmatpush1.bf16.msra.mxu0 %v3157_v14  ;;  %1185 = vmatprep.subr.bf16.mxu1 %v3370_v0  ;;  %v3244_v14 = vld [vmem:[%s4148_s0 + $0x16c] ss:$16 sps:$4 sm:$0xff]   ;;  %v3254_v21 = vld [vmem:[%s4148_s0 + $0x1a4] ss:$16 sps:$4 sm:$0xff]  }
  0x1c   :  { %1474 = vmatprep.subr.bf16.mxu0 %v3370_v0 }
  0x1e   :  { %1186 = vmatpush1.bf16.msra.mxu1 %v3158_v15  ;;  %v3246_v15 = vld [vmem:[%s4148_s0 + $0x160] ss:$16 sps:$4 sm:$0xff]  }
  0x1f   :  { %1475 = vmatpush1.bf16.msra.mxu0 %v3159_v16  ;;  %1187 = vmatprep.subr.bf16.mxu1 %v3370_v0  ;;  %v3247_v16 = vld [vmem:[%s4148_s0 + $0x168] ss:$16 sps:$4 sm:$0xff]  }
  0x20   :  { %1476 = vmatprep.subr.bf16.mxu0 %v3370_v0 }
  0x22   :  { %1188 = vmatpush1.bf16.msra.mxu1 %v3160_v17  ;;  %v3248_v17 = vld [vmem:[%s4148_s0 + $0x184] ss:$16 sps:$4 sm:$0xff]  }
  0x23   :  { %1477 = vmatpush1.bf16.msra.mxu0 %v3161_v18  ;;  %1189 = vmatprep.subr.bf16.mxu1 %v3370_v0  ;;  %v3250_v18 = vld [vmem:[%s4148_s0 + $0x18c] ss:$16 sps:$4 sm:$0xff]  }
  0x24   :  { %1478 = vmatprep.subr.bf16.mxu0 %v3370_v0 }
  0x26   :  { %1190 = vmatpush1.bf16.msra.mxu1 %v3162_v20  ;;  %v3253_v20 = vld [vmem:[%s4148_s0 + $0x188] ss:$16 sps:$4 sm:$0xff]  }
  0x27   :  { %1479 = vmatpush1.bf16.msra.mxu0 %v3163_v22  ;;  %1191 = vmatprep.subr.bf16.mxu1 %v3370_v0  ;;  %v3256_v22 = vld [vmem:[%s4148_s0 + $0x1ac] ss:$16 sps:$4 sm:$0xff]  }
  0x28   :  { %1480 = vmatprep.subr.bf16.mxu0 %v3370_v0 }
  0x2a   :  { %1192 = vmatpush1.bf16.msra.mxu1 %v3164_v23  ;;  %v3258_v23 = vld [vmem:[%s4148_s0 + $0x1a0] ss:$16 sps:$4 sm:$0xff]  }
  0x2b   :  { %1481 = vmatpush1.bf16.msra.mxu0 %v3165_v24  ;;  %1193 = vmatprep.subr.bf16.mxu1 %v3370_v0  ;;  %v3259_v24 = vld [vmem:[%s4148_s0 + $0x1a8] ss:$16 sps:$4 sm:$0xff]  }
  0x2c   :  { %1482 = vmatprep.subr.bf16.mxu0 %v3370_v0 }
  0x2e   :  { %1194 = vmatpush1.bf16.msra.mxu1 %v3166_v25  ;;  %v3260_v25 = vld [vmem:[%s4148_s0 + $0x1c4] ss:$16 sps:$4 sm:$0xff]  }
  0x2f   :  { %1483 = vmatpush1.bf16.msra.mxu0 %v3167_v26  ;;  %1195 = vmatprep.subr.bf16.mxu1 %v3370_v0  ;;  %v3262_v26 = vld [vmem:[%s4148_s0 + $0x1cc] ss:$16 sps:$4 sm:$0xff]  }
  0x30   :  { %1484 = vmatprep.subr.bf16.mxu0 %v3370_v0 }
  0x32   :  { %1196 = vmatpush1.bf16.msra.mxu1 %v3168_v27  ;;  %v3264_v27 = vld [vmem:[%s4148_s0 + $0x1c0] ss:$16 sps:$4 sm:$0xff]  }
  0x33   :  { %1485 = vmatpush1.bf16.msra.mxu0 %v3169_v28  ;;  %1197 = vmatprep.subr.bf16.mxu1 %v3370_v0  ;;  %v3265_v28 = vld [vmem:[%s4148_s0 + $0x1c8] ss:$16 sps:$4 sm:$0xff]  }
  0x34   :  { %1486 = vmatprep.subr.bf16.mxu0 %v3370_v0 }
  0x36   :  { %1198 = vmatpush1.bf16.msra.mxu1 %v3170_v29  ;;  %v3266_v29 = vld [vmem:[%s4148_s0 + $0x1e4] ss:$16 sps:$4 sm:$0xff]  }
  0x37   :  { %1487 = vmatpush1.bf16.msra.mxu0 %v3171_v30  ;;  %1199 = vmatprep.subr.bf16.mxu1 %v3370_v0  ;;  %v3268_v30 = vld [vmem:[%s4148_s0 + $0x1ec] ss:$16 sps:$4 sm:$0xff]  }
  0x38   :  { %1488 = vmatprep.subr.bf16.mxu0 %v3370_v0 }
  0x3a   :  { %1200 = vmatpush1.bf16.msra.mxu1 %v3172_v31  ;;  %v3270_v31 = vld [vmem:[%s4148_s0 + $0x1e0] ss:$16 sps:$4 sm:$0xff]  }
  0x3b   :  { %1489 = vmatpush1.bf16.msra.mxu0 %v3173_v32  ;;  %1201 = vmatprep.subr.bf16.mxu1 %v3370_v0  ;;  %v3271_v32 = vld [vmem:[%s4148_s0 + $0x1e8] ss:$16 sps:$4 sm:$0xff]  }
  0x3c   :  { %1490 = vmatprep.subr.bf16.mxu0 %v3370_v0  ;;  %v3223_v0 = vld [vmem:[%s4148_s0 + $0xe8] ss:$16 sps:$4 sm:$0xff]  }
  0x3e   :  { %1202 = vmatpush1.bf16.msra.mxu1 %v3174_v33  ;;  %v3272_v33 = vld [vmem:[%s4148_s0 + $0x204] ss:$16 sps:$4 sm:$0xff]  }
  0x3f   :  { %1491 = vmatpush1.bf16.msra.mxu0 %v3175_v34  ;;  %v3274_v34 = vld [vmem:[%s4148_s0 + $0x20c] ss:$16 sps:$4 sm:$0xff]  }
  0x41   :  { %1204 = vmatmul.mubr.bf16.vlgmr.msra.gmra.mrb[0].mxu1 %v3176_v35  ;;  %v3276_v35 = vld [vmem:[%s4148_s0 + $0x200] ss:$16 sps:$4 sm:$0xff]  }
  0x42   :  { %1493 = vmatmul.mubr.bf16.vlgmr.msra.gmra.mrb[0].mxu0 %v3179_v36  ;;  %1211 = vmatprep.mubr.bf16.mxu1 %v3182_v37  ;;  %v3277_v36 = vld [vmem:[%s4148_s0 + $0x208] ss:$16 sps:$4 sm:$0xff]   ;;  %v3278_v37 = vld [vmem:[%s4148_s0 + $0x224] ss:$16 sps:$4 sm:$0xff]  }
  0x43   :  { %1500 = vmatprep.mubr.bf16.mxu0 %v3184_v38  ;;  %v3280_v38 = vld [vmem:[%s4148_s0 + $0x22c] ss:$16 sps:$4 sm:$0xff]  }
  0x49   :  { %1212 = vmatmul.mubr.bf16.gmra.mrb[4].mxu1 %v3186_v39  ;;  %v3282_v39 = vld [vmem:[%s4148_s0 + $0x220] ss:$16 sps:$4 sm:$0xff]  }
  0x4a   :  { %1501 = vmatmul.mubr.bf16.gmra.mrb[4].mxu0 %v3187_v40  ;;  %1219 = vmatprep.mubr.bf16.mxu1 %v3188_v41  ;;  %v3283_v40 = vld [vmem:[%s4148_s0 + $0x228] ss:$16 sps:$4 sm:$0xff]   ;;  %v3284_v41 = vld [vmem:[%s4148_s0 + $0x244] ss:$16 sps:$4 sm:$0xff]  }
  0x4b   :  { %1508 = vmatprep.mubr.bf16.mxu0 %v3190_v42  ;;  %v3286_v42 = vld [vmem:[%s4148_s0 + $0x24c] ss:$16 sps:$4 sm:$0xff]  }
  0x51   :  { %1220 = vmatmul.mubr.bf16.gmra.mrb[8].mxu1 %v3192_v43  ;;  %v3288_v43 = vld [vmem:[%s4148_s0 + $0x240] ss:$16 sps:$4 sm:$0xff]  }
  0x52   :  { %1509 = vmatmul.mubr.bf16.gmra.mrb[8].mxu0 %v3193_v44  ;;  %1227 = vmatprep.mubr.bf16.mxu1 %v3194_v45  ;;  %v3289_v44 = vld [vmem:[%s4148_s0 + $0x248] ss:$16 sps:$4 sm:$0xff]   ;;  %v3290_v45 = vld [vmem:[%s4148_s0 + $0x264] ss:$16 sps:$4 sm:$0xff]  }
  0x53   :  { %1516 = vmatprep.mubr.bf16.mxu0 %v3196_v46  ;;  %v3292_v46 = vld [vmem:[%s4148_s0 + $0x26c] ss:$16 sps:$4 sm:$0xff]  }
  0x59   :  { %1228 = vmatmul.mubr.bf16.gmra.mrb[12].mxu1 %v3198_v47  ;;  %v3294_v47 = vld [vmem:[%s4148_s0 + $0x260] ss:$16 sps:$4 sm:$0xff]  }
  0x5a   :  { %1517 = vmatmul.mubr.bf16.gmra.mrb[12].mxu0 %v3199_v48  ;;  %1235 = vmatprep.mubr.bf16.mxu1 %v3200_v49  ;;  %v3295_v48 = vld [vmem:[%s4148_s0 + $0x268] ss:$16 sps:$4 sm:$0xff]   ;;  %v3296_v49 = vld [vmem:[%s4148_s0 + $0x284] ss:$16 sps:$4 sm:$0xff]  }
  0x5b   :  { %1524 = vmatprep.mubr.bf16.mxu0 %v3202_v50  ;;  %v3298_v50 = vld [vmem:[%s4148_s0 + $0x28c] ss:$16 sps:$4 sm:$0xff]  }
  0x61   :  { %1236 = vmatmul.mubr.bf16.gmra.mrb[16].mxu1 %v3204_v51  ;;  %v3300_v51 = vld [vmem:[%s4148_s0 + $0x280] ss:$16 sps:$4 sm:$0xff]  }
  0x62   :  { %1525 = vmatmul.mubr.bf16.gmra.mrb[16].mxu0 %v3205_v52  ;;  %1243 = vmatprep.mubr.bf16.mxu1 %v3206_v53  ;;  %v3301_v52 = vld [vmem:[%s4148_s0 + $0x288] ss:$16 sps:$4 sm:$0xff]   ;;  %v3302_v53 = vld [vmem:[%s4148_s0 + $0x2a4] ss:$16 sps:$4 sm:$0xff]  }
  0x63   :  { %1532 = vmatprep.mubr.bf16.mxu0 %v3208_v54  ;;  %v3304_v54 = vld [vmem:[%s4148_s0 + $0x2ac] ss:$16 sps:$4 sm:$0xff]  }
  0x69   :  { %1244 = vmatmul.mubr.bf16.gmra.mrb[20].mxu1 %v3210_v55  ;;  %v3306_v55 = vld [vmem:[%s4148_s0 + $0x2a0] ss:$16 sps:$4 sm:$0xff]  }
  0x6a   :  { %1533 = vmatmul.mubr.bf16.gmra.mrb[20].mxu0 %v3211_v56  ;;  %1251 = vmatprep.mubr.bf16.mxu1 %v3212_v57  ;;  %v3307_v56 = vld [vmem:[%s4148_s0 + $0x2a8] ss:$16 sps:$4 sm:$0xff]   ;;  %v3308_v57 = vld [vmem:[%s4148_s0 + $0x2c4] ss:$16 sps:$4 sm:$0xff]  }
  0x6b   :  { %1540 = vmatprep.mubr.bf16.mxu0 %v3214_v58  ;;  %v3310_v58 = vld [vmem:[%s4148_s0 + $0x2cc] ss:$16 sps:$4 sm:$0xff]  }
  0x71   :  { %1252 = vmatmul.mubr.bf16.gmra.mrb[24].mxu1 %v3216_v59  ;;  %v3312_v59 = vld [vmem:[%s4148_s0 + $0x2c0] ss:$16 sps:$4 sm:$0xff]  }
  0x72   :  { %1541 = vmatmul.mubr.bf16.gmra.mrb[24].mxu0 %v3217_v60  ;;  %1259 = vmatprep.mubr.bf16.mxu1 %v3218_v61  ;;  %v3313_v60 = vld [vmem:[%s4148_s0 + $0x2c8] ss:$16 sps:$4 sm:$0xff]   ;;  %v3314_v61 = vld [vmem:[%s4148_s0 + $0x2e4] ss:$16 sps:$4 sm:$0xff]  }
  0x73   :  { %1548 = vmatprep.mubr.bf16.mxu0 %v3220_v62  ;;  %v3316_v62 = vld [vmem:[%s4148_s0 + $0x2ec] ss:$16 sps:$4 sm:$0xff]  }
  0x79   :  { %1260 = vmatmul.mubr.bf16.gmra.mrb[28].mxu1 %v3222_v63  ;;  %v3318_v63 = vld [vmem:[%s4148_s0 + $0x2e0] ss:$16 sps:$4 sm:$0xff]  }
  0x7a   :  { %1549 = vmatmul.mubr.bf16.gmra.mrb[28].mxu0 %v3223_v0  ;;  %1267 = vmatprep.mubr.bf16.mxu1 %v3224_v1  ;;  %v3319_v0 = vld [vmem:[%s4148_s0 + $0x2e8] ss:$16 sps:$4 sm:$0xff]   ;;  %v3320_v1 = vld [vmem:[%s4148_s0 + $0x304] ss:$16 sps:$4 sm:$0xff]  }
  0x7b   :  { %1556 = vmatprep.mubr.bf16.mxu0 %v3226_v2  ;;  %v3322_v2 = vld [vmem:[%s4148_s0 + $0x30c] ss:$16 sps:$4 sm:$0xff]  }
  0x81   :  { %1268 = vmatmul.mubr.bf16.gmra.mrb[32].mxu1 %v3228_v3  ;;  %v3324_v3 = vld [vmem:[%s4148_s0 + $0x300] ss:$16 sps:$4 sm:$0xff]  }
  0x82   :  { %1557 = vmatmul.mubr.bf16.gmra.mrb[32].mxu0 %v3229_v4  ;;  %1275 = vmatprep.mubr.bf16.mxu1 %v3230_v5  ;;  %v3325_v4 = vld [vmem:[%s4148_s0 + $0x308] ss:$16 sps:$4 sm:$0xff]   ;;  %v3326_v5 = vld [vmem:[%s4148_s0 + $0x324] ss:$16 sps:$4 sm:$0xff]  }
  0x83   :  { %1564 = vmatprep.mubr.bf16.mxu0 %v3232_v6  ;;  %v3328_v6 = vld [vmem:[%s4148_s0 + $0x32c] ss:$16 sps:$4 sm:$0xff]  }
  0x89   :  { %1276 = vmatmul.mubr.bf16.gmra.mrb[36].mxu1 %v3234_v7  ;;  %v3330_v7 = vld [vmem:[%s4148_s0 + $0x320] ss:$16 sps:$4 sm:$0xff]  }
  0x8a   :  { %1565 = vmatmul.mubr.bf16.gmra.mrb[36].mxu0 %v3235_v8  ;;  %1283 = vmatprep.mubr.bf16.mxu1 %v3236_v9  ;;  %v3331_v8 = vld [vmem:[%s4148_s0 + $0x328] ss:$16 sps:$4 sm:$0xff]   ;;  %v3332_v9 = vld [vmem:[%s4148_s0 + $0x344] ss:$16 sps:$4 sm:$0xff]  }
  0x8b   :  { %1572 = vmatprep.mubr.bf16.mxu0 %v3238_v10  ;;  %v3334_v10 = vld [vmem:[%s4148_s0 + $0x34c] ss:$16 sps:$4 sm:$0xff]  }
  0x91   :  { %1284 = vmatmul.mubr.bf16.gmra.mrb[40].mxu1 %v3240_v11  ;;  %v3336_v11 = vld [vmem:[%s4148_s0 + $0x340] ss:$16 sps:$4 sm:$0xff]  }
  0x92   :  { %1573 = vmatmul.mubr.bf16.gmra.mrb[40].mxu0 %v3241_v12  ;;  %1291 = vmatprep.mubr.bf16.mxu1 %v3242_v13  ;;  %v3337_v12 = vld [vmem:[%s4148_s0 + $0x348] ss:$16 sps:$4 sm:$0xff]   ;;  %v3338_v13 = vld [vmem:[%s4148_s0 + $0x364] ss:$16 sps:$4 sm:$0xff]  }
  0x93   :  { %1580 = vmatprep.mubr.bf16.mxu0 %v3244_v14  ;;  %v3340_v14 = vld [vmem:[%s4148_s0 + $0x36c] ss:$16 sps:$4 sm:$0xff]  }
  0x99   :  { %1292 = vmatmul.mubr.bf16.gmra.mrb[44].mxu1 %v3246_v15 }
  0x9a   :  { %1581 = vmatmul.mubr.bf16.gmra.mrb[44].mxu0 %v3247_v16  ;;  %1299 = vmatprep.mubr.bf16.mxu1 %v3248_v17  ;;  %v3852_v17 = vld [vmem:[%s4149_s2] ss:$0 sm:$0xff] }
  0x9b   :  { %1588 = vmatprep.mubr.bf16.mxu0 %v3250_v18 }
  0xa1   :  { %1300 = vmatmul.mubr.bf16.gmra.mrb[48].mxu1 %v3252_v19  ;;  %v3342_v19 = vld [vmem:[%s4148_s0 + $0x360] ss:$16 sps:$4 sm:$0xff]  }
  0xa2   :  { %1589 = vmatmul.mubr.bf16.gmra.mrb[48].mxu0 %v3253_v20  ;;  %1307 = vmatprep.mubr.bf16.mxu1 %v3254_v21 }
  0xa3   :  { %1596 = vmatprep.mubr.bf16.mxu0 %v3256_v22 }
  0xa9   :  { %1308 = vmatmul.mubr.bf16.gmra.mrb[52].mxu1 %v3258_v23  ;;  %v3343_v23 = vld [vmem:[%s4148_s0 + $0x368] ss:$16 sps:$4 sm:$0xff]  }
  0xaa   :  { %1597 = vmatmul.mubr.bf16.gmra.mrb[52].mxu0 %v3259_v24  ;;  %1315 = vmatprep.mubr.bf16.mxu1 %v3260_v25  ;;  %v3344_v24 = vld [vmem:[%s4148_s0 + $0x384] ss:$16 sps:$4 sm:$0xff]   ;;  %v3866_v25 = vld [vmem:[%s4149_s2 + $0x1] ss:$0 sm:$0xff] }
  0xab   :  { %1604 = vmatprep.mubr.bf16.mxu0 %v3262_v26 }
  0xb1   :  { %1316 = vmatmul.mubr.bf16.gmra.mrb[56].mxu1 %v3264_v27 }
  0xb2   :  { %1605 = vmatmul.mubr.bf16.gmra.mrb[56].mxu0 %v3265_v28  ;;  %1323 = vmatprep.mubr.bf16.mxu1 %v3266_v29  ;;  %v3346_v28 = vld [vmem:[%s4148_s0 + $0x38c] ss:$16 sps:$4 sm:$0xff]  }
  0xb3   :  { %1612 = vmatprep.mubr.bf16.mxu0 %v3268_v30 }
  0xb9   :  { %1324 = vmatmul.mubr.bf16.gmra.mrb[60].mxu1 %v3270_v31 }
  0xba   :  { %1613 = vmatmul.mubr.bf16.gmra.mrb[60].mxu0 %v3271_v32  ;;  %1331 = vmatprep.mubr.bf16.mxu1 %v3272_v33 }
  0xbb   :  { %1620 = vmatprep.mubr.bf16.mxu0 %v3274_v34  ;;  %v3348_v34 = vld [vmem:[%s4148_s0 + $0x380] ss:$16 sps:$4 sm:$0xff]  }
  0xc1   :  { %1332 = vmatmul.mubr.bf16.gmra.mrb[64].mxu1 %v3276_v35 }
  0xc2   :  { %1621 = vmatmul.mubr.bf16.gmra.mrb[64].mxu0 %v3277_v36  ;;  %1339 = vmatprep.mubr.bf16.mxu1 %v3278_v37 }
  0xc3   :  { %1628 = vmatprep.mubr.bf16.mxu0 %v3280_v38  ;;  %v3349_v38 = vld [vmem:[%s4148_s0 + $0x388] ss:$16 sps:$4 sm:$0xff]  }
  0xc9   :  { %1340 = vmatmul.mubr.bf16.gmra.mrb[68].mxu1 %v3282_v39 }
  0xca   :  { %1629 = vmatmul.mubr.bf16.gmra.mrb[68].mxu0 %v3283_v40  ;;  %1347 = vmatprep.mubr.bf16.mxu1 %v3284_v41  ;;  %v3350_v41 = vld [vmem:[%s4148_s0 + $0x3a4] ss:$16 sps:$4 sm:$0xff]  }
  0xcb   :  { %1636 = vmatprep.mubr.bf16.mxu0 %v3286_v42 }
  0xd1   :  { %1348 = vmatmul.mubr.bf16.gmra.mrb[72].mxu1 %v3288_v43 }
  0xd2   :  { %1637 = vmatmul.mubr.bf16.gmra.mrb[72].mxu0 %v3289_v44  ;;  %1355 = vmatprep.mubr.bf16.mxu1 %v3290_v45 }
  0xd3   :  { %1644 = vmatprep.mubr.bf16.mxu0 %v3292_v46 }
  0xd9   :  { %1356 = vmatmul.mubr.bf16.gmra.mrb[76].mxu1 %v3294_v47 }
  0xda   :  { %1645 = vmatmul.mubr.bf16.gmra.mrb[76].mxu0 %v3295_v48  ;;  %1363 = vmatprep.mubr.bf16.mxu1 %v3296_v49  ;;  %v3352_v48 = vld [vmem:[%s4148_s0 + $0x3ac] ss:$16 sps:$4 sm:$0xff]  }
  0xdb   :  { %1652 = vmatprep.mubr.bf16.mxu0 %v3298_v50 }
  0xe1   :  { %1364 = vmatmul.mubr.bf16.gmra.mrb[80].mxu1 %v3300_v51 }
  0xe2   :  { %1653 = vmatmul.mubr.bf16.gmra.mrb[80].mxu0 %v3301_v52  ;;  %1371 = vmatprep.mubr.bf16.mxu1 %v3302_v53 }
  0xe3   :  { %1660 = vmatprep.mubr.bf16.mxu0 %v3304_v54 }
  0xe9   :  { %1372 = vmatmul.mubr.bf16.gmra.mrb[84].mxu1 %v3306_v55 }
  0xea   :  { %1661 = vmatmul.mubr.bf16.gmra.mrb[84].mxu0 %v3307_v56  ;;  %1379 = vmatprep.mubr.bf16.mxu1 %v3308_v57  ;;  %v3354_v57 = vld [vmem:[%s4148_s0 + $0x3a0] ss:$16 sps:$4 sm:$0xff]  }
  0xeb   :  { %1668 = vmatprep.mubr.bf16.mxu0 %v3310_v58 }
  0xf1   :  { %1380 = vmatmul.mubr.bf16.gmra.mrb[88].mxu1 %v3312_v59 }
  0xf2   :  { %1669 = vmatmul.mubr.bf16.gmra.mrb[88].mxu0 %v3313_v60  ;;  %1387 = vmatprep.mubr.bf16.mxu1 %v3314_v61  ;;  %v3355_v61 = vld [vmem:[%s4148_s0 + $0x3a8] ss:$16 sps:$4 sm:$0xff]  }
  0xf3   :  { %1676 = vmatprep.mubr.bf16.mxu0 %v3316_v62 }
  0xf9   :  { %1388 = vmatmul.mubr.bf16.gmra.mrb[92].mxu1 %v3318_v63 }
  0xfa   :  { %1677 = vmatmul.mubr.bf16.gmra.mrb[92].mxu0 %v3319_v0  ;;  %1395 = vmatprep.mubr.bf16.mxu1 %v3320_v1  ;;  %v3356_v0 = vld [vmem:[%s4148_s0 + $0x3c4] ss:$16 sps:$4 sm:$0xff]  }
  0xfb   :  { %1684 = vmatprep.mubr.bf16.mxu0 %v3322_v2 }
 0x101   :  { %1396 = vmatmul.mubr.bf16.gmra.mrb[96].mxu1 %v3324_v3 }
 0x102   :  { %1685 = vmatmul.mubr.bf16.gmra.mrb[96].mxu0 %v3325_v4  ;;  %1403 = vmatprep.mubr.bf16.mxu1 %v3326_v5 }
 0x103   :  { %1692 = vmatprep.mubr.bf16.mxu0 %v3328_v6 }
 0x109   :  { %1404 = vmatmul.mubr.bf16.gmra.mrb[100].mxu1 %v3330_v7  ;;  %v3358_v7 = vld [vmem:[%s4148_s0 + $0x3cc] ss:$16 sps:$4 sm:$0xff]  }
 0x10a   :  { %1693 = vmatmul.mubr.bf16.gmra.mrb[100].mxu0 %v3331_v8  ;;  %1411 = vmatprep.mubr.bf16.mxu1 %v3332_v9 }
 0x10b   :  { %1700 = vmatprep.mubr.bf16.mxu0 %v3334_v10 }
 0x111   :  { %1412 = vmatmul.mubr.bf16.gmra.mrb[104].mxu1 %v3336_v11 }
 0x112   :  { %1701 = vmatmul.mubr.bf16.gmra.mrb[104].mxu0 %v3337_v12  ;;  %1419 = vmatprep.mubr.bf16.mxu1 %v3338_v13 }
 0x113   :  { %1708 = vmatprep.mubr.bf16.mxu0 %v3340_v14 }
 0x114   :  { %v1205_v15 = vpop.f32.mrb[0].mxu1 }
 0x115   :  { %v1494_v16 = vpop.f32.mrb[0].mxu0  ;;  %v1207_v18 = vpop.f32.mrb[1].mxu1 }
 0x116   :  { %v1495_v20 = vadd.f32 %v1494_v16, %v1205_v15  ;;  %v1496_v21 = vpop.f32.mrb[1].mxu0  ;;  %v1208_v22 = vpop.f32.mrb[2].mxu1  ;;  %v3360_v16 = vld [vmem:[%s4148_s0 + $0x3c0] ss:$16 sps:$4 sm:$0xff]  }
 0x117   :  { %v1497_v26 = vpop.f32.mrb[2].mxu0  ;;  %v1210_v27 = vpop.f32.mrb[3].mxu1  ;;  %v3361_v21 = vld [vmem:[%s4148_s0 + $0x3c8] ss:$16 sps:$4 sm:$0xff]  }
 0x118   :  { %v1949_v29 = vmul.f32 %v3852_v17, %v1495_v20  ;;  %v1498_v30 = vadd.f32 %v1497_v26, %v1208_v22  ;;  %v1499_v31 = vpop.f32.mrb[3].mxu0 }
 0x119   :  { %1420 = vmatmul.mubr.bf16.gmra.mrb[108].mxu1 %v3342_v19 }
 0x11a   :  { %v2018_v32 = vadd.f32 %v3866_v25, %v1949_v29  ;;  %v1950_v33 = vmul.f32 %v3852_v17, %v1498_v30  ;;  %1709 = vmatmul.mubr.bf16.gmra.mrb[108].mxu0 %v3343_v23  ;;  %1427 = vmatprep.mubr.bf16.mxu1 %v3344_v24  ;;  %v3362_v24 = vld [vmem:[%s4148_s0 + $0x3e4] ss:$16 sps:$4 sm:$0xff]  }
 0x11b   :  { %1716 = vmatprep.mubr.bf16.mxu0 %v3346_v28 }
 0x11c   :  { %v2146_v35 = vmul.f32 0.01, %v2018_v32  ;;  %v2019_v36 = vadd.f32 %v3866_v25, %v1950_v33  ;;  %v1213_v37 = vpop.f32.mrb[4].mxu1  ;;  %vm2082_vm0 = vcmp.ge.f32.partialorder %v2018_v32, 0.0 }
 0x11d   :  { %v1502_v39 = vpop.f32.mrb[4].mxu0  ;;  %v1215_v40 = vpop.f32.mrb[5].mxu1 }
 0x11e   :  { %vm2083_vm1 = vcmp.ge.f32.partialorder %v2019_v36, 0.0  ;;  %v2147_v42 = vmul.f32 0.01, %v2019_v36  ;;  %v1503_v43 = vadd.f32 %v1502_v39, %v1213_v37  ;;  %v1504_v44 = vpop.f32.mrb[5].mxu0  ;;  %v1216_v45 = vpop.f32.mrb[6].mxu1  ;;  %v2210_v49 = vsel %vm2082_vm0, %v2018_v32, %v2146_v35 }
 0x11f   :  { %v1505_v46 = vpop.f32.mrb[6].mxu0  ;;  %v1218_v47 = vpop.f32.mrb[7].mxu1  ;;  %v3364_v32 = vld [vmem:[%s4148_s0 + $0x3ec] ss:$16 sps:$4 sm:$0xff]   ;;  %v3366_v44 = vld [vmem:[%s4148_s0 + $0x3e0] ss:$16 sps:$4 sm:$0xff]  }
 0x120   :  { %v2211_v50 = vsel %vm2083_vm1, %v2019_v36, %v2147_v42  ;;  %v1951_v51 = vmul.f32 %v3852_v17, %v1503_v43  ;;  %v1506_v52 = vadd.f32 %v1505_v46, %v1216_v45  ;;  %v1507_v53 = vpop.f32.mrb[7].mxu0  ;;  %v3367_v47 = vld [vmem:[%s4148_s0 + $0x3e8] ss:$16 sps:$4 sm:$0xff]  }
 0x121   :  { %v2891_v54 = vpack.c.bf16 %v2211_v50, %v2210_v49  ;;  %1428 = vmatmul.mubr.bf16.gmra.mrb[112].mxu1 %v3348_v34 }
 0x122   :  { %v2020_v55 = vadd.f32 %v3866_v25, %v1951_v51  ;;  %v1952_v56 = vmul.f32 %v3852_v17, %v1506_v52  ;;  %1717 = vmatmul.mubr.bf16.gmra.mrb[112].mxu0 %v3349_v38  ;;  %1435 = vmatprep.mubr.bf16.mxu1 %v3350_v41 }
 0x123   :  { %2892 = vst [vmem:[%s4150_s3] sm:$0xff] %v2891_v54   ;;  %1724 = vmatprep.mubr.bf16.mxu0 %v3352_v48 }
 0x124   :  { %v2148_v58 = vmul.f32 0.01, %v2020_v55  ;;  %v2021_v59 = vadd.f32 %v3866_v25, %v1952_v56  ;;  %v1221_v60 = vpop.f32.mrb[8].mxu1  ;;  %vm2084_vm2 = vcmp.ge.f32.partialorder %v2020_v55, 0.0 }
 0x125   :  { %v1510_v62 = vpop.f32.mrb[8].mxu0  ;;  %v1223_v63 = vpop.f32.mrb[9].mxu1 }
 0x126   :  { %vm2085_vm3 = vcmp.ge.f32.partialorder %v2021_v59, 0.0  ;;  %v2149_v1 = vmul.f32 0.01, %v2021_v59  ;;  %v1511_v2 = vadd.f32 %v1510_v62, %v1221_v60  ;;  %v1512_v3 = vpop.f32.mrb[9].mxu0  ;;  %v1224_v4 = vpop.f32.mrb[10].mxu1  ;;  %v2212_v8 = vsel %vm2084_vm2, %v2020_v55, %v2148_v58 }
 0x127   :  { %v1513_v5 = vpop.f32.mrb[10].mxu0  ;;  %v1226_v6 = vpop.f32.mrb[11].mxu1 }
 0x128   :  { %v2213_v9 = vsel %vm2085_vm3, %v2021_v59, %v2149_v1  ;;  %v1953_v10 = vmul.f32 %v3852_v17, %v1511_v2  ;;  %v1514_v11 = vadd.f32 %v1513_v5, %v1224_v4  ;;  %v1515_v12 = vpop.f32.mrb[11].mxu0 }
 0x129   :  { %v2896_v13 = vpack.c.bf16 %v2213_v9, %v2212_v8  ;;  %1436 = vmatmul.mubr.bf16.gmra.mrb[116].mxu1 %v3354_v57 }
 0x12a   :  { %v2022_v14 = vadd.f32 %v3866_v25, %v1953_v10  ;;  %v1954_v15 = vmul.f32 %v3852_v17, %v1514_v11  ;;  %1725 = vmatmul.mubr.bf16.gmra.mrb[116].mxu0 %v3355_v61  ;;  %1443 = vmatprep.mubr.bf16.mxu1 %v3356_v0 }
 0x12b   :  { %3048 = vst [vmem:[%s4150_s3 + $0x8] sm:$0xff] %v2896_v13   ;;  %1732 = vmatprep.mubr.bf16.mxu0 %v3358_v7 }
 0x12c   :  { %v2150_v18 = vmul.f32 0.01, %v2022_v14  ;;  %v2023_v19 = vadd.f32 %v3866_v25, %v1954_v15  ;;  %v1229_v20 = vpop.f32.mrb[12].mxu1  ;;  %vm2086_vm4 = vcmp.ge.f32.partialorder %v2022_v14, 0.0 }
 0x12d   :  { %v1518_v22 = vpop.f32.mrb[12].mxu0  ;;  %v1231_v23 = vpop.f32.mrb[13].mxu1 }
 0x12e   :  { %vm2087_vm5 = vcmp.ge.f32.partialorder %v2023_v19, 0.0  ;;  %v2151_v26 = vmul.f32 0.01, %v2023_v19  ;;  %v1519_v27 = vadd.f32 %v1518_v22, %v1229_v20  ;;  %v1520_v28 = vpop.f32.mrb[13].mxu0  ;;  %v1232_v29 = vpop.f32.mrb[14].mxu1  ;;  %v2214_v33 = vsel %vm2086_vm4, %v2022_v14, %v2150_v18 }
 0x12f   :  { %v1521_v30 = vpop.f32.mrb[14].mxu0  ;;  %v1234_v31 = vpop.f32.mrb[15].mxu1 }
 0x130   :  { %v2215_v34 = vsel %vm2087_vm5, %v2023_v19, %v2151_v26  ;;  %v1955_v35 = vmul.f32 %v3852_v17, %v1519_v27  ;;  %v1522_v36 = vadd.f32 %v1521_v30, %v1232_v29  ;;  %v1523_v37 = vpop.f32.mrb[15].mxu0 }
 0x131   :  { %v2901_v38 = vpack.c.bf16 %v2215_v34, %v2214_v33  ;;  %1444 = vmatmul.mubr.bf16.gmra.mrb[120].mxu1 %v3360_v16 }
 0x132   :  { %v2024_v39 = vadd.f32 %v3866_v25, %v1955_v35  ;;  %v1956_v40 = vmul.f32 %v3852_v17, %v1522_v36  ;;  %1733 = vmatmul.mubr.bf16.gmra.mrb[120].mxu0 %v3361_v21  ;;  %1451 = vmatprep.mubr.bf16.mxu1 %v3362_v24 }
 0x133   :  { %3049 = vst [vmem:[%s4150_s3 + $0x10] sm:$0xff] %v2901_v38   ;;  %1740 = vmatprep.mubr.bf16.mxu0 %v3364_v32 }
 0x134   :  { %v2152_v41 = vmul.f32 0.01, %v2024_v39  ;;  %v2025_v42 = vadd.f32 %v3866_v25, %v1956_v40  ;;  %v1237_v43 = vpop.f32.mrb[16].mxu1  ;;  %vm2088_vm6 = vcmp.ge.f32.partialorder %v2024_v39, 0.0 }
 0x135   :  { %v1526_v45 = vpop.f32.mrb[16].mxu0  ;;  %v1239_v46 = vpop.f32.mrb[17].mxu1 }
 0x136   :  { %vm2089_vm7 = vcmp.ge.f32.partialorder %v2025_v42, 0.0  ;;  %v2153_v48 = vmul.f32 0.01, %v2025_v42  ;;  %v1527_v49 = vadd.f32 %v1526_v45, %v1237_v43  ;;  %v1528_v50 = vpop.f32.mrb[17].mxu0  ;;  %v1240_v51 = vpop.f32.mrb[18].mxu1  ;;  %v2216_v54 = vsel %vm2088_vm6, %v2024_v39, %v2152_v41 }
 0x137   :  { %v1529_v52 = vpop.f32.mrb[18].mxu0  ;;  %v1242_v53 = vpop.f32.mrb[19].mxu1 }
 0x138   :  { %v2217_v55 = vsel %vm2089_vm7, %v2025_v42, %v2153_v48  ;;  %v1957_v56 = vmul.f32 %v3852_v17, %v1527_v49  ;;  %v1530_v57 = vadd.f32 %v1529_v52, %v1240_v51  ;;  %v1531_v58 = vpop.f32.mrb[19].mxu0 }
 0x139   :  { %v2906_v59 = vpack.c.bf16 %v2217_v55, %v2216_v54  ;;  %1452 = vmatmul.mubr.bf16.gmra.mrb[124].mxu1 %v3366_v44 }
 0x13a   :  { %v2026_v60 = vadd.f32 %v3866_v25, %v1957_v56  ;;  %v1958_v61 = vmul.f32 %v3852_v17, %v1530_v57  ;;  %1741 = vmatmul.mubr.bf16.gmra.mrb[124].mxu0 %v3367_v47 }
 0x13b   :  { %3050 = vst [vmem:[%s4150_s3 + $0x18] sm:$0xff] %v2906_v59  }
 0x13c   :  { %v2154_v62 = vmul.f32 0.01, %v2026_v60  ;;  %v2027_v63 = vadd.f32 %v3866_v25, %v1958_v61  ;;  %v1245_v0 = vpop.f32.mrb[20].mxu1  ;;  %vm2090_vm8 = vcmp.ge.f32.partialorder %v2026_v60, 0.0 }
 0x13d   :  { %v1534_v1 = vpop.f32.mrb[20].mxu0  ;;  %v1247_v2 = vpop.f32.mrb[21].mxu1 }
 0x13e   :  { %vm2091_vm9 = vcmp.ge.f32.partialorder %v2027_v63, 0.0  ;;  %v2155_v3 = vmul.f32 0.01, %v2027_v63  ;;  %v1535_v4 = vadd.f32 %v1534_v1, %v1245_v0  ;;  %v1536_v5 = vpop.f32.mrb[21].mxu0  ;;  %v1248_v6 = vpop.f32.mrb[22].mxu1  ;;  %v2218_v9 = vsel %vm2090_vm8, %v2026_v60, %v2154_v62 }
 0x13f   :  { %v1537_v7 = vpop.f32.mrb[22].mxu0  ;;  %v1250_v8 = vpop.f32.mrb[23].mxu1 }
 0x140   :  { %v2219_v10 = vsel %vm2091_vm9, %v2027_v63, %v2155_v3  ;;  %v1959_v11 = vmul.f32 %v3852_v17, %v1535_v4  ;;  %v1538_v12 = vadd.f32 %v1537_v7, %v1248_v6  ;;  %v1539_v13 = vpop.f32.mrb[23].mxu0 }
 0x141   :  { %v2911_v14 = vpack.c.bf16 %v2219_v10, %v2218_v9 }
 0x142   :  { %v2028_v15 = vadd.f32 %v3866_v25, %v1959_v11  ;;  %v1960_v16 = vmul.f32 %v3852_v17, %v1538_v12 }
 0x143   :  { %3051 = vst [vmem:[%s4150_s3 + $0x20] sm:$0xff] %v2911_v14  }
 0x144   :  { %v2156_v18 = vmul.f32 0.01, %v2028_v15  ;;  %v2029_v19 = vadd.f32 %v3866_v25, %v1960_v16  ;;  %v1253_v20 = vpop.f32.mrb[24].mxu1  ;;  %vm2092_vm10 = vcmp.ge.f32.partialorder %v2028_v15, 0.0 }
 0x145   :  { %v1542_v21 = vpop.f32.mrb[24].mxu0  ;;  %v1255_v22 = vpop.f32.mrb[25].mxu1 }
 0x146   :  { %vm2093_vm11 = vcmp.ge.f32.partialorder %v2029_v19, 0.0  ;;  %v2157_v23 = vmul.f32 0.01, %v2029_v19  ;;  %v1543_v24 = vadd.f32 %v1542_v21, %v1253_v20  ;;  %v1544_v26 = vpop.f32.mrb[25].mxu0  ;;  %v1256_v27 = vpop.f32.mrb[26].mxu1  ;;  %v2220_v30 = vsel %vm2092_vm10, %v2028_v15, %v2156_v18 }
 0x147   :  { %v1545_v28 = vpop.f32.mrb[26].mxu0  ;;  %v1258_v29 = vpop.f32.mrb[27].mxu1 }
 0x148   :  { %v2221_v31 = vsel %vm2093_vm11, %v2029_v19, %v2157_v23  ;;  %v1961_v32 = vmul.f32 %v3852_v17, %v1543_v24  ;;  %v1546_v33 = vadd.f32 %v1545_v28, %v1256_v27  ;;  %v1547_v34 = vpop.f32.mrb[27].mxu0 }
 0x149   :  { %v2916_v35 = vpack.c.bf16 %v2221_v31, %v2220_v30 }
 0x14a   :  { %v2030_v36 = vadd.f32 %v3866_v25, %v1961_v32  ;;  %v1962_v37 = vmul.f32 %v3852_v17, %v1546_v33 }
 0x14b   :  { %3052 = vst [vmem:[%s4150_s3 + $0x28] sm:$0xff] %v2916_v35  }
 0x14c   :  { %v2158_v38 = vmul.f32 0.01, %v2030_v36  ;;  %v2031_v39 = vadd.f32 %v3866_v25, %v1962_v37  ;;  %v1261_v40 = vpop.f32.mrb[28].mxu1  ;;  %vm2094_vm12 = vcmp.ge.f32.partialorder %v2030_v36, 0.0 }
 0x14d   :  { %v1550_v41 = vpop.f32.mrb[28].mxu0  ;;  %v1263_v42 = vpop.f32.mrb[29].mxu1 }
 0x14e   :  { %vm2095_vm13 = vcmp.ge.f32.partialorder %v2031_v39, 0.0  ;;  %v2159_v43 = vmul.f32 0.01, %v2031_v39  ;;  %v1551_v44 = vadd.f32 %v1550_v41, %v1261_v40  ;;  %v1552_v45 = vpop.f32.mrb[29].mxu0  ;;  %v1264_v46 = vpop.f32.mrb[30].mxu1  ;;  %v2222_v49 = vsel %vm2094_vm12, %v2030_v36, %v2158_v38 }
 0x14f   :  { %v1553_v47 = vpop.f32.mrb[30].mxu0  ;;  %v1266_v48 = vpop.f32.mrb[31].mxu1 }
 0x150   :  { %v2223_v50 = vsel %vm2095_vm13, %v2031_v39, %v2159_v43  ;;  %v1963_v51 = vmul.f32 %v3852_v17, %v1551_v44  ;;  %v1554_v52 = vadd.f32 %v1553_v47, %v1264_v46  ;;  %v1555_v53 = vpop.f32.mrb[31].mxu0 }
 0x151   :  { %v2921_v54 = vpack.c.bf16 %v2223_v50, %v2222_v49 }
 0x152   :  { %v2032_v55 = vadd.f32 %v3866_v25, %v1963_v51  ;;  %v1964_v56 = vmul.f32 %v3852_v17, %v1554_v52 }
 0x153   :  { %3053 = vst [vmem:[%s4150_s3 + $0x30] sm:$0xff] %v2921_v54  }
 0x154   :  { %v2160_v57 = vmul.f32 0.01, %v2032_v55  ;;  %v2033_v58 = vadd.f32 %v3866_v25, %v1964_v56  ;;  %v1269_v59 = vpop.f32.mrb[32].mxu1  ;;  %vm2096_vm14 = vcmp.ge.f32.partialorder %v2032_v55, 0.0 }
 0x155   :  { %v1558_v60 = vpop.f32.mrb[32].mxu0  ;;  %v1271_v61 = vpop.f32.mrb[33].mxu1 }
 0x156   :  { %vm2097_vm15 = vcmp.ge.f32.partialorder %v2033_v58, 0.0  ;;  %v2161_v62 = vmul.f32 0.01, %v2033_v58  ;;  %v1559_v63 = vadd.f32 %v1558_v60, %v1269_v59  ;;  %v1560_v0 = vpop.f32.mrb[33].mxu0  ;;  %v1272_v1 = vpop.f32.mrb[34].mxu1  ;;  %v2224_v4 = vsel %vm2096_vm14, %v2032_v55, %v2160_v57 }
 0x157   :  { %v1561_v2 = vpop.f32.mrb[34].mxu0  ;;  %v1274_v3 = vpop.f32.mrb[35].mxu1 }
 0x158   :  { %v2225_v5 = vsel %vm2097_vm15, %v2033_v58, %v2161_v62  ;;  %v1965_v6 = vmul.f32 %v3852_v17, %v1559_v63  ;;  %v1562_v7 = vadd.f32 %v1561_v2, %v1272_v1  ;;  %v1563_v8 = vpop.f32.mrb[35].mxu0 }
 0x159   :  { %v2926_v9 = vpack.c.bf16 %v2225_v5, %v2224_v4 }
 0x15a   :  { %v2034_v10 = vadd.f32 %v3866_v25, %v1965_v6  ;;  %v1966_v11 = vmul.f32 %v3852_v17, %v1562_v7 }
 0x15b   :  { %3054 = vst [vmem:[%s4150_s3 + $0x38] sm:$0xff] %v2926_v9  }
 0x15c   :  { %v2162_v12 = vmul.f32 0.01, %v2034_v10  ;;  %v2035_v13 = vadd.f32 %v3866_v25, %v1966_v11  ;;  %v1277_v14 = vpop.f32.mrb[36].mxu1  ;;  %vm2098_vm0 = vcmp.ge.f32.partialorder %v2034_v10, 0.0 }
 0x15d   :  { %v1566_v15 = vpop.f32.mrb[36].mxu0  ;;  %v1279_v16 = vpop.f32.mrb[37].mxu1 }
 0x15e   :  { %vm2099_vm1 = vcmp.ge.f32.partialorder %v2035_v13, 0.0  ;;  %v2163_v18 = vmul.f32 0.01, %v2035_v13  ;;  %v1567_v19 = vadd.f32 %v1566_v15, %v1277_v14  ;;  %v1568_v20 = vpop.f32.mrb[37].mxu0  ;;  %v1280_v21 = vpop.f32.mrb[38].mxu1  ;;  %v2226_v24 = vsel %vm2098_vm0, %v2034_v10, %v2162_v12 }
 0x15f   :  { %v1569_v22 = vpop.f32.mrb[38].mxu0  ;;  %v1282_v23 = vpop.f32.mrb[39].mxu1 }
 0x160   :  { %v2227_v26 = vsel %vm2099_vm1, %v2035_v13, %v2163_v18  ;;  %v1967_v27 = vmul.f32 %v3852_v17, %v1567_v19  ;;  %v1570_v28 = vadd.f32 %v1569_v22, %v1280_v21  ;;  %v1571_v29 = vpop.f32.mrb[39].mxu0 }
 0x161   :  { %v2931_v30 = vpack.c.bf16 %v2227_v26, %v2226_v24 }
 0x162   :  { %v2036_v31 = vadd.f32 %v3866_v25, %v1967_v27  ;;  %v1968_v32 = vmul.f32 %v3852_v17, %v1570_v28 }
 0x163   :  { %3055 = vst [vmem:[%s4150_s3 + $0x40] sm:$0xff] %v2931_v30  }
 0x164   :  { %v2164_v33 = vmul.f32 0.01, %v2036_v31  ;;  %v2037_v34 = vadd.f32 %v3866_v25, %v1968_v32  ;;  %v1285_v35 = vpop.f32.mrb[40].mxu1  ;;  %vm2100_vm2 = vcmp.ge.f32.partialorder %v2036_v31, 0.0 }
 0x165   :  { %v1574_v36 = vpop.f32.mrb[40].mxu0  ;;  %v1287_v37 = vpop.f32.mrb[41].mxu1 }
 0x166   :  { %vm2101_vm3 = vcmp.ge.f32.partialorder %v2037_v34, 0.0  ;;  %v2165_v38 = vmul.f32 0.01, %v2037_v34  ;;  %v1575_v39 = vadd.f32 %v1574_v36, %v1285_v35  ;;  %v1576_v40 = vpop.f32.mrb[41].mxu0  ;;  %v1288_v41 = vpop.f32.mrb[42].mxu1  ;;  %v2228_v44 = vsel %vm2100_vm2, %v2036_v31, %v2164_v33 }
 0x167   :  { %v1577_v42 = vpop.f32.mrb[42].mxu0  ;;  %v1290_v43 = vpop.f32.mrb[43].mxu1 }
 0x168   :  { %v2229_v45 = vsel %vm2101_vm3, %v2037_v34, %v2165_v38  ;;  %v1969_v46 = vmul.f32 %v3852_v17, %v1575_v39  ;;  %v1578_v47 = vadd.f32 %v1577_v42, %v1288_v41  ;;  %v1579_v48 = vpop.f32.mrb[43].mxu0 }
 0x169   :  { %v2936_v49 = vpack.c.bf16 %v2229_v45, %v2228_v44 }
 0x16a   :  { %v2038_v50 = vadd.f32 %v3866_v25, %v1969_v46  ;;  %v1970_v51 = vmul.f32 %v3852_v17, %v1578_v47 }
 0x16b   :  { %3056 = vst [vmem:[%s4150_s3 + $0x48] sm:$0xff] %v2936_v49  }
 0x16c   :  { %v2166_v52 = vmul.f32 0.01, %v2038_v50  ;;  %v2039_v53 = vadd.f32 %v3866_v25, %v1970_v51  ;;  %v1293_v54 = vpop.f32.mrb[44].mxu1  ;;  %vm2102_vm4 = vcmp.ge.f32.partialorder %v2038_v50, 0.0 }
 0x16d   :  { %v1582_v55 = vpop.f32.mrb[44].mxu0  ;;  %v1295_v56 = vpop.f32.mrb[45].mxu1 }
 0x16e   :  { %vm2103_vm5 = vcmp.ge.f32.partialorder %v2039_v53, 0.0  ;;  %v2167_v57 = vmul.f32 0.01, %v2039_v53  ;;  %v1583_v58 = vadd.f32 %v1582_v55, %v1293_v54  ;;  %v1584_v59 = vpop.f32.mrb[45].mxu0  ;;  %v1296_v60 = vpop.f32.mrb[46].mxu1  ;;  %v2230_v63 = vsel %vm2102_vm4, %v2038_v50, %v2166_v52 }
 0x16f   :  { %v1585_v61 = vpop.f32.mrb[46].mxu0  ;;  %v1298_v62 = vpop.f32.mrb[47].mxu1 }
 0x170   :  { %v2231_v0 = vsel %vm2103_vm5, %v2039_v53, %v2167_v57  ;;  %v1971_v1 = vmul.f32 %v3852_v17, %v1583_v58  ;;  %v1586_v2 = vadd.f32 %v1585_v61, %v1296_v60  ;;  %v1587_v3 = vpop.f32.mrb[47].mxu0 }
 0x171   :  { %v2941_v4 = vpack.c.bf16 %v2231_v0, %v2230_v63 }
 0x172   :  { %v2040_v5 = vadd.f32 %v3866_v25, %v1971_v1  ;;  %v1972_v6 = vmul.f32 %v3852_v17, %v1586_v2 }
 0x173   :  { %3057 = vst [vmem:[%s4150_s3 + $0x50] sm:$0xff] %v2941_v4  }
 0x174   :  { %v2168_v7 = vmul.f32 0.01, %v2040_v5  ;;  %v2041_v8 = vadd.f32 %v3866_v25, %v1972_v6  ;;  %v1301_v9 = vpop.f32.mrb[48].mxu1  ;;  %vm2104_vm6 = vcmp.ge.f32.partialorder %v2040_v5, 0.0 }
 0x175   :  { %v1590_v10 = vpop.f32.mrb[48].mxu0  ;;  %v1303_v11 = vpop.f32.mrb[49].mxu1 }
 0x176   :  { %vm2105_vm7 = vcmp.ge.f32.partialorder %v2041_v8, 0.0  ;;  %v2169_v12 = vmul.f32 0.01, %v2041_v8  ;;  %v1591_v13 = vadd.f32 %v1590_v10, %v1301_v9  ;;  %v1592_v14 = vpop.f32.mrb[49].mxu0  ;;  %v1304_v15 = vpop.f32.mrb[50].mxu1  ;;  %v2232_v19 = vsel %vm2104_vm6, %v2040_v5, %v2168_v7 }
 0x177   :  { %v1593_v16 = vpop.f32.mrb[50].mxu0  ;;  %v1306_v18 = vpop.f32.mrb[51].mxu1 }
 0x178   :  { %v2233_v20 = vsel %vm2105_vm7, %v2041_v8, %v2169_v12  ;;  %v1973_v21 = vmul.f32 %v3852_v17, %v1591_v13  ;;  %v1594_v22 = vadd.f32 %v1593_v16, %v1304_v15  ;;  %v1595_v23 = vpop.f32.mrb[51].mxu0 }
 0x179   :  { %v2946_v24 = vpack.c.bf16 %v2233_v20, %v2232_v19 }
 0x17a   :  { %v2042_v26 = vadd.f32 %v3866_v25, %v1973_v21  ;;  %v1974_v27 = vmul.f32 %v3852_v17, %v1594_v22 }
 0x17b   :  { %3058 = vst [vmem:[%s4150_s3 + $0x58] sm:$0xff] %v2946_v24  }
 0x17c   :  { %v2170_v28 = vmul.f32 0.01, %v2042_v26  ;;  %v2043_v29 = vadd.f32 %v3866_v25, %v1974_v27  ;;  %v1309_v30 = vpop.f32.mrb[52].mxu1  ;;  %vm2106_vm8 = vcmp.ge.f32.partialorder %v2042_v26, 0.0 }
 0x17d   :  { %v1598_v31 = vpop.f32.mrb[52].mxu0  ;;  %v1311_v32 = vpop.f32.mrb[53].mxu1 }
 0x17e   :  { %vm2107_vm9 = vcmp.ge.f32.partialorder %v2043_v29, 0.0  ;;  %v2171_v33 = vmul.f32 0.01, %v2043_v29  ;;  %v1599_v34 = vadd.f32 %v1598_v31, %v1309_v30  ;;  %v1600_v35 = vpop.f32.mrb[53].mxu0  ;;  %v1312_v36 = vpop.f32.mrb[54].mxu1  ;;  %v2234_v39 = vsel %vm2106_vm8, %v2042_v26, %v2170_v28 }
 0x17f   :  { %v1601_v37 = vpop.f32.mrb[54].mxu0  ;;  %v1314_v38 = vpop.f32.mrb[55].mxu1 }
 0x180   :  { %v2235_v40 = vsel %vm2107_vm9, %v2043_v29, %v2171_v33  ;;  %v1975_v41 = vmul.f32 %v3852_v17, %v1599_v34  ;;  %v1602_v42 = vadd.f32 %v1601_v37, %v1312_v36  ;;  %v1603_v43 = vpop.f32.mrb[55].mxu0 }
 0x181   :  { %v2951_v44 = vpack.c.bf16 %v2235_v40, %v2234_v39 }
 0x182   :  { %v2044_v45 = vadd.f32 %v3866_v25, %v1975_v41  ;;  %v1976_v46 = vmul.f32 %v3852_v17, %v1602_v42 }
 0x183   :  { %3059 = vst [vmem:[%s4150_s3 + $0x60] sm:$0xff] %v2951_v44  }
 0x184   :  { %v2172_v47 = vmul.f32 0.01, %v2044_v45  ;;  %v2045_v48 = vadd.f32 %v3866_v25, %v1976_v46  ;;  %v1317_v49 = vpop.f32.mrb[56].mxu1  ;;  %vm2108_vm10 = vcmp.ge.f32.partialorder %v2044_v45, 0.0 }
 0x185   :  { %v1606_v50 = vpop.f32.mrb[56].mxu0  ;;  %v1319_v51 = vpop.f32.mrb[57].mxu1 }
 0x186   :  { %vm2109_vm11 = vcmp.ge.f32.partialorder %v2045_v48, 0.0  ;;  %v2173_v52 = vmul.f32 0.01, %v2045_v48  ;;  %v1607_v53 = vadd.f32 %v1606_v50, %v1317_v49  ;;  %v1608_v54 = vpop.f32.mrb[57].mxu0  ;;  %v1320_v55 = vpop.f32.mrb[58].mxu1  ;;  %v2236_v58 = vsel %vm2108_vm10, %v2044_v45, %v2172_v47 }
 0x187   :  { %v1609_v56 = vpop.f32.mrb[58].mxu0  ;;  %v1322_v57 = vpop.f32.mrb[59].mxu1 }
 0x188   :  { %v2237_v59 = vsel %vm2109_vm11, %v2045_v48, %v2173_v52  ;;  %v1977_v60 = vmul.f32 %v3852_v17, %v1607_v53  ;;  %v1610_v61 = vadd.f32 %v1609_v56, %v1320_v55  ;;  %v1611_v62 = vpop.f32.mrb[59].mxu0 }
 0x189   :  { %v2956_v63 = vpack.c.bf16 %v2237_v59, %v2236_v58 }
 0x18a   :  { %v2046_v0 = vadd.f32 %v3866_v25, %v1977_v60  ;;  %v1978_v1 = vmul.f32 %v3852_v17, %v1610_v61 }
 0x18b   :  { %3060 = vst [vmem:[%s4150_s3 + $0x68] sm:$0xff] %v2956_v63  }
 0x18c   :  { %v2174_v2 = vmul.f32 0.01, %v2046_v0  ;;  %v2047_v3 = vadd.f32 %v3866_v25, %v1978_v1  ;;  %v1325_v4 = vpop.f32.mrb[60].mxu1  ;;  %vm2110_vm12 = vcmp.ge.f32.partialorder %v2046_v0, 0.0 }
 0x18d   :  { %v1614_v5 = vpop.f32.mrb[60].mxu0  ;;  %v1327_v6 = vpop.f32.mrb[61].mxu1 }
 0x18e   :  { %vm2111_vm13 = vcmp.ge.f32.partialorder %v2047_v3, 0.0  ;;  %v2175_v7 = vmul.f32 0.01, %v2047_v3  ;;  %v1615_v8 = vadd.f32 %v1614_v5, %v1325_v4  ;;  %v1616_v9 = vpop.f32.mrb[61].mxu0  ;;  %v1328_v10 = vpop.f32.mrb[62].mxu1  ;;  %v2238_v13 = vsel %vm2110_vm12, %v2046_v0, %v2174_v2 }
 0x18f   :  { %v1617_v11 = vpop.f32.mrb[62].mxu0  ;;  %v1330_v12 = vpop.f32.mrb[63].mxu1 }
 0x190   :  { %v2239_v14 = vsel %vm2111_vm13, %v2047_v3, %v2175_v7  ;;  %v1979_v15 = vmul.f32 %v3852_v17, %v1615_v8  ;;  %v1618_v16 = vadd.f32 %v1617_v11, %v1328_v10  ;;  %v1619_v18 = vpop.f32.mrb[63].mxu0 }
 0x191   :  { %v2961_v19 = vpack.c.bf16 %v2239_v14, %v2238_v13 }
 0x192   :  { %v2048_v20 = vadd.f32 %v3866_v25, %v1979_v15  ;;  %v1980_v21 = vmul.f32 %v3852_v17, %v1618_v16 }
 0x193   :  { %3061 = vst [vmem:[%s4150_s3 + $0x70] sm:$0xff] %v2961_v19  }
 0x194   :  { %v2176_v22 = vmul.f32 0.01, %v2048_v20  ;;  %v2049_v23 = vadd.f32 %v3866_v25, %v1980_v21  ;;  %v1333_v24 = vpop.f32.mrb[64].mxu1  ;;  %vm2112_vm14 = vcmp.ge.f32.partialorder %v2048_v20, 0.0 }
 0x195   :  { %v1622_v26 = vpop.f32.mrb[64].mxu0  ;;  %v1335_v27 = vpop.f32.mrb[65].mxu1 }
 0x196   :  { %vm2113_vm15 = vcmp.ge.f32.partialorder %v2049_v23, 0.0  ;;  %v2177_v28 = vmul.f32 0.01, %v2049_v23  ;;  %v1623_v29 = vadd.f32 %v1622_v26, %v1333_v24  ;;  %v1624_v30 = vpop.f32.mrb[65].mxu0  ;;  %v1336_v31 = vpop.f32.mrb[66].mxu1  ;;  %v2240_v34 = vsel %vm2112_vm14, %v2048_v20, %v2176_v22 }
 0x197   :  { %v1625_v32 = vpop.f32.mrb[66].mxu0  ;;  %v1338_v33 = vpop.f32.mrb[67].mxu1 }
 0x198   :  { %v2241_v35 = vsel %vm2113_vm15, %v2049_v23, %v2177_v28  ;;  %v1981_v36 = vmul.f32 %v3852_v17, %v1623_v29  ;;  %v1626_v37 = vadd.f32 %v1625_v32, %v1336_v31  ;;  %v1627_v38 = vpop.f32.mrb[67].mxu0 }
 0x199   :  { %v2966_v39 = vpack.c.bf16 %v2241_v35, %v2240_v34 }
 0x19a   :  { %v2050_v40 = vadd.f32 %v3866_v25, %v1981_v36  ;;  %v1982_v41 = vmul.f32 %v3852_v17, %v1626_v37 }
 0x19b   :  { %3062 = vst [vmem:[%s4150_s3 + $0x78] sm:$0xff] %v2966_v39  }
 0x19c   :  { %v2178_v42 = vmul.f32 0.01, %v2050_v40  ;;  %v2051_v43 = vadd.f32 %v3866_v25, %v1982_v41  ;;  %v1341_v44 = vpop.f32.mrb[68].mxu1  ;;  %vm2114_vm0 = vcmp.ge.f32.partialorder %v2050_v40, 0.0 }
 0x19d   :  { %v1630_v45 = vpop.f32.mrb[68].mxu0  ;;  %v1343_v46 = vpop.f32.mrb[69].mxu1 }
 0x19e   :  { %vm2115_vm1 = vcmp.ge.f32.partialorder %v2051_v43, 0.0  ;;  %v2179_v47 = vmul.f32 0.01, %v2051_v43  ;;  %v1631_v48 = vadd.f32 %v1630_v45, %v1341_v44  ;;  %v1632_v49 = vpop.f32.mrb[69].mxu0  ;;  %v1344_v50 = vpop.f32.mrb[70].mxu1  ;;  %v2242_v53 = vsel %vm2114_vm0, %v2050_v40, %v2178_v42 }
 0x19f   :  { %v1633_v51 = vpop.f32.mrb[70].mxu0  ;;  %v1346_v52 = vpop.f32.mrb[71].mxu1 }
 0x1a0   :  { %v2243_v54 = vsel %vm2115_vm1, %v2051_v43, %v2179_v47  ;;  %v1983_v55 = vmul.f32 %v3852_v17, %v1631_v48  ;;  %v1634_v56 = vadd.f32 %v1633_v51, %v1344_v50  ;;  %v1635_v57 = vpop.f32.mrb[71].mxu0 }
 0x1a1   :  { %v2971_v58 = vpack.c.bf16 %v2243_v54, %v2242_v53 }
 0x1a2   :  { %v2052_v59 = vadd.f32 %v3866_v25, %v1983_v55  ;;  %v1984_v60 = vmul.f32 %v3852_v17, %v1634_v56 }
 0x1a3   :  { %3063 = vst [vmem:[%s4150_s3 + $0x80] sm:$0xff] %v2971_v58  }
 0x1a4   :  { %v2180_v61 = vmul.f32 0.01, %v2052_v59  ;;  %v2053_v62 = vadd.f32 %v3866_v25, %v1984_v60  ;;  %v1349_v63 = vpop.f32.mrb[72].mxu1  ;;  %vm2116_vm2 = vcmp.ge.f32.partialorder %v2052_v59, 0.0 }
 0x1a5   :  { %v1638_v0 = vpop.f32.mrb[72].mxu0  ;;  %v1351_v1 = vpop.f32.mrb[73].mxu1 }
 0x1a6   :  { %vm2117_vm3 = vcmp.ge.f32.partialorder %v2053_v62, 0.0  ;;  %v2181_v2 = vmul.f32 0.01, %v2053_v62  ;;  %v1639_v3 = vadd.f32 %v1638_v0, %v1349_v63  ;;  %v1640_v4 = vpop.f32.mrb[73].mxu0  ;;  %v1352_v5 = vpop.f32.mrb[74].mxu1  ;;  %v2244_v8 = vsel %vm2116_vm2, %v2052_v59, %v2180_v61 }
 0x1a7   :  { %v1641_v6 = vpop.f32.mrb[74].mxu0  ;;  %v1354_v7 = vpop.f32.mrb[75].mxu1 }
 0x1a8   :  { %v2245_v9 = vsel %vm2117_vm3, %v2053_v62, %v2181_v2  ;;  %v1985_v10 = vmul.f32 %v3852_v17, %v1639_v3  ;;  %v1642_v11 = vadd.f32 %v1641_v6, %v1352_v5  ;;  %v1643_v12 = vpop.f32.mrb[75].mxu0 }
 0x1a9   :  { %v2976_v13 = vpack.c.bf16 %v2245_v9, %v2244_v8 }
 0x1aa   :  { %v2054_v14 = vadd.f32 %v3866_v25, %v1985_v10  ;;  %v1986_v15 = vmul.f32 %v3852_v17, %v1642_v11 }
 0x1ab   :  { %3064 = vst [vmem:[%s4150_s3 + $0x88] sm:$0xff] %v2976_v13  }
 0x1ac   :  { %v2182_v16 = vmul.f32 0.01, %v2054_v14  ;;  %v2055_v18 = vadd.f32 %v3866_v25, %v1986_v15  ;;  %v1357_v19 = vpop.f32.mrb[76].mxu1  ;;  %vm2118_vm4 = vcmp.ge.f32.partialorder %v2054_v14, 0.0 }
 0x1ad   :  { %v1646_v20 = vpop.f32.mrb[76].mxu0  ;;  %v1359_v21 = vpop.f32.mrb[77].mxu1 }
 0x1ae   :  { %vm2119_vm5 = vcmp.ge.f32.partialorder %v2055_v18, 0.0  ;;  %v2183_v22 = vmul.f32 0.01, %v2055_v18  ;;  %v1647_v23 = vadd.f32 %v1646_v20, %v1357_v19  ;;  %v1648_v24 = vpop.f32.mrb[77].mxu0  ;;  %v1360_v26 = vpop.f32.mrb[78].mxu1  ;;  %v2246_v29 = vsel %vm2118_vm4, %v2054_v14, %v2182_v16 }
 0x1af   :  { %v1649_v27 = vpop.f32.mrb[78].mxu0  ;;  %v1362_v28 = vpop.f32.mrb[79].mxu1  ;;  %v4067_v24 = vld [vmem:[%s4149_s2] ss:$0 sm:$0xff] }
 0x1b0   :  { %v2247_v30 = vsel %vm2119_vm5, %v2055_v18, %v2183_v22  ;;  %v1987_v31 = vmul.f32 %v3852_v17, %v1647_v23  ;;  %v1650_v32 = vadd.f32 %v1649_v27, %v1360_v26  ;;  %v1651_v33 = vpop.f32.mrb[79].mxu0 }
 0x1b1   :  { %v2981_v34 = vpack.c.bf16 %v2247_v30, %v2246_v29  ;;  %v4073_v29 = vld [vmem:[%s4149_s2 + $0x1] ss:$0 sm:$0xff] }
 0x1b2   :  { %v2056_v35 = vadd.f32 %v3866_v25, %v1987_v31  ;;  %v1988_v36 = vmul.f32 %v3852_v17, %v1650_v32 }
 0x1b3   :  { %3065 = vst [vmem:[%s4150_s3 + $0x90] sm:$0xff] %v2981_v34  }
 0x1b4   :  { %v2184_v37 = vmul.f32 0.01, %v2056_v35  ;;  %v2057_v38 = vadd.f32 %v3866_v25, %v1988_v36  ;;  %v1365_v39 = vpop.f32.mrb[80].mxu1  ;;  %vm2120_vm6 = vcmp.ge.f32.partialorder %v2056_v35, 0.0 }
 0x1b5   :  { %v1654_v40 = vpop.f32.mrb[80].mxu0  ;;  %v1367_v41 = vpop.f32.mrb[81].mxu1 }
 0x1b6   :  { %vm2121_vm7 = vcmp.ge.f32.partialorder %v2057_v38, 0.0  ;;  %v2185_v42 = vmul.f32 0.01, %v2057_v38  ;;  %v1655_v43 = vadd.f32 %v1654_v40, %v1365_v39  ;;  %v1656_v44 = vpop.f32.mrb[81].mxu0  ;;  %v1368_v45 = vpop.f32.mrb[82].mxu1  ;;  %v2248_v48 = vsel %vm2120_vm6, %v2056_v35, %v2184_v37 }
 0x1b7   :  { %v1657_v46 = vpop.f32.mrb[82].mxu0  ;;  %v1370_v47 = vpop.f32.mrb[83].mxu1 }
 0x1b8   :  { %v2249_v49 = vsel %vm2121_vm7, %v2057_v38, %v2185_v42  ;;  %v1989_v50 = vmul.f32 %v3852_v17, %v1655_v43  ;;  %v1658_v51 = vadd.f32 %v1657_v46, %v1368_v45  ;;  %v1659_v52 = vpop.f32.mrb[83].mxu0 }
 0x1b9   :  { %v2986_v53 = vpack.c.bf16 %v2249_v49, %v2248_v48 }
 0x1ba   :  { %v2058_v54 = vadd.f32 %v3866_v25, %v1989_v50  ;;  %v1990_v55 = vmul.f32 %v3852_v17, %v1658_v51 }
 0x1bb   :  { %3066 = vst [vmem:[%s4150_s3 + $0x98] sm:$0xff] %v2986_v53  }
 0x1bc   :  { %v2186_v56 = vmul.f32 0.01, %v2058_v54  ;;  %v2059_v57 = vadd.f32 %v3866_v25, %v1990_v55  ;;  %v1373_v58 = vpop.f32.mrb[84].mxu1  ;;  %vm2122_vm8 = vcmp.ge.f32.partialorder %v2058_v54, 0.0 }
 0x1bd   :  { %v1662_v59 = vpop.f32.mrb[84].mxu0  ;;  %v1375_v60 = vpop.f32.mrb[85].mxu1 }
 0x1be   :  { %vm2123_vm9 = vcmp.ge.f32.partialorder %v2059_v57, 0.0  ;;  %v2187_v61 = vmul.f32 0.01, %v2059_v57  ;;  %v1663_v62 = vadd.f32 %v1662_v59, %v1373_v58  ;;  %v1664_v63 = vpop.f32.mrb[85].mxu0  ;;  %v1376_v0 = vpop.f32.mrb[86].mxu1  ;;  %v2250_v3 = vsel %vm2122_vm8, %v2058_v54, %v2186_v56 }
 0x1bf   :  { %v1665_v1 = vpop.f32.mrb[86].mxu0  ;;  %v1378_v2 = vpop.f32.mrb[87].mxu1 }
 0x1c0   :  { %v2251_v4 = vsel %vm2123_vm9, %v2059_v57, %v2187_v61  ;;  %v1991_v5 = vmul.f32 %v3852_v17, %v1663_v62  ;;  %v1666_v6 = vadd.f32 %v1665_v1, %v1376_v0  ;;  %v1667_v7 = vpop.f32.mrb[87].mxu0 }
 0x1c1   :  { %v2991_v8 = vpack.c.bf16 %v2251_v4, %v2250_v3 }
 0x1c2   :  { %v2060_v9 = vadd.f32 %v3866_v25, %v1991_v5  ;;  %v1992_v10 = vmul.f32 %v3852_v17, %v1666_v6 }
 0x1c3   :  { %3067 = vst [vmem:[%s4150_s3 + $0xa0] sm:$0xff] %v2991_v8  }
 0x1c4   :  { %v2188_v11 = vmul.f32 0.01, %v2060_v9  ;;  %v2061_v12 = vadd.f32 %v3866_v25, %v1992_v10  ;;  %v1381_v13 = vpop.f32.mrb[88].mxu1  ;;  %vm2124_vm10 = vcmp.ge.f32.partialorder %v2060_v9, 0.0 }
 0x1c5   :  { %v1670_v14 = vpop.f32.mrb[88].mxu0  ;;  %v1383_v15 = vpop.f32.mrb[89].mxu1 }
 0x1c6   :  { %vm2125_vm11 = vcmp.ge.f32.partialorder %v2061_v12, 0.0  ;;  %v2189_v16 = vmul.f32 0.01, %v2061_v12  ;;  %v1671_v18 = vadd.f32 %v1670_v14, %v1381_v13  ;;  %v1672_v19 = vpop.f32.mrb[89].mxu0  ;;  %v1384_v20 = vpop.f32.mrb[90].mxu1  ;;  %v2252_v23 = vsel %vm2124_vm10, %v2060_v9, %v2188_v11 }
 0x1c7   :  { %v1673_v21 = vpop.f32.mrb[90].mxu0  ;;  %v1386_v22 = vpop.f32.mrb[91].mxu1 }
 0x1c8   :  { %v2253_v17 = vsel %vm2125_vm11, %v2061_v12, %v2189_v16  ;;  %v1993_v25 = vmul.f32 %v4067_v24, %v1671_v18  ;;  %v1674_v26 = vadd.f32 %v1673_v21, %v1384_v20  ;;  %v1675_v27 = vpop.f32.mrb[91].mxu0 }
 0x1c9   :  { %v2996_v28 = vpack.c.bf16 %v2253_v17, %v2252_v23 }
 0x1ca   :  { %v2062_v30 = vadd.f32 %v4073_v29, %v1993_v25  ;;  %v1994_v31 = vmul.f32 %v4067_v24, %v1674_v26 }
 0x1cb   :  { %3068 = vst [vmem:[%s4150_s3 + $0xa8] sm:$0xff] %v2996_v28  }
 0x1cc   :  { %v2190_v32 = vmul.f32 0.01, %v2062_v30  ;;  %v2063_v33 = vadd.f32 %v4073_v29, %v1994_v31  ;;  %v1389_v34 = vpop.f32.mrb[92].mxu1  ;;  %vm2126_vm12 = vcmp.ge.f32.partialorder %v2062_v30, 0.0 }
 0x1cd   :  { %v1678_v35 = vpop.f32.mrb[92].mxu0  ;;  %v1391_v36 = vpop.f32.mrb[93].mxu1 }
 0x1ce   :  { %vm2127_vm13 = vcmp.ge.f32.partialorder %v2063_v33, 0.0  ;;  %v2191_v37 = vmul.f32 0.01, %v2063_v33  ;;  %v1679_v38 = vadd.f32 %v1678_v35, %v1389_v34  ;;  %v1680_v39 = vpop.f32.mrb[93].mxu0  ;;  %v1392_v40 = vpop.f32.mrb[94].mxu1  ;;  %v2254_v43 = vsel %vm2126_vm12, %v2062_v30, %v2190_v32 }
 0x1cf   :  { %v1681_v41 = vpop.f32.mrb[94].mxu0  ;;  %v1394_v42 = vpop.f32.mrb[95].mxu1 }
 0x1d0   :  { %v2255_v44 = vsel %vm2127_vm13, %v2063_v33, %v2191_v37  ;;  %v1995_v45 = vmul.f32 %v4067_v24, %v1679_v38  ;;  %v1682_v46 = vadd.f32 %v1681_v41, %v1392_v40  ;;  %v1683_v47 = vpop.f32.mrb[95].mxu0 }
 0x1d1   :  { %v3001_v48 = vpack.c.bf16 %v2255_v44, %v2254_v43 }
 0x1d2   :  { %v2064_v49 = vadd.f32 %v4073_v29, %v1995_v45  ;;  %v1996_v50 = vmul.f32 %v4067_v24, %v1682_v46 }
 0x1d3   :  { %3069 = vst [vmem:[%s4150_s3 + $0xb0] sm:$0xff] %v3001_v48  }
 0x1d4   :  { %v2192_v51 = vmul.f32 0.01, %v2064_v49  ;;  %v2065_v52 = vadd.f32 %v4073_v29, %v1996_v50  ;;  %v1397_v53 = vpop.f32.mrb[96].mxu1  ;;  %vm2128_vm14 = vcmp.ge.f32.partialorder %v2064_v49, 0.0 }
 0x1d5   :  { %v1686_v54 = vpop.f32.mrb[96].mxu0  ;;  %v1399_v55 = vpop.f32.mrb[97].mxu1 }
 0x1d6   :  { %vm2129_vm15 = vcmp.ge.f32.partialorder %v2065_v52, 0.0  ;;  %v2193_v56 = vmul.f32 0.01, %v2065_v52  ;;  %v1687_v57 = vadd.f32 %v1686_v54, %v1397_v53  ;;  %v1688_v58 = vpop.f32.mrb[97].mxu0  ;;  %v1400_v59 = vpop.f32.mrb[98].mxu1  ;;  %v2256_v62 = vsel %vm2128_vm14, %v2064_v49, %v2192_v51 }
 0x1d7   :  { %v1689_v60 = vpop.f32.mrb[98].mxu0  ;;  %v1402_v61 = vpop.f32.mrb[99].mxu1 }
 0x1d8   :  { %v2257_v63 = vsel %vm2129_vm15, %v2065_v52, %v2193_v56  ;;  %v1997_v0 = vmul.f32 %v4067_v24, %v1687_v57  ;;  %v1690_v1 = vadd.f32 %v1689_v60, %v1400_v59  ;;  %v1691_v2 = vpop.f32.mrb[99].mxu0 }
 0x1d9   :  { %v3006_v3 = vpack.c.bf16 %v2257_v63, %v2256_v62 }
 0x1da   :  { %v2066_v4 = vadd.f32 %v4073_v29, %v1997_v0  ;;  %v1998_v5 = vmul.f32 %v4067_v24, %v1690_v1 }
 0x1db   :  { %3070 = vst [vmem:[%s4150_s3 + $0xb8] sm:$0xff] %v3006_v3  }
 0x1dc   :  { %v2194_v6 = vmul.f32 0.01, %v2066_v4  ;;  %v2067_v7 = vadd.f32 %v4073_v29, %v1998_v5  ;;  %v1405_v8 = vpop.f32.mrb[100].mxu1  ;;  %vm2130_vm0 = vcmp.ge.f32.partialorder %v2066_v4, 0.0 }
 0x1dd   :  { %v1694_v9 = vpop.f32.mrb[100].mxu0  ;;  %v1407_v10 = vpop.f32.mrb[101].mxu1 }
 0x1de   :  { %vm2131_vm1 = vcmp.ge.f32.partialorder %v2067_v7, 0.0  ;;  %v2195_v11 = vmul.f32 0.01, %v2067_v7  ;;  %v1695_v12 = vadd.f32 %v1694_v9, %v1405_v8  ;;  %v1696_v13 = vpop.f32.mrb[101].mxu0  ;;  %v1408_v14 = vpop.f32.mrb[102].mxu1  ;;  %v2258_v18 = vsel %vm2130_vm0, %v2066_v4, %v2194_v6 }
 0x1df   :  { %v1697_v15 = vpop.f32.mrb[102].mxu0  ;;  %v1410_v16 = vpop.f32.mrb[103].mxu1 }
 0x1e0   :  { %v2259_v19 = vsel %vm2131_vm1, %v2067_v7, %v2195_v11  ;;  %v1999_v20 = vmul.f32 %v4067_v24, %v1695_v12  ;;  %v1698_v21 = vadd.f32 %v1697_v15, %v1408_v14  ;;  %v1699_v22 = vpop.f32.mrb[103].mxu0 }
 0x1e1   :  { %v3011_v23 = vpack.c.bf16 %v2259_v19, %v2258_v18 }
 0x1e2   :  { %v2068_v17 = vadd.f32 %v4073_v29, %v1999_v20  ;;  %v2000_v25 = vmul.f32 %v4067_v24, %v1698_v21 }
 0x1e3   :  { %3071 = vst [vmem:[%s4150_s3 + $0xc0] sm:$0xff] %v3011_v23  }
 0x1e4   :  { %v2196_v26 = vmul.f32 0.01, %v2068_v17  ;;  %v2069_v27 = vadd.f32 %v4073_v29, %v2000_v25  ;;  %v1413_v28 = vpop.f32.mrb[104].mxu1  ;;  %vm2132_vm2 = vcmp.ge.f32.partialorder %v2068_v17, 0.0 }
 0x1e5   :  { %v1702_v30 = vpop.f32.mrb[104].mxu0  ;;  %v1415_v31 = vpop.f32.mrb[105].mxu1 }
 0x1e6   :  { %vm2133_vm3 = vcmp.ge.f32.partialorder %v2069_v27, 0.0  ;;  %v2197_v32 = vmul.f32 0.01, %v2069_v27  ;;  %v1703_v33 = vadd.f32 %v1702_v30, %v1413_v28  ;;  %v1704_v34 = vpop.f32.mrb[105].mxu0  ;;  %v1416_v35 = vpop.f32.mrb[106].mxu1  ;;  %v2260_v38 = vsel %vm2132_vm2, %v2068_v17, %v2196_v26 }
 0x1e7   :  { %v1705_v36 = vpop.f32.mrb[106].mxu0  ;;  %v1418_v37 = vpop.f32.mrb[107].mxu1 }
 0x1e8   :  { %v2261_v39 = vsel %vm2133_vm3, %v2069_v27, %v2197_v32  ;;  %v2001_v40 = vmul.f32 %v4067_v24, %v1703_v33  ;;  %v1706_v41 = vadd.f32 %v1705_v36, %v1416_v35  ;;  %v1707_v42 = vpop.f32.mrb[107].mxu0 }
 0x1e9   :  { %v3016_v43 = vpack.c.bf16 %v2261_v39, %v2260_v38 }
 0x1ea   :  { %v2070_v44 = vadd.f32 %v4073_v29, %v2001_v40  ;;  %v2002_v45 = vmul.f32 %v4067_v24, %v1706_v41 }
 0x1eb   :  { %3072 = vst [vmem:[%s4150_s3 + $0xc8] sm:$0xff] %v3016_v43  }
 0x1ec   :  { %v2198_v46 = vmul.f32 0.01, %v2070_v44  ;;  %v2071_v47 = vadd.f32 %v4073_v29, %v2002_v45  ;;  %v1421_v48 = vpop.f32.mrb[108].mxu1  ;;  %vm2134_vm4 = vcmp.ge.f32.partialorder %v2070_v44, 0.0 }
 0x1ed   :  { %v1710_v49 = vpop.f32.mrb[108].mxu0  ;;  %v1423_v50 = vpop.f32.mrb[109].mxu1 }
 0x1ee   :  { %vm2135_vm5 = vcmp.ge.f32.partialorder %v2071_v47, 0.0  ;;  %v2199_v51 = vmul.f32 0.01, %v2071_v47  ;;  %v1711_v52 = vadd.f32 %v1710_v49, %v1421_v48  ;;  %v1712_v53 = vpop.f32.mrb[109].mxu0  ;;  %v1424_v54 = vpop.f32.mrb[110].mxu1  ;;  %v2262_v57 = vsel %vm2134_vm4, %v2070_v44, %v2198_v46 }
 0x1ef   :  { %v1713_v55 = vpop.f32.mrb[110].mxu0  ;;  %v1426_v56 = vpop.f32.mrb[111].mxu1 }
 0x1f0   :  { %v2263_v58 = vsel %vm2135_vm5, %v2071_v47, %v2199_v51  ;;  %v2003_v59 = vmul.f32 %v4067_v24, %v1711_v52  ;;  %v1714_v60 = vadd.f32 %v1713_v55, %v1424_v54  ;;  %v1715_v61 = vpop.f32.mrb[111].mxu0 }
 0x1f1   :  { %v3021_v62 = vpack.c.bf16 %v2263_v58, %v2262_v57 }
 0x1f2   :  { %v2072_v63 = vadd.f32 %v4073_v29, %v2003_v59  ;;  %v2004_v0 = vmul.f32 %v4067_v24, %v1714_v60 }
 0x1f3   :  { %3073 = vst [vmem:[%s4150_s3 + $0xd0] sm:$0xff] %v3021_v62  }
 0x1f4   :  { %v2200_v1 = vmul.f32 0.01, %v2072_v63  ;;  %v2073_v2 = vadd.f32 %v4073_v29, %v2004_v0  ;;  %v1429_v3 = vpop.f32.mrb[112].mxu1  ;;  %vm2136_vm6 = vcmp.ge.f32.partialorder %v2072_v63, 0.0 }
 0x1f5   :  { %v1718_v4 = vpop.f32.mrb[112].mxu0  ;;  %v1431_v5 = vpop.f32.mrb[113].mxu1 }
 0x1f6   :  { %vm2137_vm7 = vcmp.ge.f32.partialorder %v2073_v2, 0.0  ;;  %v2201_v6 = vmul.f32 0.01, %v2073_v2  ;;  %v1719_v7 = vadd.f32 %v1718_v4, %v1429_v3  ;;  %v1720_v8 = vpop.f32.mrb[113].mxu0  ;;  %v1432_v9 = vpop.f32.mrb[114].mxu1  ;;  %v2264_v12 = vsel %vm2136_vm6, %v2072_v63, %v2200_v1 }
 0x1f7   :  { %v1721_v10 = vpop.f32.mrb[114].mxu0  ;;  %v1434_v11 = vpop.f32.mrb[115].mxu1 }
 0x1f8   :  { %v2265_v13 = vsel %vm2137_vm7, %v2073_v2, %v2201_v6  ;;  %v2005_v14 = vmul.f32 %v4067_v24, %v1719_v7  ;;  %v1722_v15 = vadd.f32 %v1721_v10, %v1432_v9  ;;  %v1723_v16 = vpop.f32.mrb[115].mxu0 }
 0x1f9   :  { %v3026_v18 = vpack.c.bf16 %v2265_v13, %v2264_v12 }
 0x1fa   :  { %v2074_v19 = vadd.f32 %v4073_v29, %v2005_v14  ;;  %v2006_v20 = vmul.f32 %v4067_v24, %v1722_v15 }
 0x1fb   :  { %3074 = vst [vmem:[%s4150_s3 + $0xd8] sm:$0xff] %v3026_v18  }
 0x1fc   :  { %v2202_v21 = vmul.f32 0.01, %v2074_v19  ;;  %v2075_v22 = vadd.f32 %v4073_v29, %v2006_v20  ;;  %v1437_v23 = vpop.f32.mrb[116].mxu1  ;;  %vm2138_vm8 = vcmp.ge.f32.partialorder %v2074_v19, 0.0 }
 0x1fd   :  { %v1726_v17 = vpop.f32.mrb[116].mxu0  ;;  %v1439_v25 = vpop.f32.mrb[117].mxu1 }
 0x1fe   :  { %vm2139_vm9 = vcmp.ge.f32.partialorder %v2075_v22, 0.0  ;;  %v2203_v26 = vmul.f32 0.01, %v2075_v22  ;;  %v1727_v27 = vadd.f32 %v1726_v17, %v1437_v23  ;;  %v1728_v28 = vpop.f32.mrb[117].mxu0  ;;  %v1440_v30 = vpop.f32.mrb[118].mxu1  ;;  %v2266_v33 = vsel %vm2138_vm8, %v2074_v19, %v2202_v21 }
 0x1ff   :  { %v1729_v31 = vpop.f32.mrb[118].mxu0  ;;  %v1442_v32 = vpop.f32.mrb[119].mxu1 }
 0x200   :  { %v2267_v34 = vsel %vm2139_vm9, %v2075_v22, %v2203_v26  ;;  %v2007_v35 = vmul.f32 %v4067_v24, %v1727_v27  ;;  %v1730_v36 = vadd.f32 %v1729_v31, %v1440_v30  ;;  %v1731_v37 = vpop.f32.mrb[119].mxu0 }
 0x201   :  { %v3031_v38 = vpack.c.bf16 %v2267_v34, %v2266_v33 }
 0x202   :  { %v2076_v39 = vadd.f32 %v4073_v29, %v2007_v35  ;;  %v2008_v40 = vmul.f32 %v4067_v24, %v1730_v36 }
 0x203   :  { %3075 = vst [vmem:[%s4150_s3 + $0xe0] sm:$0xff] %v3031_v38  }
 0x204   :  { %v2204_v41 = vmul.f32 0.01, %v2076_v39  ;;  %v2077_v42 = vadd.f32 %v4073_v29, %v2008_v40  ;;  %v1445_v43 = vpop.f32.mrb[120].mxu1  ;;  %vm2140_vm10 = vcmp.ge.f32.partialorder %v2076_v39, 0.0 }
 0x205   :  { %v1734_v44 = vpop.f32.mrb[120].mxu0  ;;  %v1447_v45 = vpop.f32.mrb[121].mxu1 }
 0x206   :  { %vm2141_vm11 = vcmp.ge.f32.partialorder %v2077_v42, 0.0  ;;  %v2205_v46 = vmul.f32 0.01, %v2077_v42  ;;  %v1735_v47 = vadd.f32 %v1734_v44, %v1445_v43  ;;  %v1736_v48 = vpop.f32.mrb[121].mxu0  ;;  %v1448_v49 = vpop.f32.mrb[122].mxu1  ;;  %v2268_v52 = vsel %vm2140_vm10, %v2076_v39, %v2204_v41 }
 0x207   :  { %v1737_v50 = vpop.f32.mrb[122].mxu0  ;;  %v1450_v51 = vpop.f32.mrb[123].mxu1 }
 0x208   :  { %v2269_v53 = vsel %vm2141_vm11, %v2077_v42, %v2205_v46  ;;  %v2009_v54 = vmul.f32 %v4067_v24, %v1735_v47  ;;  %v1738_v55 = vadd.f32 %v1737_v50, %v1448_v49  ;;  %v1739_v56 = vpop.f32.mrb[123].mxu0 }
 0x209   :  { %v3036_v57 = vpack.c.bf16 %v2269_v53, %v2268_v52 }
 0x20a   :  { %v2078_v58 = vadd.f32 %v4073_v29, %v2009_v54  ;;  %v2010_v59 = vmul.f32 %v4067_v24, %v1738_v55 }
 0x20b   :  { %3076 = vst [vmem:[%s4150_s3 + $0xe8] sm:$0xff] %v3036_v57  }
 0x20c   :  { %v2206_v60 = vmul.f32 0.01, %v2078_v58  ;;  %v2079_v61 = vadd.f32 %v4073_v29, %v2010_v59  ;;  %v1453_v62 = vpop.f32.mrb[124].mxu1  ;;  %vm2142_vm12 = vcmp.ge.f32.partialorder %v2078_v58, 0.0 }
 0x20d   :  { %v1742_v63 = vpop.f32.mrb[124].mxu0  ;;  %v1455_v0 = vpop.f32.mrb[125].mxu1 }
 0x20e   :  { %vm2143_vm13 = vcmp.ge.f32.partialorder %v2079_v61, 0.0  ;;  %v2207_v1 = vmul.f32 0.01, %v2079_v61  ;;  %v1743_v2 = vadd.f32 %v1742_v63, %v1453_v62  ;;  %v1744_v3 = vpop.f32.mrb[125].mxu0  ;;  %v1456_v4 = vpop.f32.mrb[126].mxu1  ;;  %v2270_v7 = vsel %vm2142_vm12, %v2078_v58, %v2206_v60 }
 0x20f   :  { %v1745_v5 = vpop.f32.mrb[126].mxu0  ;;  %v1458_v6 = vpop.f32.mrb[127].mxu1 }
 0x210   :  { %v2271_v8 = vsel %vm2143_vm13, %v2079_v61, %v2207_v1  ;;  %v2011_v9 = vmul.f32 %v4067_v24, %v1743_v2  ;;  %v1746_v10 = vadd.f32 %v1745_v5, %v1456_v4  ;;  %v1747_v11 = vpop.f32.mrb[127].mxu0 }
 0x211   :  { %v3041_v12 = vpack.c.bf16 %v2271_v8, %v2270_v7 }
 0x212   :  { %v2080_v13 = vadd.f32 %v4073_v29, %v2011_v9  ;;  %v2012_v14 = vmul.f32 %v4067_v24, %v1746_v10 }
 0x213   :  { %3077 = vst [vmem:[%s4150_s3 + $0xf0] sm:$0xff] %v3041_v12  }
 0x214   :  { %v2208_v15 = vmul.f32 0.01, %v2080_v13  ;;  %v2081_v16 = vadd.f32 %v4073_v29, %v2012_v14  ;;  %vm2144_vm14 = vcmp.ge.f32.partialorder %v2080_v13, 0.0 }
 0x216   :  { %vm2145_vm15 = vcmp.ge.f32.partialorder %v2081_v16, 0.0  ;;  %v2209_v18 = vmul.f32 0.01, %v2081_v16  ;;  %v2272_v19 = vsel %vm2144_vm14, %v2080_v13, %v2208_v15 }
 0x218   :  { %v2273_v20 = vsel %vm2145_vm15, %v2081_v16, %v2209_v18 }
 0x219   :  { %v3046_v21 = vpack.c.bf16 %v2273_v20, %v2272_v19 }
 0x21b   :  { %3078 = vst [vmem:[%s4150_s3 + $0xf8] sm:$0xff] %v3046_v21  }

// kernel: regressor_forward.7
= control target key start
LH: loop header
LB: loop body
LE: loop exit
PB: predicated region body
PF: predicated region fallthrough
CT: control target
= control target key end

     0   :  { %v855_v1 = vmov 0.0   ;;  %vm856_vm0 = vmmov 0   ;;  %s1057_s1 = inlined_call_operand.vmem [shape: bf16[384,128], index: 1, kind: input, shape index: {}]   ;;  %s1058_s0 = inlined_call_operand.vmem [shape: bf16[80,384], index: 0, kind: input, shape index: {}]   ;;  %s1059_s2 = inlined_call_operand.vmem [shape: f32[8,128], index: 2, kind: input, shape index: {}]   ;;  %s1060_s3 = inlined_call_operand.vmem [shape: bf16[80,128], index: 3, kind: output, shape index: {}]  }
   0x1   :  { %v811_v0 = vld [vmem:[%s1057_s1 + $0x40] sm:$0xff]   ;;  %773 = vmatprep.subr.bf16.mxu1 %v855_v1  ;;  %789 = vmatprep.mubr.msk.bf16.mxu1 %vm856_vm0, %v855_v1  ;;  %v814_v4 = vld [vmem:[%s1057_s1 + $0x48] sm:$0xff]   ;;  %v817_v7 = vld [vmem:[%s1057_s1 + $0x50] sm:$0xff]  }
   0x2   :  { %v812_v2 = vld [vmem:[%s1057_s1] sm:$0xff]   ;;  %714 = vmatprep.subr.bf16.mxu0 %v811_v0  ;;  %v815_v5 = vld [vmem:[%s1057_s1 + $0x8] sm:$0xff]   ;;  %v818_v8 = vld [vmem:[%s1057_s1 + $0x10] sm:$0xff]  }
   0x3   :  { %v813_v3 = vld [vmem:[%s1057_s1 + $0x80] sm:$0xff]   ;;  %715 = vmatpush3.bf16.msra.mxu0 %v812_v2  ;;  %v816_v6 = vld [vmem:[%s1057_s1 + $0x88] sm:$0xff]   ;;  %v819_v9 = vld [vmem:[%s1057_s1 + $0x90] sm:$0xff]  }
   0x4   :  { %774 = vmatpush3.bf16.msra.mxu1 %v813_v3  ;;  %716 = vmatprep.subr.bf16.mxu0 %v814_v4  ;;  %v820_v10 = vld [vmem:[%s1057_s1 + $0x58] sm:$0xff]   ;;  %v823_v13 = vld [vmem:[%s1057_s1 + $0x60] sm:$0xff]   ;;  %v826_v16 = vld [vmem:[%s1057_s1 + $0x68] sm:$0xff]  }
   0x5   :  { %775 = vmatprep.subr.bf16.mxu1 %v855_v1  ;;  %v821_v11 = vld [vmem:[%s1057_s1 + $0x18] sm:$0xff]   ;;  %v824_v14 = vld [vmem:[%s1057_s1 + $0x20] sm:$0xff]   ;;  %v827_v17 = vld [vmem:[%s1057_s1 + $0x28] sm:$0xff]  }
   0x6   :  { %v822_v12 = vld [vmem:[%s1057_s1 + $0x98] sm:$0xff]   ;;  %v825_v15 = vld [vmem:[%s1057_s1 + $0xa0] sm:$0xff]   ;;  %v828_v18 = vld [vmem:[%s1057_s1 + $0xa8] sm:$0xff]  }
   0x7   :  { %717 = vmatpush3.bf16.msra.mxu0 %v815_v5  ;;  %v829_v19 = vld [vmem:[%s1057_s1 + $0x70] sm:$0xff]   ;;  %v832_v22 = vld [vmem:[%s1057_s1 + $0x78] sm:$0xff]   ;;  %v835_v26 = vld [vmem:[%s1058_s0] ss:$12 sps:$4 sm:$0xff]  }
   0x8   :  { %776 = vmatpush3.bf16.msra.mxu1 %v816_v6  ;;  %718 = vmatprep.subr.bf16.mxu0 %v817_v7  ;;  %v830_v20 = vld [vmem:[%s1057_s1 + $0x30] sm:$0xff]   ;;  %v833_v24 = vld [vmem:[%s1057_s1 + $0x38] sm:$0xff]   ;;  %v842_v30 = vld [vmem:[%s1058_s0 + $0x20] ss:$12 sps:$4 sm:$0xff]  }
   0x9   :  { %777 = vmatprep.subr.bf16.mxu1 %v855_v1  ;;  %v831_v21 = vld [vmem:[%s1057_s1 + $0xb0] sm:$0xff]   ;;  %v834_v25 = vld [vmem:[%s1057_s1 + $0xb8] sm:$0xff]   ;;  %v853_v38 = vld [vmem:[%s1058_s0 + $0x60] ss:$12 sps:$4 sm:$0xff]  }
   0xa   :  { %v837_v23 = vld [vmem:[%s1058_s0 + $0x4] ss:$12 sps:$4 sm:$0xff]   ;;  %v838_v27 = vld [vmem:[%s1058_s0 + $0x8] ss:$12 sps:$4 sm:$0xff]   ;;  %v847_v34 = vld [vmem:[%s1058_s0 + $0x4c] ss:$12 sps:$4 sm:$0xff]  }
   0xb   :  { %719 = vmatpush3.bf16.msra.mxu0 %v818_v8  ;;  %363 = vmatprep.mubr.bf16.mxu0 %v837_v23  ;;  %v839_v28 = vld [vmem:[%s1058_s0 + $0x1c] ss:$12 sps:$4 sm:$0xff]   ;;  %v841_v29 = vld [vmem:[%s1058_s0 + $0x18] ss:$12 sps:$4 sm:$0xff]   ;;  %v843_v31 = vld [vmem:[%s1058_s0 + $0x34] ss:$12 sps:$4 sm:$0xff]  }
   0xc   :  { %778 = vmatpush3.bf16.msra.mxu1 %v819_v9  ;;  %720 = vmatprep.subr.bf16.mxu0 %v820_v10  ;;  %v845_v32 = vld [vmem:[%s1058_s0 + $0x30] ss:$12 sps:$4 sm:$0xff]   ;;  %v846_v33 = vld [vmem:[%s1058_s0 + $0x38] ss:$12 sps:$4 sm:$0xff]   ;;  %v849_v35 = vld [vmem:[%s1058_s0 + $0x48] ss:$12 sps:$4 sm:$0xff]  }
   0xd   :  { %779 = vmatprep.subr.bf16.mxu1 %v855_v1  ;;  %v850_v36 = vld [vmem:[%s1058_s0 + $0x50] ss:$12 sps:$4 sm:$0xff]   ;;  %v854_v39 = vld [vmem:[%s1058_s0 + $0x68] ss:$12 sps:$4 sm:$0xff]   ;;  %v1015_v46 = vld [vmem:[%s1059_s2] ss:$0 sm:$0xff] }
   0xe   :  { %v851_v37 = vld [vmem:[%s1058_s0 + $0x64] ss:$12 sps:$4 sm:$0xff]   ;;  %v1020_v52 = vld [vmem:[%s1059_s2 + $0x1] ss:$0 sm:$0xff] }
   0xf   :  { %721 = vmatpush3.bf16.msra.mxu0 %v821_v11 }
  0x10   :  { %780 = vmatpush3.bf16.msra.mxu1 %v822_v12  ;;  %722 = vmatprep.subr.bf16.mxu0 %v823_v13 }
  0x11   :  { %781 = vmatprep.subr.bf16.mxu1 %v855_v1 }
  0x13   :  { %723 = vmatpush3.bf16.msra.mxu0 %v824_v14 }
  0x14   :  { %782 = vmatpush3.bf16.msra.mxu1 %v825_v15  ;;  %724 = vmatprep.subr.bf16.mxu0 %v826_v16 }
  0x15   :  { %783 = vmatprep.subr.bf16.mxu1 %v855_v1 }
  0x17   :  { %725 = vmatpush3.bf16.msra.mxu0 %v827_v17 }
  0x18   :  { %784 = vmatpush3.bf16.msra.mxu1 %v828_v18  ;;  %726 = vmatprep.subr.bf16.mxu0 %v829_v19 }
  0x19   :  { %785 = vmatprep.subr.bf16.mxu1 %v855_v1 }
  0x1b   :  { %727 = vmatpush3.bf16.msra.mxu0 %v830_v20 }
  0x1c   :  { %786 = vmatpush3.bf16.msra.mxu1 %v831_v21  ;;  %728 = vmatprep.subr.bf16.mxu0 %v832_v22 }
  0x1d   :  { %787 = vmatprep.subr.bf16.mxu1 %v855_v1 }
  0x1f   :  { %729 = vmatpush3.bf16.msra.mxu0 %v833_v24 }
  0x20   :  { %788 = vmatpush3.bf16.msra.mxu1 %v834_v25 }
  0x22   :  { %364 = vmatmul.mubr.bf16.vlgmr.msra.gmra.mrb[0].mxu0 %v835_v26 }
  0x23   :  { %790 = vmatmul.mubr.bf16.vlgmr.msra.gmra.mrb[0].mxu1 %v838_v27  ;;  %371 = vmatprep.mubr.bf16.mxu0 %v839_v28 }
  0x24   :  { %793 = vmatprep.mubr.msk.bf16.mxu1 %vm856_vm0, %v855_v1 }
  0x2a   :  { %372 = vmatmul.mubr.bf16.gmra.mrb[4].mxu0 %v841_v29 }
  0x2b   :  { %794 = vmatmul.mubr.bf16.gmra.mrb[4].mxu1 %v842_v30  ;;  %379 = vmatprep.mubr.bf16.mxu0 %v843_v31 }
  0x2c   :  { %797 = vmatprep.mubr.msk.bf16.mxu1 %vm856_vm0, %v855_v1 }
  0x32   :  { %380 = vmatmul.mubr.bf16.gmra.mrb[8].mxu0 %v845_v32 }
  0x33   :  { %798 = vmatmul.mubr.bf16.gmra.mrb[8].mxu1 %v846_v33  ;;  %387 = vmatprep.mubr.bf16.mxu0 %v847_v34 }
  0x34   :  { %801 = vmatprep.mubr.msk.bf16.mxu1 %vm856_vm0, %v855_v1 }
  0x3a   :  { %388 = vmatmul.mubr.bf16.gmra.mrb[12].mxu0 %v849_v35 }
  0x3b   :  { %802 = vmatmul.mubr.bf16.gmra.mrb[12].mxu1 %v850_v36  ;;  %395 = vmatprep.mubr.bf16.mxu0 %v851_v37 }
  0x3c   :  { %805 = vmatprep.mubr.msk.bf16.mxu1 %vm856_vm0, %v855_v1 }
  0x42   :  { %396 = vmatmul.mubr.bf16.gmra.mrb[16].mxu0 %v853_v38 }
  0x43   :  { %806 = vmatmul.mubr.bf16.gmra.mrb[16].mxu1 %v854_v39 }
  0xf5   :  { %v730_v40 = vpop.f32.mrb[0].mxu0 }
  0xf6   :  { %v438_v41 = vpop.f32.mrb[0].mxu1  ;;  %v731_v42 = vpop.f32.mrb[1].mxu0 }
  0xf7   :  { %v732_v43 = vadd.f32 %v731_v42, %v730_v40  ;;  %v791_v44 = vpop.f32.mrb[1].mxu1  ;;  %v733_v45 = vpop.f32.mrb[2].mxu0 }
  0xf8   :  { %v441_v47 = vpop.f32.mrb[2].mxu1  ;;  %v734_v48 = vpop.f32.mrb[3].mxu0 }
  0xf9   :  { %v439_v49 = vadd.f32 %v732_v43, %v438_v41  ;;  %v735_v50 = vadd.f32 %v734_v48, %v733_v45  ;;  %v792_v51 = vpop.f32.mrb[3].mxu1 }
  0xfb   :  { %v515_v53 = vmul.f32 %v1015_v46, %v439_v49  ;;  %v442_v54 = vadd.f32 %v735_v50, %v441_v47 }
  0xfd   :  { %v530_v55 = vadd.f32 %v1020_v52, %v515_v53  ;;  %v516_v56 = vmul.f32 %v1015_v46, %v442_v54  ;;  %v736_v57 = vpop.f32.mrb[4].mxu0 }
  0xfe   :  { %v446_v58 = vpop.f32.mrb[4].mxu1  ;;  %v737_v59 = vpop.f32.mrb[5].mxu0 }
  0xff   :  { %v550_v60 = vmul.f32 0.01, %v530_v55  ;;  %v531_v61 = vadd.f32 %v1020_v52, %v516_v56  ;;  %v738_v62 = vadd.f32 %v737_v59, %v736_v57  ;;  %v795_v63 = vpop.f32.mrb[5].mxu1  ;;  %v739_v0 = vpop.f32.mrb[6].mxu0  ;;  %vm540_vm1 = vcmp.ge.f32.partialorder %v530_v55, 0.0 }
 0x100   :  { %v449_v1 = vpop.f32.mrb[6].mxu1  ;;  %v740_v2 = vpop.f32.mrb[7].mxu0 }
 0x101   :  { %vm541_vm2 = vcmp.ge.f32.partialorder %v531_v61, 0.0  ;;  %v551_v3 = vmul.f32 0.01, %v531_v61  ;;  %v447_v4 = vadd.f32 %v738_v62, %v446_v58  ;;  %v796_v5 = vpop.f32.mrb[7].mxu1  ;;  %v741_v6 = vadd.f32 %v740_v2, %v739_v0 }
 0x102   :  { %v560_v7 = vsel %vm540_vm1, %v530_v55, %v550_v60 }
 0x103   :  { %v561_v8 = vsel %vm541_vm2, %v531_v61, %v551_v3  ;;  %v517_v9 = vmul.f32 %v1015_v46, %v447_v4  ;;  %v450_v11 = vadd.f32 %v741_v6, %v449_v1 }
 0x104   :  { %v688_v10 = vpack.c.bf16 %v561_v8, %v560_v7 }
 0x105   :  { %v532_v12 = vadd.f32 %v1020_v52, %v517_v9  ;;  %v742_v13 = vpop.f32.mrb[8].mxu0  ;;  %v518_v14 = vmul.f32 %v1015_v46, %v450_v11 }
 0x106   :  { %689 = vst [vmem:[%s1060_s3] sm:$0xff] %v688_v10   ;;  %v454_v15 = vpop.f32.mrb[8].mxu1  ;;  %v743_v16 = vpop.f32.mrb[9].mxu0 }
 0x107   :  { %v744_v17 = vadd.f32 %v743_v16, %v742_v13  ;;  %v799_v18 = vpop.f32.mrb[9].mxu1  ;;  %v745_v19 = vpop.f32.mrb[10].mxu0  ;;  %v552_v20 = vmul.f32 0.01, %v532_v12  ;;  %v533_v21 = vadd.f32 %v1020_v52, %v518_v14  ;;  %vm542_vm3 = vcmp.ge.f32.partialorder %v532_v12, 0.0 }
 0x108   :  { %v457_v22 = vpop.f32.mrb[10].mxu1  ;;  %v746_v23 = vpop.f32.mrb[11].mxu0 }
 0x109   :  { %v455_v24 = vadd.f32 %v744_v17, %v454_v15  ;;  %v747_v25 = vadd.f32 %v746_v23, %v745_v19  ;;  %v800_v26 = vpop.f32.mrb[11].mxu1  ;;  %vm543_vm4 = vcmp.ge.f32.partialorder %v533_v21, 0.0  ;;  %v553_v27 = vmul.f32 0.01, %v533_v21 }
 0x10a   :  { %v562_v30 = vsel %vm542_vm3, %v532_v12, %v552_v20 }
 0x10b   :  { %v519_v28 = vmul.f32 %v1015_v46, %v455_v24  ;;  %v458_v29 = vadd.f32 %v747_v25, %v457_v22  ;;  %v563_v31 = vsel %vm543_vm4, %v533_v21, %v553_v27 }
 0x10c   :  { %v693_v32 = vpack.c.bf16 %v563_v31, %v562_v30 }
 0x10d   :  { %v534_v33 = vadd.f32 %v1020_v52, %v519_v28  ;;  %v520_v34 = vmul.f32 %v1015_v46, %v458_v29  ;;  %v748_v35 = vpop.f32.mrb[12].mxu0 }
 0x10e   :  { %v462_v36 = vpop.f32.mrb[12].mxu1  ;;  %v749_v37 = vpop.f32.mrb[13].mxu0  ;;  %710 = vst [vmem:[%s1060_s3 + $0x8] sm:$0xff] %v693_v32  }
 0x10f   :  { %v554_v38 = vmul.f32 0.01, %v534_v33  ;;  %v535_v39 = vadd.f32 %v1020_v52, %v520_v34  ;;  %v750_v40 = vadd.f32 %v749_v37, %v748_v35  ;;  %v803_v41 = vpop.f32.mrb[13].mxu1  ;;  %v751_v42 = vpop.f32.mrb[14].mxu0  ;;  %vm544_vm5 = vcmp.ge.f32.partialorder %v534_v33, 0.0 }
 0x110   :  { %v465_v43 = vpop.f32.mrb[14].mxu1  ;;  %v752_v44 = vpop.f32.mrb[15].mxu0 }
 0x111   :  { %vm545_vm6 = vcmp.ge.f32.partialorder %v535_v39, 0.0  ;;  %v555_v45 = vmul.f32 0.01, %v535_v39  ;;  %v463_v47 = vadd.f32 %v750_v40, %v462_v36  ;;  %v804_v48 = vpop.f32.mrb[15].mxu1  ;;  %v753_v49 = vadd.f32 %v752_v44, %v751_v42 }
 0x112   :  { %v564_v50 = vsel %vm544_vm5, %v534_v33, %v554_v38 }
 0x113   :  { %v565_v51 = vsel %vm545_vm6, %v535_v39, %v555_v45  ;;  %v521_v53 = vmul.f32 %v1015_v46, %v463_v47  ;;  %v466_v55 = vadd.f32 %v753_v49, %v465_v43 }
 0x114   :  { %v698_v54 = vpack.c.bf16 %v565_v51, %v564_v50 }
 0x115   :  { %v536_v56 = vadd.f32 %v1020_v52, %v521_v53  ;;  %v754_v57 = vpop.f32.mrb[16].mxu0  ;;  %v522_v58 = vmul.f32 %v1015_v46, %v466_v55 }
 0x116   :  { %711 = vst [vmem:[%s1060_s3 + $0x10] sm:$0xff] %v698_v54   ;;  %v470_v59 = vpop.f32.mrb[16].mxu1  ;;  %v755_v60 = vpop.f32.mrb[17].mxu0 }
 0x117   :  { %v756_v61 = vadd.f32 %v755_v60, %v754_v57  ;;  %v807_v62 = vpop.f32.mrb[17].mxu1  ;;  %v757_v63 = vpop.f32.mrb[18].mxu0  ;;  %v556_v0 = vmul.f32 0.01, %v536_v56  ;;  %v537_v1 = vadd.f32 %v1020_v52, %v522_v58  ;;  %vm546_vm7 = vcmp.ge.f32.partialorder %v536_v56, 0.0 }
 0x118   :  { %v473_v2 = vpop.f32.mrb[18].mxu1  ;;  %v758_v3 = vpop.f32.mrb[19].mxu0 }
 0x119   :  { %v471_v4 = vadd.f32 %v756_v61, %v470_v59  ;;  %v759_v5 = vadd.f32 %v758_v3, %v757_v63  ;;  %v808_v6 = vpop.f32.mrb[19].mxu1  ;;  %vm547_vm8 = vcmp.ge.f32.partialorder %v537_v1, 0.0  ;;  %v557_v7 = vmul.f32 0.01, %v537_v1 }
 0x11a   :  { %v566_v10 = vsel %vm546_vm7, %v536_v56, %v556_v0 }
 0x11b   :  { %v523_v8 = vmul.f32 %v1015_v46, %v471_v4  ;;  %v474_v9 = vadd.f32 %v759_v5, %v473_v2  ;;  %v567_v11 = vsel %vm547_vm8, %v537_v1, %v557_v7 }
 0x11c   :  { %v703_v12 = vpack.c.bf16 %v567_v11, %v566_v10 }
 0x11d   :  { %v538_v13 = vadd.f32 %v1020_v52, %v523_v8  ;;  %v524_v14 = vmul.f32 %v1015_v46, %v474_v9 }
 0x11e   :  { %712 = vst [vmem:[%s1060_s3 + $0x18] sm:$0xff] %v703_v12  }
 0x11f   :  { %v558_v15 = vmul.f32 0.01, %v538_v13  ;;  %v539_v16 = vadd.f32 %v1020_v52, %v524_v14  ;;  %vm548_vm9 = vcmp.ge.f32.partialorder %v538_v13, 0.0 }
 0x121   :  { %vm549_vm10 = vcmp.ge.f32.partialorder %v539_v16, 0.0  ;;  %v559_v17 = vmul.f32 0.01, %v539_v16  ;;  %v568_v18 = vsel %vm548_vm9, %v538_v13, %v558_v15 }
 0x123   :  { %v569_v19 = vsel %vm549_vm10, %v539_v16, %v559_v17 }
 0x124   :  { %v708_v20 = vpack.c.bf16 %v569_v19, %v568_v18 }
 0x126   :  { %713 = vst [vmem:[%s1060_s3 + $0x20] sm:$0xff] %v708_v20  }

// kernel: regressor_forward.8
= control target key start
LH: loop header
LB: loop body
LE: loop exit
PB: predicated region body
PF: predicated region fallthrough
CT: control target
= control target key end

     0   :  { %s1020_s1 = inlined_call_operand.vmem [shape: bf16[640,128], index: 1, kind: input, shape index: {}]   ;;  %s1021_s0 = inlined_call_operand.vmem [shape: bf16[32,640], index: 0, kind: input, shape index: {}]   ;;  %s1022_s2 = inlined_call_operand.vmem [shape: f32[8,128], index: 2, kind: input, shape index: {}]   ;;  %s1023_s3 = inlined_call_operand.vmem [shape: bf16[32,128], index: 3, kind: output, shape index: {}]  }
   0x1   :  { %v784_v0 = vld [vmem:[%s1020_s1 + $0x40] sm:$0xff]   ;;  %v788_v4 = vld [vmem:[%s1020_s1 + $0x48] sm:$0xff]   ;;  %v792_v8 = vld [vmem:[%s1020_s1 + $0x50] sm:$0xff]  }
   0x2   :  { %v785_v1 = vld [vmem:[%s1020_s1 + $0xc0] sm:$0xff]   ;;  %698 = vmatprep.subr.bf16.mxu0 %v784_v0  ;;  %v789_v5 = vld [vmem:[%s1020_s1 + $0xc8] sm:$0xff]   ;;  %v793_v9 = vld [vmem:[%s1020_s1 + $0xd0] sm:$0xff]  }
   0x3   :  { %v786_v2 = vld [vmem:[%s1020_s1] sm:$0xff]   ;;  %726 = vmatprep.subr.bf16.mxu1 %v785_v1  ;;  %v790_v6 = vld [vmem:[%s1020_s1 + $0x8] sm:$0xff]   ;;  %v794_v10 = vld [vmem:[%s1020_s1 + $0x10] sm:$0xff]  }
   0x4   :  { %v787_v3 = vld [vmem:[%s1020_s1 + $0x80] sm:$0xff]   ;;  %699 = vmatpush3.bf16.msra.mxu0 %v786_v2  ;;  %v791_v7 = vld [vmem:[%s1020_s1 + $0x88] sm:$0xff]   ;;  %v795_v11 = vld [vmem:[%s1020_s1 + $0x90] sm:$0xff]  }
   0x5   :  { %727 = vmatpush3.bf16.msra.mxu1 %v787_v3  ;;  %700 = vmatprep.subr.bf16.mxu0 %v788_v4  ;;  %v796_v12 = vld [vmem:[%s1020_s1 + $0x58] sm:$0xff]   ;;  %v800_v16 = vld [vmem:[%s1020_s1 + $0x60] sm:$0xff]   ;;  %v804_v20 = vld [vmem:[%s1020_s1 + $0x68] sm:$0xff]  }
   0x6   :  { %728 = vmatprep.subr.bf16.mxu1 %v789_v5  ;;  %v797_v13 = vld [vmem:[%s1020_s1 + $0xd8] sm:$0xff]   ;;  %v801_v17 = vld [vmem:[%s1020_s1 + $0xe0] sm:$0xff]   ;;  %v805_v21 = vld [vmem:[%s1020_s1 + $0xe8] sm:$0xff]  }
   0x7   :  { %v798_v14 = vld [vmem:[%s1020_s1 + $0x18] sm:$0xff]   ;;  %v802_v18 = vld [vmem:[%s1020_s1 + $0x20] sm:$0xff]   ;;  %v806_v22 = vld [vmem:[%s1020_s1 + $0x28] sm:$0xff]  }
   0x8   :  { %701 = vmatpush3.bf16.msra.mxu0 %v790_v6  ;;  %v799_v15 = vld [vmem:[%s1020_s1 + $0x98] sm:$0xff]   ;;  %v803_v19 = vld [vmem:[%s1020_s1 + $0xa0] sm:$0xff]   ;;  %v807_v23 = vld [vmem:[%s1020_s1 + $0xa8] sm:$0xff]  }
   0x9   :  { %729 = vmatpush3.bf16.msra.mxu1 %v791_v7  ;;  %702 = vmatprep.subr.bf16.mxu0 %v792_v8  ;;  %v808_v24 = vld [vmem:[%s1020_s1 + $0x70] sm:$0xff]   ;;  %v812_v28 = vld [vmem:[%s1020_s1 + $0x78] sm:$0xff]   ;;  %v821_v35 = vld [vmem:[%s1021_s0 + $0xc] ss:$20 sps:$4 sm:$0xff]  }
   0xa   :  { %730 = vmatprep.subr.bf16.mxu1 %v793_v9  ;;  %v809_v25 = vld [vmem:[%s1020_s1 + $0xf0] sm:$0xff]   ;;  %v813_v29 = vld [vmem:[%s1020_s1 + $0xf8] sm:$0xff]   ;;  %v822_v36 = vld [vmem:[%s1020_s1 + $0x100] sm:$0xff]   ;;  %492 = vmatprep.mubr.bf16.mxu1 %v821_v35 }
   0xb   :  { %v810_v26 = vld [vmem:[%s1020_s1 + $0x30] sm:$0xff]   ;;  %v814_v30 = vld [vmem:[%s1020_s1 + $0x38] sm:$0xff]   ;;  %v823_v37 = vld [vmem:[%s1020_s1 + $0x108] sm:$0xff]  }
   0xc   :  { %703 = vmatpush3.bf16.msra.mxu0 %v794_v10  ;;  %v811_v27 = vld [vmem:[%s1020_s1 + $0xb0] sm:$0xff]   ;;  %v815_v31 = vld [vmem:[%s1020_s1 + $0xb8] sm:$0xff]   ;;  %v827_v39 = vld [vmem:[%s1021_s0 + $0x2c] ss:$20 sps:$4 sm:$0xff]  }
   0xd   :  { %731 = vmatpush3.bf16.msra.mxu1 %v795_v11  ;;  %704 = vmatprep.subr.bf16.mxu0 %v796_v12  ;;  %v816_v32 = vld [vmem:[%s1021_s0] ss:$20 sps:$4 sm:$0xff]   ;;  %v818_v33 = vld [vmem:[%s1021_s0 + $0x4] ss:$20 sps:$4 sm:$0xff]   ;;  %v819_v34 = vld [vmem:[%s1021_s0 + $0x8] ss:$20 sps:$4 sm:$0xff]  }
   0xe   :  { %732 = vmatprep.subr.bf16.mxu1 %v797_v13  ;;  %443 = vmatprep.mubr.bf16.mxu0 %v818_v33  ;;  %v824_v38 = vld [vmem:[%s1020_s1 + $0x110] sm:$0xff]   ;;  %v825_v41 = vld [vmem:[%s1020_s1 + $0x118] sm:$0xff]   ;;  %v826_v45 = vld [vmem:[%s1020_s1 + $0x120] sm:$0xff]  }
   0xf   :  { %v829_v40 = vld [vmem:[%s1021_s0 + $0x34] ss:$20 sps:$4 sm:$0xff]   ;;  %v833_v43 = vld [vmem:[%s1021_s0 + $0x30] ss:$20 sps:$4 sm:$0xff]   ;;  %v835_v48 = vld [vmem:[%s1020_s1 + $0x138] sm:$0xff]  }
  0x10   :  { %705 = vmatpush3.bf16.msra.mxu0 %v798_v14  ;;  %v832_v42 = vld [vmem:[%s1021_s0 + $0x28] ss:$20 sps:$4 sm:$0xff]   ;;  %v836_v44 = vld [vmem:[%s1021_s0 + $0x10] ss:$20 sps:$4 sm:$0xff]   ;;  %v837_v49 = vld [vmem:[%s1021_s0 + $0x38] ss:$20 sps:$4 sm:$0xff]  }
  0x11   :  { %733 = vmatpush3.bf16.msra.mxu1 %v799_v15  ;;  %706 = vmatprep.subr.bf16.mxu0 %v800_v16  ;;  %v831_v46 = vld [vmem:[%s1020_s1 + $0x128] sm:$0xff]   ;;  %v834_v47 = vld [vmem:[%s1020_s1 + $0x130] sm:$0xff]   ;;  %v677_v15 = vld [vmem:[%s1022_s2] ss:$0 sm:$0xff] }
  0x12   :  { %734 = vmatprep.subr.bf16.mxu1 %v801_v17 }
  0x14   :  { %707 = vmatpush3.bf16.msra.mxu0 %v802_v18  ;;  %v678_v18 = vld [vmem:[%s1022_s2 + $0x1] ss:$0 sm:$0xff] }
  0x15   :  { %735 = vmatpush3.bf16.msra.mxu1 %v803_v19  ;;  %708 = vmatprep.subr.bf16.mxu0 %v804_v20 }
  0x16   :  { %736 = vmatprep.subr.bf16.mxu1 %v805_v21 }
  0x18   :  { %709 = vmatpush3.bf16.msra.mxu0 %v806_v22 }
  0x19   :  { %737 = vmatpush3.bf16.msra.mxu1 %v807_v23  ;;  %710 = vmatprep.subr.bf16.mxu0 %v808_v24 }
  0x1a   :  { %738 = vmatprep.subr.bf16.mxu1 %v809_v25 }
  0x1c   :  { %711 = vmatpush3.bf16.msra.mxu0 %v810_v26 }
  0x1d   :  { %739 = vmatpush3.bf16.msra.mxu1 %v811_v27  ;;  %712 = vmatprep.subr.bf16.mxu0 %v812_v28 }
  0x1e   :  { %740 = vmatprep.subr.bf16.mxu1 %v813_v29 }
  0x20   :  { %713 = vmatpush3.bf16.msra.mxu0 %v814_v30 }
  0x21   :  { %741 = vmatpush3.bf16.msra.mxu1 %v815_v31  ;;  %764 = vmatprep.subr.bf16.mxu0 %v822_v36 }
  0x23   :  { %444 = vmatmul.mubr.bf16.vlgmr.msra.gmra.mrb[0].mxu0 %v816_v32 }
  0x24   :  { %493 = vmatmul.mubr.bf16.vlgmr.msra.gmra.mrb[0].mxu1 %v819_v34  ;;  %765 = vmatpush3.bf16.msra.mxu0 %v822_v36 }
  0x25   :  { %766 = vmatprep.subr.bf16.mxu0 %v823_v37  ;;  %451 = vmatprep.mubr.bf16.mxu0 %v827_v39 }
  0x26   :  { %500 = vmatprep.mubr.bf16.mxu1 %v829_v40 }
  0x28   :  { %767 = vmatpush3.bf16.msra.mxu0 %v823_v37 }
  0x29   :  { %768 = vmatprep.subr.bf16.mxu0 %v824_v38 }
  0x2b   :  { %452 = vmatmul.mubr.bf16.gmra.mrb[4].mxu0 %v832_v42 }
  0x2c   :  { %501 = vmatmul.mubr.bf16.gmra.mrb[4].mxu1 %v833_v43  ;;  %769 = vmatpush3.bf16.msra.mxu0 %v824_v38 }
  0x2d   :  { %770 = vmatprep.subr.bf16.mxu0 %v825_v41  ;;  %780 = vmatprep.mubr.bf16.mxu0 %v836_v44 }
  0x30   :  { %771 = vmatpush3.bf16.msra.mxu0 %v825_v41 }
  0x31   :  { %772 = vmatprep.subr.bf16.mxu0 %v826_v45 }
  0x34   :  { %773 = vmatpush3.bf16.msra.mxu0 %v826_v45 }
  0x35   :  { %774 = vmatprep.subr.bf16.mxu0 %v831_v46 }
  0x38   :  { %775 = vmatpush3.bf16.msra.mxu0 %v831_v46 }
  0x39   :  { %776 = vmatprep.subr.bf16.mxu0 %v834_v47 }
  0x3c   :  { %777 = vmatpush3.bf16.msra.mxu0 %v834_v47 }
  0x3d   :  { %778 = vmatprep.subr.bf16.mxu0 %v835_v48 }
  0x40   :  { %779 = vmatpush3.bf16.msra.mxu0 %v835_v48 }
  0x43   :  { %781 = vmatmul.mubr.bf16.vlgmr.msra.gmra.mrb[8].mxu0 %v837_v49 }
  0xf6   :  { %v714_v50 = vpop.f32.mrb[0].mxu0 }
  0xf7   :  { %v742_v51 = vpop.f32.mrb[0].mxu1  ;;  %v715_v52 = vpop.f32.mrb[1].mxu0 }
  0xf8   :  { %v716_v53 = vadd.f32 %v715_v52, %v714_v50  ;;  %v743_v54 = vpop.f32.mrb[1].mxu1  ;;  %v717_v55 = vpop.f32.mrb[2].mxu0 }
  0xf9   :  { %v744_v56 = vadd.f32 %v743_v54, %v742_v51  ;;  %v745_v57 = vpop.f32.mrb[2].mxu1  ;;  %v718_v58 = vpop.f32.mrb[3].mxu0 }
  0xfa   :  { %v719_v59 = vadd.f32 %v718_v58, %v717_v55  ;;  %v746_v60 = vpop.f32.mrb[3].mxu1 }
  0xfb   :  { %v747_v61 = vadd.f32 %v746_v60, %v745_v57  ;;  %v495_v62 = vadd.f32 %v744_v56, %v716_v53 }
  0xfd   :  { %v498_v63 = vadd.f32 %v747_v61, %v719_v59 }
  0xfe   :  { %v720_v0 = vpop.f32.mrb[4].mxu0 }
  0xff   :  { %v748_v1 = vpop.f32.mrb[4].mxu1  ;;  %v721_v2 = vpop.f32.mrb[5].mxu0 }
 0x100   :  { %v722_v3 = vadd.f32 %v721_v2, %v720_v0  ;;  %v749_v4 = vpop.f32.mrb[5].mxu1  ;;  %v723_v5 = vpop.f32.mrb[6].mxu0 }
 0x101   :  { %v750_v6 = vadd.f32 %v749_v4, %v748_v1  ;;  %v751_v7 = vpop.f32.mrb[6].mxu1  ;;  %v724_v8 = vpop.f32.mrb[7].mxu0 }
 0x102   :  { %v725_v9 = vadd.f32 %v724_v8, %v723_v5  ;;  %v752_v10 = vpop.f32.mrb[7].mxu1 }
 0x103   :  { %v753_v11 = vadd.f32 %v752_v10, %v751_v7  ;;  %v503_v12 = vadd.f32 %v750_v6, %v722_v3 }
 0x105   :  { %v506_v13 = vadd.f32 %v753_v11, %v725_v9 }
 0x116   :  { %v782_v14 = vpop.f32.mrb[8].mxu0 }
 0x117   :  { %v552_v16 = vadd.f32 %v782_v14, %v503_v12  ;;  %v543_v17 = vpop.f32.mrb[9].mxu0 }
 0x118   :  { %v544_v19 = vadd.f32 %v543_v17, %v495_v62  ;;  %v783_v20 = vpop.f32.mrb[10].mxu0 }
 0x119   :  { %v580_v21 = vmul.f32 %v677_v15, %v552_v16  ;;  %v555_v22 = vadd.f32 %v783_v20, %v506_v13  ;;  %v546_v23 = vpop.f32.mrb[11].mxu0 }
 0x11a   :  { %v578_v24 = vmul.f32 %v677_v15, %v544_v19  ;;  %v547_v25 = vadd.f32 %v546_v23, %v498_v63 }
 0x11b   :  { %v589_v26 = vadd.f32 %v678_v18, %v580_v21  ;;  %v581_v27 = vmul.f32 %v677_v15, %v555_v22 }
 0x11c   :  { %v587_v28 = vadd.f32 %v678_v18, %v578_v24  ;;  %v579_v29 = vmul.f32 %v677_v15, %v547_v25 }
 0x11d   :  { %v597_v30 = vmul.f32 0.01, %v589_v26  ;;  %v590_v31 = vadd.f32 %v678_v18, %v581_v27  ;;  %vm593_vm0 = vcmp.ge.f32.partialorder %v589_v26, 0.0 }
 0x11e   :  { %v595_v32 = vmul.f32 0.01, %v587_v28  ;;  %v588_v33 = vadd.f32 %v678_v18, %v579_v29  ;;  %vm591_vm1 = vcmp.ge.f32.partialorder %v587_v28, 0.0 }
 0x11f   :  { %vm594_vm2 = vcmp.ge.f32.partialorder %v590_v31, 0.0  ;;  %v598_v34 = vmul.f32 0.01, %v590_v31  ;;  %v601_v36 = vsel %vm593_vm0, %v589_v26, %v597_v30 }
 0x120   :  { %vm592_vm3 = vcmp.ge.f32.partialorder %v588_v33, 0.0  ;;  %v596_v35 = vmul.f32 0.01, %v588_v33  ;;  %v599_v38 = vsel %vm591_vm1, %v587_v28, %v595_v32 }
 0x121   :  { %v602_v37 = vsel %vm594_vm2, %v590_v31, %v598_v34 }
 0x122   :  { %v695_v39 = vpack.c.bf16 %v602_v37, %v601_v36  ;;  %v600_v40 = vsel %vm592_vm3, %v588_v33, %v596_v35 }
 0x123   :  { %v690_v41 = vpack.c.bf16 %v600_v40, %v599_v38 }
 0x124   :  { %697 = vst [vmem:[%s1023_s3 + $0x8] sm:$0xff] %v695_v39  }
 0x125   :  { %691 = vst [vmem:[%s1023_s3] sm:$0xff] %v690_v41  }

// kernel: regressor_forward.9
= control target key start
LH: loop header
LB: loop body
LE: loop exit
PB: predicated region body
PF: predicated region fallthrough
CT: control target
= control target key end

     0   :  { %v1034_v35 = vmov 0   ;;  %vm1036_vm3 = vmmov 0   ;;  %s1323_s1 = inlined_call_operand.vmem [shape: bf16[256,128], index: 1, kind: input, shape index: {}]   ;;  %s1324_s0 = inlined_call_operand.vmem [shape: bf16[8,256], index: 0, kind: input, shape index: {}]   ;;  %s1325_s2 = inlined_call_operand.vmem [shape: bf16[128,256], index: 2, kind: input, shape index: {}]   ;;  %s1326_s3 = inlined_call_operand.vmem [shape: bf16[256,128], index: 3, kind: input, shape index: {}]   ;;  %s1327_s6 = inlined_call_operand.vmem [shape: f32[16,256], index: 6, kind: input, shape index: {}]   ;;  %s1328_s4 = inlined_call_operand.vmem [shape: bf16[128,128], index: 4, kind: input, shape index: {}]   ;;  %s1329_s5 = inlined_call_operand.vmem [shape: bf16[128,128], index: 5, kind: input, shape index: {}]   ;;  %s1330_s7 = inlined_call_operand.vmem [shape: f32[8,128], index: 7, kind: output, shape index: {}]  }
   0x1   :  { %v960_v0 = vld [vmem:[%s1323_s1 + $0x40] sm:$0xff]   ;;  %v962_v2 = vld [vmem:[%s1323_s1 + $0x48] sm:$0xff]   ;;  %v964_v4 = vld [vmem:[%s1323_s1 + $0x50] sm:$0xff]   ;;  %339 = vmatprep.mubr.bf16.mxu1 %v1034_v35 }
   0x2   :  { %v961_v1 = vld [vmem:[%s1323_s1] sm:$0xff]   ;;  %855 = vmatprep.subr.bf16.mxu0 %v960_v0  ;;  %v963_v3 = vld [vmem:[%s1323_s1 + $0x8] sm:$0xff]   ;;  %v965_v5 = vld [vmem:[%s1323_s1 + $0x10] sm:$0xff]   ;;  %v1035_v0 = vmov 0.0  }
   0x3   :  { %856 = vmatpush3.bf16.msra.mxu0 %v961_v1  ;;  %v966_v6 = vld [vmem:[%s1323_s1 + $0x58] sm:$0xff]   ;;  %v968_v8 = vld [vmem:[%s1323_s1 + $0x60] sm:$0xff]   ;;  %v970_v10 = vld [vmem:[%s1323_s1 + $0x68] sm:$0xff]  }
   0x4   :  { %857 = vmatprep.subr.bf16.mxu0 %v962_v2  ;;  %v967_v7 = vld [vmem:[%s1323_s1 + $0x18] sm:$0xff]   ;;  %v969_v9 = vld [vmem:[%s1323_s1 + $0x20] sm:$0xff]   ;;  %v971_v16 = vld [vmem:[%s1323_s1 + $0x28] sm:$0xff]  }
   0x5   :  { %v27_v11 = vld [vmem:[%s1324_s0] sm:$0xff]  ;;  %v981_v15 = vld [vmem:[%s1325_s2 + $0x14] ss:$8 sps:$4 sm:$0xff]   ;;  %v983_v19 = vld [vmem:[%s1325_s2 + $0x10] ss:$8 sps:$4 sm:$0xff]  }
   0x6   :  { %v788_v12 = vcombine.high %v27_v11, %v27_v11  ;;  %v978_v13 = vld [vmem:[%s1325_s2 + $0x4] ss:$8 sps:$4 sm:$0xff]   ;;  %v980_v14 = vld [vmem:[%s1325_s2] ss:$8 sps:$4 sm:$0xff]   ;;  %v972_v17 = vld [vmem:[%s1323_s1 + $0x70] sm:$0xff]   ;;  %v787_v26 = vcombine.low %v27_v11, %v27_v11 }
   0x7   :  { %858 = vmatpush3.bf16.msra.mxu0 %v963_v3  ;;  %307 = vmatprep.subr.bf16.mxu1 %v978_v13  ;;  %v973_v18 = vld [vmem:[%s1323_s1 + $0x30] sm:$0xff]   ;;  %v974_v20 = vld [vmem:[%s1323_s1 + $0x78] sm:$0xff]   ;;  %v984_v21 = vld [vmem:[%s1325_s2 + $0x24] ss:$8 sps:$4 sm:$0xff]  }
   0x8   :  { %859 = vmatprep.subr.bf16.mxu0 %v964_v4  ;;  %195 = vmatprep.mubr.bf16.mxu0 %v788_v12  ;;  %v986_v22 = vld [vmem:[%s1325_s2 + $0x20] ss:$8 sps:$4 sm:$0xff]   ;;  %v987_v23 = vld [vmem:[%s1325_s2 + $0x34] ss:$8 sps:$4 sm:$0xff]   ;;  %v989_v25 = vld [vmem:[%s1325_s2 + $0x30] ss:$8 sps:$4 sm:$0xff]  }
   0x9   :  { %308 = vmatpush1.bf16.msra.mxu1 %v980_v14  ;;  %v975_v24 = vld [vmem:[%s1323_s1 + $0x38] sm:$0xff]   ;;  %v990_v27 = vld [vmem:[%s1325_s2 + $0x44] ss:$8 sps:$4 sm:$0xff]   ;;  %v992_v28 = vld [vmem:[%s1325_s2 + $0x40] ss:$8 sps:$4 sm:$0xff]  }
   0xa   :  { %309 = vmatprep.subr.bf16.mxu1 %v981_v15  ;;  %v993_v29 = vld [vmem:[%s1325_s2 + $0x54] ss:$8 sps:$4 sm:$0xff]   ;;  %v995_v30 = vld [vmem:[%s1325_s2 + $0x50] ss:$8 sps:$4 sm:$0xff]   ;;  %v996_v31 = vld [vmem:[%s1325_s2 + $0x64] ss:$8 sps:$4 sm:$0xff]  }
   0xb   :  { %860 = vmatpush3.bf16.msra.mxu0 %v965_v5  ;;  %v998_v32 = vld [vmem:[%s1325_s2 + $0x60] ss:$8 sps:$4 sm:$0xff]   ;;  %v999_v33 = vld [vmem:[%s1325_s2 + $0x74] ss:$8 sps:$4 sm:$0xff]   ;;  %v1001_v34 = vld [vmem:[%s1325_s2 + $0x70] ss:$8 sps:$4 sm:$0xff]  }
   0xc   :  { %861 = vmatprep.subr.bf16.mxu0 %v966_v6  ;;  %v1002_v36 = vld [vmem:[%s1326_s3 + $0x40] sm:$0xff]   ;;  %v1004_v38 = vld [vmem:[%s1326_s3 + $0x48] sm:$0xff]   ;;  %v1006_v40 = vld [vmem:[%s1326_s3 + $0x50] sm:$0xff]   ;;  %v351_v6 = vlaneseq }
   0xd   :  { %310 = vmatpush1.bf16.msra.mxu1 %v983_v19  ;;  %v1003_v37 = vld [vmem:[%s1326_s3] sm:$0xff]   ;;  %v1005_v39 = vld [vmem:[%s1326_s3 + $0x8] sm:$0xff]   ;;  %v1007_v41 = vld [vmem:[%s1326_s3 + $0x10] sm:$0xff]  }
   0xe   :  { %311 = vmatprep.subr.bf16.mxu1 %v984_v21  ;;  %v1008_v42 = vld [vmem:[%s1326_s3 + $0x58] sm:$0xff]   ;;  %v1010_v44 = vld [vmem:[%s1326_s3 + $0x60] sm:$0xff]   ;;  %v1012_v58 = vld [vmem:[%s1326_s3 + $0x68] sm:$0xff]  }
   0xf   :  { %862 = vmatpush3.bf16.msra.mxu0 %v967_v7  ;;  %v1009_v43 = vld [vmem:[%s1326_s3 + $0x18] sm:$0xff]   ;;  %v1011_v45 = vld [vmem:[%s1326_s3 + $0x20] sm:$0xff]   ;;  %v1013_v59 = vld [vmem:[%s1326_s3 + $0x28] sm:$0xff]   ;;  %v352_v7 = vshrl.u32 %v351_v6, 7 }
  0x10   :  { %863 = vmatprep.subr.bf16.mxu0 %v968_v8  ;;  %v203_v48 = vld [vmem:[%s1327_s6] ss:$0 sm:$0xff]  ;;  %v205_v51 = vld [vmem:[%s1327_s6 + $0x1] ss:$0 sm:$0xff]  ;;  %v1014_v60 = vld [vmem:[%s1326_s3 + $0x70] sm:$0xff]  }
  0x11   :  { %312 = vmatpush1.bf16.msra.mxu1 %v986_v22  ;;  %v1015_v61 = vld [vmem:[%s1326_s3 + $0x30] sm:$0xff]   ;;  %v1016_v62 = vld [vmem:[%s1326_s3 + $0x78] sm:$0xff]   ;;  %v1018_v1 = vld [vmem:[%s1328_s4] sm:$0xff]   ;;  %v353_v8 = vsub.s32 0, %v352_v7 }
  0x12   :  { %313 = vmatprep.subr.bf16.mxu1 %v987_v23  ;;  %v1017_v63 = vld [vmem:[%s1326_s3 + $0x38] sm:$0xff]   ;;  %v1019_v2 = vld [vmem:[%s1328_s4 + $0x8] sm:$0xff]   ;;  %v1020_v3 = vld [vmem:[%s1328_s4 + $0x10] sm:$0xff]  }
  0x13   :  { %864 = vmatpush3.bf16.msra.mxu0 %v969_v9  ;;  %v1021_v4 = vld [vmem:[%s1328_s4 + $0x18] sm:$0xff]   ;;  %v1022_v5 = vld [vmem:[%s1328_s4 + $0x20] sm:$0xff]   ;;  %v1028_v35 = vld [vmem:[%s1329_s5 + $0x10] sm:$0xff]  }
  0x14   :  { %865 = vmatprep.subr.bf16.mxu0 %v970_v10  ;;  %v821_v9 = vld [vmem:[%s1327_s6 + $0x2] ss:$8 sm:$0x3]  ;;  %v357_v10 = vsub.s32 1, %v352_v7 }
  0x15   :  { %314 = vmatpush1.bf16.msra.mxu1 %v989_v25  ;;  %v822_v11 = vld [vmem:[%s1327_s6 + $0x3] ss:$8 sm:$0x3]  ;;  %v354_v12 = vrot.slane %v821_v9, %v353_v8 }
  0x16   :  { %315 = vmatprep.subr.bf16.mxu1 %v990_v27  ;;  %v358_v13 = vrot.slane %v821_v9, %v357_v10  ;;  %v369_v14 = vrot.slane %v822_v11, %v353_v8 }
  0x17   :  { %866 = vmatpush3.bf16.msra.mxu0 %v971_v16  ;;  %v373_v16 = vrot.slane %v822_v11, %v357_v10 }
  0x18   :  { %867 = vmatprep.subr.bf16.mxu0 %v972_v17 }
  0x19   :  { %316 = vmatpush1.bf16.msra.mxu1 %v992_v28 }
  0x1a   :  { %317 = vmatprep.subr.bf16.mxu1 %v993_v29 }
  0x1b   :  { %868 = vmatpush3.bf16.msra.mxu0 %v973_v18 }
  0x1c   :  { %869 = vmatprep.subr.bf16.mxu0 %v974_v20 }
  0x1d   :  { %318 = vmatpush1.bf16.msra.mxu1 %v995_v30  ;;  %v1023_v30 = vld [vmem:[%s1328_s4 + $0x28] sm:$0xff]  }
  0x1e   :  { %319 = vmatprep.subr.bf16.mxu1 %v996_v31  ;;  %v1024_v31 = vld [vmem:[%s1328_s4 + $0x30] sm:$0xff]  }
  0x1f   :  { %870 = vmatpush3.bf16.msra.mxu0 %v975_v24 }
  0x20   :  { %877 = vmatprep.subr.bf16.mxu0 %v1002_v36  ;;  %v1029_v36 = vld [vmem:[%s1329_s5 + $0x18] sm:$0xff]  }
  0x21   :  { %320 = vmatpush1.bf16.msra.mxu1 %v998_v32  ;;  %v1025_v32 = vld [vmem:[%s1328_s4 + $0x38] sm:$0xff]  }
  0x22   :  { %196 = vmatmul.mubr.bf16.vlgmr.msra.gmra.mrb[0].mxu0 %v787_v26  ;;  %321 = vmatprep.subr.bf16.mxu1 %v999_v33  ;;  %v1026_v33 = vld [vmem:[%s1329_s5] sm:$0xff]  }
  0x23   :  { %878 = vmatpush3.bf16.msra.mxu0 %v1003_v37  ;;  %v1030_v37 = vld [vmem:[%s1329_s5 + $0x20] sm:$0xff]  }
  0x24   :  { %879 = vmatprep.subr.bf16.mxu0 %v1004_v38  ;;  %v1031_v38 = vld [vmem:[%s1329_s5 + $0x28] sm:$0xff]  }
  0x25   :  { %322 = vmatpush1.bf16.msra.mxu1 %v1001_v34  ;;  %v1027_v34 = vld [vmem:[%s1329_s5 + $0x8] sm:$0xff]  }
  0x26   :  { %917 = vmatprep.subr.bf16.mxu1 %v1035_v0 }
  0x27   :  { %880 = vmatpush3.bf16.msra.mxu0 %v1005_v39 }
  0x28   :  { %881 = vmatprep.subr.bf16.mxu0 %v1006_v40 }
  0x2b   :  { %882 = vmatpush3.bf16.msra.mxu0 %v1007_v41  ;;  %v554_v41 = vld [vmem:[%s1327_s6 + $0x4] ss:$0 sm:$0xff] }
  0x2c   :  { %883 = vmatprep.subr.bf16.mxu0 %v1008_v42 }
  0x2f   :  { %884 = vmatpush3.bf16.msra.mxu0 %v1009_v43 }
  0x30   :  { %885 = vmatprep.subr.bf16.mxu0 %v1010_v44  ;;  %v556_v44 = vld [vmem:[%s1327_s6 + $0x5] ss:$0 sm:$0xff] }
  0x33   :  { %886 = vmatpush3.bf16.msra.mxu0 %v1011_v45 }
  0x34   :  { %887 = vmatprep.subr.bf16.mxu0 %v1012_v58 }
  0x37   :  { %888 = vmatpush3.bf16.msra.mxu0 %v1013_v59 }
  0x38   :  { %889 = vmatprep.subr.bf16.mxu0 %v1014_v60 }
  0x3b   :  { %890 = vmatpush3.bf16.msra.mxu0 %v1015_v61 }
  0x3c   :  { %891 = vmatprep.subr.bf16.mxu0 %v1016_v62 }
  0x3f   :  { %892 = vmatpush3.bf16.msra.mxu0 %v1017_v63 }
  0x40   :  { %937 = vmatprep.subr.bf16.mxu0 %v1035_v0 }
  0xf5   :  { %v871_v46 = vpop.f32.mrb[0].mxu0 }
  0xf6   :  { %v872_v47 = vpop.f32.mrb[1].mxu0 }
  0xf7   :  { %v873_v49 = vadd.f32 %v872_v47, %v871_v46  ;;  %v874_v50 = vpop.f32.mrb[2].mxu0 }
  0xf8   :  { %v875_v52 = vpop.f32.mrb[3].mxu0 }
  0xf9   :  { %v204_v53 = vmul.f32 %v873_v49, %v203_v48  ;;  %v1033_v52 = vld [vmem:[%s1329_s5 + $0x38] sm:$0xff]  }
  0xfb   :  { %v206_v54 = vadd.f32 %v205_v51, %v204_v53  ;;  %v1032_v51 = vld [vmem:[%s1329_s5 + $0x30] sm:$0xff]   ;;  %v666_v53 = vld [vmem:[%s1327_s6 + $0x6] ss:$0 sm:$0xff] }
  0xfd   :  { %vm207_vm0 = vcmp.ge.f32.partialorder %v206_v54, 0.0  ;;  %v208_v55 = vmul.f32 0.01, %v206_v54 }
  0xff   :  { %v209_v56 = vsel %vm207_vm0, %v206_v54, %v208_v55  ;;  %v668_v55 = vld [vmem:[%s1327_s6 + $0x7] ss:$0 sm:$0xff] }
 0x100   :  { %v210_v57 = vpack.c.bf16 %v209_v56, %v209_v56 }
 0x102   :  { %340 = vmatmul.mubr.bf16.vlgmr.msra.gmra.mrb[0].mxu1 %v210_v57 }
 0x103   :  { %918 = vmatpush3.bf16.msra.mxu1 %v1018_v1  ;;  %933 = vmatprep.mubr.msk.bf16.mxu1 %vm1036_vm3, %v1035_v0 }
 0x104   :  { %919 = vmatprep.subr.bf16.mxu1 %v1035_v0 }
 0x107   :  { %920 = vmatpush3.bf16.msra.mxu1 %v1019_v2  ;;  %v780_v2 = vld [vmem:[%s1327_s6 + $0x11] ss:$0 sm:$0xff] }
 0x108   :  { %921 = vmatprep.subr.bf16.mxu1 %v1035_v0 }
 0x10b   :  { %922 = vmatpush3.bf16.msra.mxu1 %v1020_v3 }
 0x10c   :  { %923 = vmatprep.subr.bf16.mxu1 %v1035_v0 }
 0x10f   :  { %924 = vmatpush3.bf16.msra.mxu1 %v1021_v4 }
 0x110   :  { %925 = vmatprep.subr.bf16.mxu1 %v1035_v0 }
 0x113   :  { %926 = vmatpush3.bf16.msra.mxu1 %v1022_v5 }
 0x114   :  { %927 = vmatprep.subr.bf16.mxu1 %v1035_v0 }
 0x117   :  { %928 = vmatpush3.bf16.msra.mxu1 %v1023_v30 }
 0x118   :  { %929 = vmatprep.subr.bf16.mxu1 %v1035_v0 }
 0x11b   :  { %930 = vmatpush3.bf16.msra.mxu1 %v1024_v31 }
 0x11c   :  { %931 = vmatprep.subr.bf16.mxu1 %v1035_v0 }
 0x11f   :  { %932 = vmatpush3.bf16.msra.mxu1 %v1025_v32 }
 0x1d5   :  { %v341_v15 = vpop.f32.mrb[0].mxu1 }
 0x1d6   :  { %v361_v17 = vmul.f32 %v354_v12, %v341_v15  ;;  %v343_v18 = vpop.f32.mrb[1].mxu1 }
 0x1d7   :  { %v362_v19 = vmul.f32 %v358_v13, %v343_v18  ;;  %v345_v20 = vpop.f32.mrb[2].mxu1 }
 0x1d8   :  { %v376_v21 = vadd.f32 %v369_v14, %v361_v17  ;;  %v346_v22 = vpop.f32.mrb[3].mxu1 }
 0x1d9   :  { %v377_v23 = vadd.f32 %v373_v16, %v362_v19 }
 0x1da   :  { %vm378_vm1 = vcmp.ge.f32.partialorder %v376_v21, 0.0  ;;  %v380_v24 = vmul.f32 0.01, %v376_v21 }
 0x1db   :  { %v381_v25 = vmul.f32 0.01, %v377_v23  ;;  %vm379_vm2 = vcmp.ge.f32.partialorder %v377_v23, 0.0 }
 0x1dc   :  { %v382_v26 = vsel %vm378_vm1, %v376_v21, %v380_v24 }
 0x1dd   :  { %v383_v27 = vsel %vm379_vm2, %v377_v23, %v381_v25  ;;  %v384_v29 = vpack.c.bf16 %v382_v26, %v382_v26 }
 0x1de   :  { %v385_v28 = vpack.c.bf16 %v383_v27, %v383_v27 }
 0x1e0   :  { %546 = vmatprep.mubr.bf16.mxu0 %v385_v28 }
 0x1e1   :  { %547 = vmatmul.mubr.bf16.vlgmr.msra.gmra.mrb[4].mxu0 %v384_v29 }
 0x1e2   :  { %953 = vmatprep.mubr.msk.bf16.mxu0 %vm1036_vm3, %v1035_v0  ;;  %938 = vmatpush3.bf16.msra.mxu0 %v1026_v33 }
 0x1e3   :  { %939 = vmatprep.subr.bf16.mxu0 %v1035_v0 }
 0x1e6   :  { %940 = vmatpush3.bf16.msra.mxu0 %v1027_v34 }
 0x1e7   :  { %941 = vmatprep.subr.bf16.mxu0 %v1035_v0 }
 0x1ea   :  { %942 = vmatpush3.bf16.msra.mxu0 %v1028_v35 }
 0x1eb   :  { %943 = vmatprep.subr.bf16.mxu0 %v1035_v0 }
 0x1ee   :  { %944 = vmatpush3.bf16.msra.mxu0 %v1029_v36 }
 0x1ef   :  { %945 = vmatprep.subr.bf16.mxu0 %v1035_v0 }
 0x1f2   :  { %946 = vmatpush3.bf16.msra.mxu0 %v1030_v37 }
 0x1f3   :  { %947 = vmatprep.subr.bf16.mxu0 %v1035_v0 }
 0x1f6   :  { %948 = vmatpush3.bf16.msra.mxu0 %v1031_v38 }
 0x1f7   :  { %949 = vmatprep.subr.bf16.mxu0 %v1035_v0 }
 0x1fa   :  { %950 = vmatpush3.bf16.msra.mxu0 %v1032_v51 }
 0x1fb   :  { %951 = vmatprep.subr.bf16.mxu0 %v1035_v0  ;;  %v778_v0 = vld [vmem:[%s1327_s6 + $0x10] ss:$0 sm:$0xff] }
 0x1fe   :  { %952 = vmatpush3.bf16.msra.mxu0 %v1033_v52 }
 0x2b4   :  { %v893_v39 = vpop.f32.mrb[4].mxu0 }
 0x2b5   :  { %v894_v40 = vpop.f32.mrb[5].mxu0 }
 0x2b6   :  { %v895_v42 = vadd.f32 %v894_v40, %v893_v39  ;;  %v896_v43 = vpop.f32.mrb[6].mxu0 }
 0x2b7   :  { %v897_v45 = vpop.f32.mrb[7].mxu0 }
 0x2b8   :  { %v555_v46 = vmul.f32 %v895_v42, %v554_v41 }
 0x2ba   :  { %v557_v47 = vadd.f32 %v556_v44, %v555_v46 }
 0x2bc   :  { %vm558_vm4 = vcmp.ge.f32.partialorder %v557_v47, 0.0  ;;  %v559_v48 = vmul.f32 0.01, %v557_v47 }
 0x2be   :  { %v560_v49 = vsel %vm558_vm4, %v557_v47, %v559_v48 }
 0x2bf   :  { %v561_v50 = vpack.c.bf16 %v560_v49, %v560_v49 }
 0x2c1   :  { %934 = vmatmul.mubr.bf16.vlgmr.msra.gmra.mrb[4].mxu1 %v561_v50 }
 0x394   :  { %v660_v54 = vpop.f32.mrb[4].mxu1 }
 0x395   :  { %v667_v56 = vmul.f32 %v666_v53, %v660_v54  ;;  %v935_v57 = vpop.f32.mrb[5].mxu1 }
 0x396   :  { %v663_v58 = vpop.f32.mrb[6].mxu1 }
 0x397   :  { %v669_v59 = vadd.f32 %v668_v55, %v667_v56  ;;  %v936_v60 = vpop.f32.mrb[7].mxu1 }
 0x399   :  { %vm670_vm5 = vcmp.ge.f32.partialorder %v669_v59, 0.0  ;;  %v671_v61 = vmul.f32 0.01, %v669_v59 }
 0x39b   :  { %v672_v62 = vsel %vm670_vm5, %v669_v59, %v671_v61 }
 0x39c   :  { %v673_v63 = vpack.c.bf16 %v672_v62, %v672_v62 }
 0x39e   :  { %954 = vmatmul.mubr.bf16.vlgmr.msra.gmra.mrb[8].mxu0 %v673_v63 }
 0x471   :  { %v772_v1 = vpop.f32.mrb[8].mxu0 }
 0x472   :  { %v779_v3 = vmul.f32 %v778_v0, %v772_v1  ;;  %v955_v4 = vpop.f32.mrb[9].mxu0 }
 0x473   :  { %v775_v5 = vpop.f32.mrb[10].mxu0 }
 0x474   :  { %v781_v6 = vadd.f32 %v780_v2, %v779_v3  ;;  %v956_v7 = vpop.f32.mrb[11].mxu0 }
 0x476   :  { %782 = vst [vmem:[%s1330_s7] sm:$0xff] %v781_v6 }

</bundles_post_ra>
